<compile_context>
chip_gen: v5e
topology: v5e:2x2
jax: 0.10.0
libtpu: 0.0.40
codegen_flags: <defaults>
</compile_context>

<pallas_src>
import functools

import numpy as np
import jax
import jax.numpy as jnp
from jax import lax
from jax.experimental import pallas as pl
from jax.experimental.pallas import tpu as pltpu


# ----------------------------- in-kernel helpers -----------------------------

def _concat_elu(t):
    """concat_elu(t) = elu(concat([t, -t], axis=-1)), branch-free (no inf)."""
    tp = jnp.maximum(t, 0.0)
    tn = jnp.minimum(t, 0.0)
    return jnp.concatenate(
        [tp + jnp.exp(tn) - 1.0,         # elu(t)
         -tn + jnp.exp(-tp) - 1.0],      # elu(-t)
        axis=-1)


def _shift_rows(u, n):
    """result[i] = u[i - n] for i >= n, else 0 (n is a static int >= 0)."""
    if n == 0:
        return u
    zeros = jnp.zeros((n, u.shape[1]), u.dtype)
    return jnp.concatenate([zeros, u[:-n, :]], axis=0)


def _causal_conv(u, w_ref, col_idx, width, Kh, Kw, n_out):
    """Causal (zero-padded top/left) KhxKw conv over one flattened image.

    u       : (M, Cin) activations, rows flattened as m = y*width + x
    w_ref   : Ref[(Kh*Kw, Cin, n_out)], tap t = kh*Kw + kw
              (== torch conv weight[:, :, kh, kw].T)
    col_idx : (M, Cin) int32 pixel-column index of each row
    One MXU matmul per tap, accumulated in f32; the spatial shift is a
    row-shift of the flattened image plus a column-boundary mask (no im2col,
    no HBM copies).  Kh = Kw = 1 reproduces a plain 1x1 Conv2d.
    """
    M = u.shape[0]
    acc = jnp.zeros((M, n_out), jnp.float32)
    for kh in range(Kh):
        for kw in range(Kw):
            dy = kh - (Kh - 1)            # <= 0
            dx = kw - (Kw - 1)            # <= 0
            shift = -(dy * width + dx)    # >= 0
            us = _shift_rows(u, shift)
            if dx < 0:
                us = jnp.where(col_idx >= -dx, us, 0.0)
            acc = acc + jnp.dot(us, w_ref[kh * Kw + kw],
                                preferred_element_type=jnp.float32)
    return acc


# -------------------------------- fused kernel -------------------------------

def _gated_res_kernel(*refs, H, W, Kh, Kw, C, has_a):
    """Whole GatedResLayer forward for one batch element, fully fused."""
    if has_a:
        (x_ref, a_ref, w1_ref, b1_ref, w1c_ref, b1c_ref,
         w2_ref, b2_ref, o_ref) = refs
    else:
        x_ref, w1_ref, b1_ref, w2_ref, b2_ref, o_ref = refs

    M = H * W
    two_c = 2 * C
    x = x_ref[0]                                              # (M, C)
    col_idx = lax.broadcasted_iota(jnp.int32, (M, two_c), 0) % W

    u = _concat_elu(x)                                        # (M, 2C), in-reg
    c1 = _causal_conv(u, w1_ref, col_idx, W, Kh, Kw, C) + b1_ref[...]
    if has_a:
        ua = _concat_elu(a_ref[0])                            # (M, 2Cs)
        c1 = c1 + jnp.dot(ua, w1c_ref[...],
                          preferred_element_type=jnp.float32) + b1c_ref[...]
    # TODO(synk): drop_rate > 0 (training-mode dropout RNG) not implemented.
    v = _concat_elu(c1)                                       # (M, 2C)
    c2 = _causal_conv(v, w2_ref, col_idx, W, Kh, Kw, two_c) + b2_ref[...]
    # TODO(synk): n_cond_classes / proj_y(y) conditioning not implemented.
    ga = c2[:, :C]
    gb = c2[:, C:]
    o_ref[0] = x + ga * (1.0 / (1.0 + jnp.exp(-gb)))          # gated residual


# --------------------------------- wrapper -----------------------------------

def _const_spec(arr):
    if arr.ndim == 2:
        return pl.BlockSpec(arr.shape, lambda b: (0, 0))
    return pl.BlockSpec(arr.shape, lambda b: (0, 0, 0))


def gated_res_layer(params, x_nchw, a_nchw=None):
    """x: (B, C, H, W) torch layout -> (B, C, H, W). One fused pallas_call."""
    Kh, Kw = params['kernel_size']
    x = jnp.transpose(x_nchw, (0, 2, 3, 1))                   # NHWC
    B, H, W, C = x.shape
    M = H * W
    has_a = a_nchw is not None

    inputs = [x.reshape(B, M, C)]
    in_specs = [pl.BlockSpec((1, M, C), lambda b: (b, 0, 0))]
    if has_a:
        a = jnp.transpose(a_nchw, (0, 2, 3, 1))
        Cs = a.shape[-1]
        inputs.append(a.reshape(B, M, Cs))
        in_specs.append(pl.BlockSpec((1, M, Cs), lambda b: (b, 0, 0)))

    def add_param(name):
        inputs.append(params[name])
        in_specs.append(_const_spec(params[name]))

    add_param('c1_w'); add_param('c1_b')
    if has_a:
        add_param('c1c_w'); add_param('c1c_b')
    add_param('c2_w'); add_param('c2_b')

    kernel = functools.partial(_gated_res_kernel, H=H, W=W, Kh=Kh, Kw=Kw,
                               C=C, has_a=has_a)
    out = pl.pallas_call(
        kernel,
        out_shape=jax.ShapeDtypeStruct((B, M, C), jnp.float32),
        grid=(B,),
        in_specs=in_specs,
        out_specs=pl.BlockSpec((1, M, C), lambda b: (b, 0, 0)),
        compiler_params=pltpu.CompilerParams(
            dimension_semantics=("parallel",)),   # both v7x TCs get work
    )(*inputs)
    return jnp.transpose(out.reshape(B, H, W, C), (0, 3, 1, 2))


# ------------------------------ parameter init -------------------------------

def init_gated_res_params(key, n_channels, kernel_size, shortcut_channels=None):
    """Plain weights (weight_norm is identity at init). Matmul-layout convs:
    conv weight stored as (Kh*Kw, Cin, Cout) == torch weight[:, :, kh, kw].T."""
    Kh, Kw = kernel_size
    C = n_channels
    ks = jax.random.split(key, 6)

    def w_init(k, fan_in, shape):
        return jax.random.normal(k, shape, jnp.float32) / np.sqrt(fan_in)

    p = {
        'kernel_size': kernel_size,
        'c1_w': w_init(ks[0], Kh * Kw * 2 * C, (Kh * Kw, 2 * C, C)),
        'c1_b': 0.01 * jax.random.normal(ks[1], (1, C), jnp.float32),
        'c2_w': w_init(ks[2], Kh * Kw * 2 * C, (Kh * Kw, 2 * C, 2 * C)),
        'c2_b': 0.01 * jax.random.normal(ks[3], (1, 2 * C), jnp.float32),
    }
    if shortcut_channels:
        p['c1c_w'] = w_init(ks[4], 2 * shortcut_channels,
                            (2 * shortcut_channels, C))
        p['c1c_b'] = 0.01 * jax.random.normal(ks[5], (1, C), jnp.float32)
    return p


# ------------------------- pure-JAX reference (check) -------------------------

def _concat_elu_ref(t):
    return jax.nn.elu(jnp.concatenate([t, -t], axis=-1))


def _causal_conv_ref(u, w, b, Kh, Kw):
    """Independent path: explicit spatial zero-pad top/left + per-tap einsum."""
    B, H, W, _ = u.shape
    Cout = w.shape[-1]
    up = jnp.pad(u, ((0, 0), (Kh - 1, 0), (Kw - 1, 0), (0, 0)))
    acc = jnp.zeros((B, H, W, Cout), jnp.float32)
    for kh in range(Kh):
        for kw in range(Kw):
            patch = up[:, kh:kh + H, kw:kw + W, :]
            acc = acc + jnp.einsum('bhwc,cd->bhwd', patch, w[kh * Kw + kw],
                                   precision=lax.Precision.HIGHEST)
    return acc + b.reshape(1, 1, 1, Cout)


def gated_res_layer_ref(params, x_nchw, a_nchw=None):
    Kh, Kw = params['kernel_size']
    x = jnp.transpose(x_nchw, (0, 2, 3, 1))
    C = x.shape[-1]
    c1 = _causal_conv_ref(_concat_elu_ref(x), params['c1_w'], params['c1_b'],
                          Kh, Kw)
    if a_nchw is not None:
        a = jnp.transpose(a_nchw, (0, 2, 3, 1))
        c1 = (c1 + jnp.einsum('bhwc,cd->bhwd', _concat_elu_ref(a),
                              params['c1c_w'],
                              precision=lax.Precision.HIGHEST)
              + params['c1c_b'].reshape(1, 1, 1, -1))
    v = _concat_elu_ref(c1)
    c2 = _causal_conv_ref(v, params['c2_w'], params['c2_b'], Kh, Kw)
    ga, gb = c2[..., :C], c2[..., C:]
    out = x + ga * jax.nn.sigmoid(gb)
    return jnp.transpose(out, (0, 3, 1, 2))


# ------------------------------------ main ------------------------------------

if __name__ == "__main__":
    B, H, W = 2, 16, 16
    n_channels = 64             # 2*C = 128 -> lane-dense MXU matmuls
    shortcut_channels = 32
    kernel_size = (2, 2)        # causal down-right conv (PixelSNAIL usage);
                                # (1, 1) reproduces the plain Conv2d(k=1) case

    key = jax.random.PRNGKey(0)
    kx, ka, kp = jax.random.split(key, 3)
    x = jax.random.normal(kx, (B, n_channels, H, W), jnp.float32)        # NCHW
    a = jax.random.normal(ka, (B, shortcut_channels, H, W), jnp.float32)
    params = init_gated_res_params(kp, n_channels, kernel_size,
                                   shortcut_channels=shortcut_channels)

    out_plain = jax.block_until_ready(gated_res_layer(params, x))        # a=None
    out_short = jax.block_until_ready(gated_res_layer(params, x, a))     # with a

    assert out_plain.shape == (B, n_channels, H, W), out_plain.shape
    assert out_short.shape == (B, n_channels, H, W), out_short.shape
    assert bool(jnp.all(jnp.isfinite(out_plain)))
    assert bool(jnp.all(jnp.isfinite(out_short)))

    ref_plain = gated_res_layer_ref(params, x)
    ref_short = gated_res_layer_ref(params, x, a)
    err_plain = float(jnp.max(jnp.abs(out_plain - ref_plain)))
    err_short = float(jnp.max(jnp.abs(out_short - ref_short)))
    assert err_plain < 2e-3 and err_short < 2e-3, (err_plain, err_short)

    print("KERNEL_OK")
</pallas_src>

<mosaic_0001>
module attributes {stable_mosaic.version = 11 : i64} {
  func.func @_gated_res_kernel(%arg0: i32, %arg1: memref<1x256x64xf32, #tpu.memory_space<vmem>>, %arg2: memref<4x128x64xf32, #tpu.memory_space<vmem>>, %arg3: memref<1x64xf32, #tpu.memory_space<vmem>>, %arg4: memref<4x128x128xf32, #tpu.memory_space<vmem>>, %arg5: memref<1x128xf32, #tpu.memory_space<vmem>>, %arg6: memref<1x256x64xf32, #tpu.memory_space<vmem>>) attributes {dimension_semantics = [#tpu.dimension_semantics<parallel>], iteration_bounds = array<i64: 2>, scalar_prefetch = 0 : i64, scratch_operands = 0 : i64, tpu.core_type = #tpu.core_type<tc>, window_params = [{transform_indices = @transform_0, window_bounds = array<i64: 1, 256, 64>}, {pipeline_mode = #tpu.pipeline_mode<synchronous>, transform_indices = @transform_1, window_bounds = array<i64: 4, 128, 64>}, {pipeline_mode = #tpu.pipeline_mode<synchronous>, transform_indices = @transform_2, window_bounds = array<i64: 1, 64>}, {pipeline_mode = #tpu.pipeline_mode<synchronous>, transform_indices = @transform_3, window_bounds = array<i64: 4, 128, 128>}, {pipeline_mode = #tpu.pipeline_mode<synchronous>, transform_indices = @transform_4, window_bounds = array<i64: 1, 128>}, {transform_indices = @transform_5, window_bounds = array<i64: 1, 256, 64>}]} {
    %c0 = arith.constant 0 : index
    %c0_0 = arith.constant 0 : index
    %c0_1 = arith.constant 0 : index
    %0 = vector.load %arg1[%c0, %c0_0, %c0_1] : memref<1x256x64xf32, #tpu.memory_space<vmem>>, vector<1x256x64xf32>
    %1 = vector.shape_cast %0 : vector<1x256x64xf32> to vector<256x64xf32>
    %2 = tpu.iota {dimensions = array<i32: 0>} : vector<256x128xi32>
    %c16_i32 = arith.constant 16 : i32
    %c0_i32 = arith.constant 0 : i32
    %3 = arith.cmpi eq, %c16_i32, %c0_i32 : i32
    %c1_i32 = arith.constant 1 : i32
    %4 = arith.select %3, %c1_i32, %c16_i32 : i32
    %5 = vector.broadcast %4 : i32 to vector<256x128xi32>
    %6 = arith.remsi %2, %5 : vector<256x128xi32>
    %c0_i32_2 = arith.constant 0 : i32
    %7 = vector.broadcast %c0_i32_2 : i32 to vector<256x128xi32>
    %8 = arith.cmpi ne, %6, %7 : vector<256x128xi32>
    %c0_i32_3 = arith.constant 0 : i32
    %9 = vector.broadcast %c0_i32_3 : i32 to vector<256x128xi32>
    %10 = arith.cmpi slt, %6, %9 : vector<256x128xi32>
    %c0_i32_4 = arith.constant 0 : i32
    %11 = arith.cmpi slt, %4, %c0_i32_4 : i32
    %12 = vector.broadcast %11 : i1 to vector<256x128xi1>
    %13 = vector.broadcast %12 : vector<256x128xi1> to vector<256x128xi1>
    %14 = arith.xori %10, %13 : vector<256x128xi1>
    %15 = arith.andi %14, %8 : vector<256x128xi1>
    %16 = vector.broadcast %4 : i32 to vector<256x128xi32>
    %17 = arith.addi %6, %16 : vector<256x128xi32>
    %18 = arith.select %15, %17, %6 : vector<256x128xi1>, vector<256x128xi32>
    %cst = arith.constant 0.000000e+00 : f32
    %19 = vector.broadcast %cst : f32 to vector<256x64xf32>
    %20 = arith.maximumf %1, %19 : vector<256x64xf32>
    %cst_5 = arith.constant 0.000000e+00 : f32
    %21 = vector.broadcast %cst_5 : f32 to vector<256x64xf32>
    %22 = arith.minimumf %1, %21 : vector<256x64xf32>
    %23 = math.exp %22 : vector<256x64xf32>
    %24 = arith.addf %20, %23 : vector<256x64xf32>
    %cst_6 = arith.constant 1.000000e+00 : f32
    %25 = vector.broadcast %cst_6 : f32 to vector<256x64xf32>
    %26 = arith.subf %24, %25 : vector<256x64xf32>
    %cst_7 = arith.constant 0.000000e+00 : f32
    %27 = vector.broadcast %cst_7 : f32 to vector<256x64xf32>
    %28 = arith.subf %27, %22 : vector<256x64xf32>
    %cst_8 = arith.constant 0.000000e+00 : f32
    %29 = vector.broadcast %cst_8 : f32 to vector<256x64xf32>
    %30 = arith.subf %29, %20 : vector<256x64xf32>
    %31 = math.exp %30 : vector<256x64xf32>
    %32 = arith.addf %28, %31 : vector<256x64xf32>
    %cst_9 = arith.constant 1.000000e+00 : f32
    %33 = vector.broadcast %cst_9 : f32 to vector<256x64xf32>
    %34 = arith.subf %32, %33 : vector<256x64xf32>
    %35 = tpu.concatenate %26, %34 in 1 : vector<256x64xf32>, vector<256x64xf32> -> vector<256x128xf32>
    %cst_10 = arith.constant 0.000000e+00 : f32
    %36 = vector.broadcast %cst_10 : f32 to vector<256x64xf32>
    %cst_11 = arith.constant 0.000000e+00 : f32
    %37 = vector.broadcast %cst_11 : f32 to vector<17x128xf32>
    %38 = vector.extract_strided_slice %35 {offsets = [0, 0], sizes = [239, 128], strides = [1, 1]} : vector<256x128xf32> to vector<239x128xf32>
    %39 = tpu.concatenate %37, %38 in 0 : vector<17x128xf32>, vector<239x128xf32> -> vector<256x128xf32>
    %c1_i32_12 = arith.constant 1 : i32
    %40 = vector.broadcast %c1_i32_12 : i32 to vector<256x128xi32>
    %41 = arith.cmpi sge, %18, %40 : vector<256x128xi32>
    %cst_13 = arith.constant 0.000000e+00 : f32
    %42 = vector.broadcast %cst_13 : f32 to vector<256x128xf32>
    %43 = arith.select %41, %39, %42 : vector<256x128xi1>, vector<256x128xf32>
    %c0_14 = arith.constant 0 : index
    %c0_15 = arith.constant 0 : index
    %c0_16 = arith.constant 0 : index
    %44 = vector.load %arg2[%c0_14, %c0_15, %c0_16] : memref<4x128x64xf32, #tpu.memory_space<vmem>>, vector<1x128x64xf32>
    %45 = vector.shape_cast %44 : vector<1x128x64xf32> to vector<128x64xf32>
    %cst_17 = arith.constant dense<0.000000e+00> : vector<256x64xf32>
    %46 = tpu.matmul %43, %45, %cst_17 {dimension_numbers = #tpu.dot_dimension_numbers<[1], [0], [0], [1], [0, 0, 1, 1], [], []>} : vector<256x128xf32>, vector<128x64xf32>, vector<256x64xf32> -> vector<256x64xf32>
    %47 = arith.addf %36, %46 : vector<256x64xf32>
    %cst_18 = arith.constant 0.000000e+00 : f32
    %48 = vector.broadcast %cst_18 : f32 to vector<16x128xf32>
    %49 = vector.extract_strided_slice %35 {offsets = [0, 0], sizes = [240, 128], strides = [1, 1]} : vector<256x128xf32> to vector<240x128xf32>
    %50 = tpu.concatenate %48, %49 in 0 : vector<16x128xf32>, vector<240x128xf32> -> vector<256x128xf32>
    %c1 = arith.constant 1 : index
    %c0_19 = arith.constant 0 : index
    %c0_20 = arith.constant 0 : index
    %51 = vector.load %arg2[%c1, %c0_19, %c0_20] : memref<4x128x64xf32, #tpu.memory_space<vmem>>, vector<1x128x64xf32>
    %52 = vector.shape_cast %51 : vector<1x128x64xf32> to vector<128x64xf32>
    %cst_21 = arith.constant dense<0.000000e+00> : vector<256x64xf32>
    %53 = tpu.matmul %50, %52, %cst_21 {dimension_numbers = #tpu.dot_dimension_numbers<[1], [0], [0], [1], [0, 0, 1, 1], [], []>} : vector<256x128xf32>, vector<128x64xf32>, vector<256x64xf32> -> vector<256x64xf32>
    %54 = arith.addf %47, %53 : vector<256x64xf32>
    %cst_22 = arith.constant 0.000000e+00 : f32
    %55 = vector.broadcast %cst_22 : f32 to vector<1x128xf32>
    %56 = vector.extract_strided_slice %35 {offsets = [0, 0], sizes = [255, 128], strides = [1, 1]} : vector<256x128xf32> to vector<255x128xf32>
    %57 = tpu.concatenate %55, %56 in 0 : vector<1x128xf32>, vector<255x128xf32> -> vector<256x128xf32>
    %c1_i32_23 = arith.constant 1 : i32
    %58 = vector.broadcast %c1_i32_23 : i32 to vector<256x128xi32>
    %59 = arith.cmpi sge, %18, %58 : vector<256x128xi32>
    %cst_24 = arith.constant 0.000000e+00 : f32
    %60 = vector.broadcast %cst_24 : f32 to vector<256x128xf32>
    %61 = arith.select %59, %57, %60 : vector<256x128xi1>, vector<256x128xf32>
    %c2 = arith.constant 2 : index
    %c0_25 = arith.constant 0 : index
    %c0_26 = arith.constant 0 : index
    %62 = vector.load %arg2[%c2, %c0_25, %c0_26] : memref<4x128x64xf32, #tpu.memory_space<vmem>>, vector<1x128x64xf32>
    %63 = vector.shape_cast %62 : vector<1x128x64xf32> to vector<128x64xf32>
    %cst_27 = arith.constant dense<0.000000e+00> : vector<256x64xf32>
    %64 = tpu.matmul %61, %63, %cst_27 {dimension_numbers = #tpu.dot_dimension_numbers<[1], [0], [0], [1], [0, 0, 1, 1], [], []>} : vector<256x128xf32>, vector<128x64xf32>, vector<256x64xf32> -> vector<256x64xf32>
    %65 = arith.addf %54, %64 : vector<256x64xf32>
    %c3 = arith.constant 3 : index
    %c0_28 = arith.constant 0 : index
    %c0_29 = arith.constant 0 : index
    %66 = vector.load %arg2[%c3, %c0_28, %c0_29] : memref<4x128x64xf32, #tpu.memory_space<vmem>>, vector<1x128x64xf32>
    %67 = vector.shape_cast %66 : vector<1x128x64xf32> to vector<128x64xf32>
    %cst_30 = arith.constant dense<0.000000e+00> : vector<256x64xf32>
    %68 = tpu.matmul %35, %67, %cst_30 {dimension_numbers = #tpu.dot_dimension_numbers<[1], [0], [0], [1], [0, 0, 1, 1], [], []>} : vector<256x128xf32>, vector<128x64xf32>, vector<256x64xf32> -> vector<256x64xf32>
    %69 = arith.addf %65, %68 : vector<256x64xf32>
    %c0_31 = arith.constant 0 : index
    %c0_32 = arith.constant 0 : index
    %70 = vector.load %arg3[%c0_31, %c0_32] : memref<1x64xf32, #tpu.memory_space<vmem>>, vector<1x64xf32>
    %71 = vector.broadcast %70 : vector<1x64xf32> to vector<256x64xf32>
    %72 = arith.addf %69, %71 : vector<256x64xf32>
    %cst_33 = arith.constant 0.000000e+00 : f32
    %73 = vector.broadcast %cst_33 : f32 to vector<256x64xf32>
    %74 = arith.maximumf %72, %73 : vector<256x64xf32>
    %cst_34 = arith.constant 0.000000e+00 : f32
    %75 = vector.broadcast %cst_34 : f32 to vector<256x64xf32>
    %76 = arith.minimumf %72, %75 : vector<256x64xf32>
    %77 = math.exp %76 : vector<256x64xf32>
    %78 = arith.addf %74, %77 : vector<256x64xf32>
    %cst_35 = arith.constant 1.000000e+00 : f32
    %79 = vector.broadcast %cst_35 : f32 to vector<256x64xf32>
    %80 = arith.subf %78, %79 : vector<256x64xf32>
    %cst_36 = arith.constant 0.000000e+00 : f32
    %81 = vector.broadcast %cst_36 : f32 to vector<256x64xf32>
    %82 = arith.subf %81, %76 : vector<256x64xf32>
    %cst_37 = arith.constant 0.000000e+00 : f32
    %83 = vector.broadcast %cst_37 : f32 to vector<256x64xf32>
    %84 = arith.subf %83, %74 : vector<256x64xf32>
    %85 = math.exp %84 : vector<256x64xf32>
    %86 = arith.addf %82, %85 : vector<256x64xf32>
    %cst_38 = arith.constant 1.000000e+00 : f32
    %87 = vector.broadcast %cst_38 : f32 to vector<256x64xf32>
    %88 = arith.subf %86, %87 : vector<256x64xf32>
    %89 = tpu.concatenate %80, %88 in 1 : vector<256x64xf32>, vector<256x64xf32> -> vector<256x128xf32>
    %cst_39 = arith.constant 0.000000e+00 : f32
    %90 = vector.broadcast %cst_39 : f32 to vector<256x128xf32>
    %cst_40 = arith.constant 0.000000e+00 : f32
    %91 = vector.broadcast %cst_40 : f32 to vector<17x128xf32>
    %92 = vector.extract_strided_slice %89 {offsets = [0, 0], sizes = [239, 128], strides = [1, 1]} : vector<256x128xf32> to vector<239x128xf32>
    %93 = tpu.concatenate %91, %92 in 0 : vector<17x128xf32>, vector<239x128xf32> -> vector<256x128xf32>
    %c1_i32_41 = arith.constant 1 : i32
    %94 = vector.broadcast %c1_i32_41 : i32 to vector<256x128xi32>
    %95 = arith.cmpi sge, %18, %94 : vector<256x128xi32>
    %cst_42 = arith.constant 0.000000e+00 : f32
    %96 = vector.broadcast %cst_42 : f32 to vector<256x128xf32>
    %97 = arith.select %95, %93, %96 : vector<256x128xi1>, vector<256x128xf32>
    %c0_43 = arith.constant 0 : index
    %c0_44 = arith.constant 0 : index
    %c0_45 = arith.constant 0 : index
    %98 = vector.load %arg4[%c0_43, %c0_44, %c0_45] : memref<4x128x128xf32, #tpu.memory_space<vmem>>, vector<1x128x128xf32>
    %99 = vector.shape_cast %98 : vector<1x128x128xf32> to vector<128x128xf32>
    %cst_46 = arith.constant dense<0.000000e+00> : vector<256x128xf32>
    %100 = tpu.matmul %97, %99, %cst_46 {dimension_numbers = #tpu.dot_dimension_numbers<[1], [0], [0], [1], [0, 0, 1, 1], [], []>} : vector<256x128xf32>, vector<128x128xf32>, vector<256x128xf32> -> vector<256x128xf32>
    %101 = arith.addf %90, %100 : vector<256x128xf32>
    %cst_47 = arith.constant 0.000000e+00 : f32
    %102 = vector.broadcast %cst_47 : f32 to vector<16x128xf32>
    %103 = vector.extract_strided_slice %89 {offsets = [0, 0], sizes = [240, 128], strides = [1, 1]} : vector<256x128xf32> to vector<240x128xf32>
    %104 = tpu.concatenate %102, %103 in 0 : vector<16x128xf32>, vector<240x128xf32> -> vector<256x128xf32>
    %c1_48 = arith.constant 1 : index
    %c0_49 = arith.constant 0 : index
    %c0_50 = arith.constant 0 : index
    %105 = vector.load %arg4[%c1_48, %c0_49, %c0_50] : memref<4x128x128xf32, #tpu.memory_space<vmem>>, vector<1x128x128xf32>
    %106 = vector.shape_cast %105 : vector<1x128x128xf32> to vector<128x128xf32>
    %cst_51 = arith.constant dense<0.000000e+00> : vector<256x128xf32>
    %107 = tpu.matmul %104, %106, %cst_51 {dimension_numbers = #tpu.dot_dimension_numbers<[1], [0], [0], [1], [0, 0, 1, 1], [], []>} : vector<256x128xf32>, vector<128x128xf32>, vector<256x128xf32> -> vector<256x128xf32>
    %108 = arith.addf %101, %107 : vector<256x128xf32>
    %cst_52 = arith.constant 0.000000e+00 : f32
    %109 = vector.broadcast %cst_52 : f32 to vector<1x128xf32>
    %110 = vector.extract_strided_slice %89 {offsets = [0, 0], sizes = [255, 128], strides = [1, 1]} : vector<256x128xf32> to vector<255x128xf32>
    %111 = tpu.concatenate %109, %110 in 0 : vector<1x128xf32>, vector<255x128xf32> -> vector<256x128xf32>
    %c1_i32_53 = arith.constant 1 : i32
    %112 = vector.broadcast %c1_i32_53 : i32 to vector<256x128xi32>
    %113 = arith.cmpi sge, %18, %112 : vector<256x128xi32>
    %cst_54 = arith.constant 0.000000e+00 : f32
    %114 = vector.broadcast %cst_54 : f32 to vector<256x128xf32>
    %115 = arith.select %113, %111, %114 : vector<256x128xi1>, vector<256x128xf32>
    %c2_55 = arith.constant 2 : index
    %c0_56 = arith.constant 0 : index
    %c0_57 = arith.constant 0 : index
    %116 = vector.load %arg4[%c2_55, %c0_56, %c0_57] : memref<4x128x128xf32, #tpu.memory_space<vmem>>, vector<1x128x128xf32>
    %117 = vector.shape_cast %116 : vector<1x128x128xf32> to vector<128x128xf32>
    %cst_58 = arith.constant dense<0.000000e+00> : vector<256x128xf32>
    %118 = tpu.matmul %115, %117, %cst_58 {dimension_numbers = #tpu.dot_dimension_numbers<[1], [0], [0], [1], [0, 0, 1, 1], [], []>} : vector<256x128xf32>, vector<128x128xf32>, vector<256x128xf32> -> vector<256x128xf32>
    %119 = arith.addf %108, %118 : vector<256x128xf32>
    %c3_59 = arith.constant 3 : index
    %c0_60 = arith.constant 0 : index
    %c0_61 = arith.constant 0 : index
    %120 = vector.load %arg4[%c3_59, %c0_60, %c0_61] : memref<4x128x128xf32, #tpu.memory_space<vmem>>, vector<1x128x128xf32>
    %121 = vector.shape_cast %120 : vector<1x128x128xf32> to vector<128x128xf32>
    %cst_62 = arith.constant dense<0.000000e+00> : vector<256x128xf32>
    %122 = tpu.matmul %89, %121, %cst_62 {dimension_numbers = #tpu.dot_dimension_numbers<[1], [0], [0], [1], [0, 0, 1, 1], [], []>} : vector<256x128xf32>, vector<128x128xf32>, vector<256x128xf32> -> vector<256x128xf32>
    %123 = arith.addf %119, %122 : vector<256x128xf32>
    %c0_63 = arith.constant 0 : index
    %c0_64 = arith.constant 0 : index
    %124 = vector.load %arg5[%c0_63, %c0_64] : memref<1x128xf32, #tpu.memory_space<vmem>>, vector<1x128xf32>
    %125 = vector.broadcast %124 : vector<1x128xf32> to vector<256x128xf32>
    %126 = arith.addf %123, %125 : vector<256x128xf32>
    %127 = vector.extract_strided_slice %126 {offsets = [0, 0], sizes = [256, 64], strides = [1, 1]} : vector<256x128xf32> to vector<256x64xf32>
    %128 = vector.extract_strided_slice %126 {offsets = [0, 64], sizes = [256, 64], strides = [1, 1]} : vector<256x128xf32> to vector<256x64xf32>
    %cst_65 = arith.constant 0.000000e+00 : f32
    %129 = vector.broadcast %cst_65 : f32 to vector<256x64xf32>
    %130 = arith.subf %129, %128 : vector<256x64xf32>
    %131 = math.exp %130 : vector<256x64xf32>
    %cst_66 = arith.constant 1.000000e+00 : f32
    %132 = vector.broadcast %cst_66 : f32 to vector<256x64xf32>
    %133 = arith.addf %132, %131 : vector<256x64xf32>
    %cst_67 = arith.constant 1.000000e+00 : f32
    %134 = vector.broadcast %cst_67 : f32 to vector<256x64xf32>
    %135 = arith.divf %134, %133 : vector<256x64xf32>
    %136 = arith.mulf %127, %135 : vector<256x64xf32>
    %137 = arith.addf %1, %136 : vector<256x64xf32>
    %c0_68 = arith.constant 0 : index
    %c0_69 = arith.constant 0 : index
    %c0_70 = arith.constant 0 : index
    %138 = vector.load %arg6[%c0_68, %c0_69, %c0_70] : memref<1x256x64xf32, #tpu.memory_space<vmem>>, vector<1x256x64xf32>
    %139 = vector.shape_cast %138 : vector<1x256x64xf32> to vector<256x64xf32>
    %140 = vector.shape_cast %137 : vector<256x64xf32> to vector<1x256x64xf32>
    tpu.vector_store %arg6[%c0_68, %c0_69, %c0_70], %140 {strides = array<i32>} : memref<1x256x64xf32, #tpu.memory_space<vmem>>, vector<1x256x64xf32>,
    return
  }
  func.func @transform_0(%arg0: i32) -> (i32, i32, i32) {
    %c0_i32 = arith.constant 0 : i32
    %c0_i32_0 = arith.constant 0 : i32
    %c0_i32_1 = arith.constant 0 : i32
    return %arg0, %c0_i32, %c0_i32_0 : i32, i32, i32
  }
  func.func @transform_1(%arg0: i32) -> (i32, i32, i32) {
    %c0_i32 = arith.constant 0 : i32
    %c0_i32_0 = arith.constant 0 : i32
    %c0_i32_1 = arith.constant 0 : i32
    %c0_i32_2 = arith.constant 0 : i32
    return %c0_i32, %c0_i32_0, %c0_i32_1 : i32, i32, i32
  }
  func.func @transform_2(%arg0: i32) -> (i32, i32) {
    %c0_i32 = arith.constant 0 : i32
    %c0_i32_0 = arith.constant 0 : i32
    %c0_i32_1 = arith.constant 0 : i32
    return %c0_i32, %c0_i32_0 : i32, i32
  }
  func.func @transform_3(%arg0: i32) -> (i32, i32, i32) {
    %c0_i32 = arith.constant 0 : i32
    %c0_i32_0 = arith.constant 0 : i32
    %c0_i32_1 = arith.constant 0 : i32
    %c0_i32_2 = arith.constant 0 : i32
    return %c0_i32, %c0_i32_0, %c0_i32_1 : i32, i32, i32
  }
  func.func @transform_4(%arg0: i32) -> (i32, i32) {
    %c0_i32 = arith.constant 0 : i32
    %c0_i32_0 = arith.constant 0 : i32
    %c0_i32_1 = arith.constant 0 : i32
    return %c0_i32, %c0_i32_0 : i32, i32
  }
  func.func @transform_5(%arg0: i32) -> (i32, i32, i32) {
    %c0_i32 = arith.constant 0 : i32
    %c0_i32_0 = arith.constant 0 : i32
    %c0_i32_1 = arith.constant 0 : i32
    return %arg0, %c0_i32, %c0_i32_0 : i32, i32, i32
  }
}

</mosaic_0001>

<bundles_post_ra>
// kernel: tpu_custom_call.1
= control target key start
LH: loop header
LB: loop body
LE: loop exit
PB: predicated region body
PF: predicated region fallthrough
CT: control target
= control target key end

     0   :  { %s5071_s18 = smov 0   ;;  %s7616_s0 = inlined_call_operand.vmem [shape: f32[2,256,64], index: 0, kind: input, shape index: {}]   ;;  %s7617_s1 = inlined_call_operand.vmem [shape: f32[4,128,64], index: 1, kind: input, shape index: {}]   ;;  %s7618_s2 = inlined_call_operand.vmem [shape: f32[1,64], index: 2, kind: input, shape index: {}]   ;;  %s7619_s3 = inlined_call_operand.vmem [shape: f32[4,128,128], index: 3, kind: input, shape index: {}]   ;;  %s7620_s4 = inlined_call_operand.vmem [shape: f32[1,128], index: 4, kind: input, shape index: {}]   ;;  %s7621_s5 = inlined_call_operand.vmem [shape: f32[2,256,64], index: 5, kind: output, shape index: {}]  }
   0x1 LB: > { %s4301_s19 = sadd.s32 4294967295, %s5037_s18   ;;  %p4305_p0 = scmp.ge.s32.totalorder %s5037_s18, 1  ;;  %s5037_s18 = sphi %s5071_s18, %s15_s18  }
   0x2   : > { %p187_p1 = scmp.lt.s32.totalorder %s5037_s18, 3 }
   0x4   : > { %p188_p2 = pnand %p4305_p0, %p187_p1 }
   0x5   : > { %p215_p3 = scmp.lt.s32.totalorder (!%p188_p2), %s4301_s19, 1  ;;  %s5039_s25 = smov (!%p188_p2), 64  }
   0x6   : > { %191 = sbr.rel (%p188_p2) target bundleno = 954 (0x3ba), region = 40 }
   0xb   : > { %s7786_s19 = smov (!%p215_p3, %s4301_s19), 1  ;;  %v4389_v29 = vld [vmem:[%s7617_s1 + $0xf8] sm:$0xff]  ;;  %v4388_v30 = vld [vmem:[%s7617_s1 + $0xf0] sm:$0xff]  ;;  %v4387_v36 = vld [vmem:[%s7617_s1 + $0xe8] sm:$0xff]  ;;  %vm7641_vm0 = vcmask 523264   ;;  %vm7640_vm1 = vcmask 1040384  }
   0xc   : > { %s4598_s20 = sshll.u32 %s7786_s19, 8  ;;  %1435 = vmatpush.msra.mxu0 %v4389_v29  ;;  %v1417_v33 = vld [vmem:[%s7617_s1 + $0x78] sm:$0xff]  ;;  %v1416_v37 = vld [vmem:[%s7617_s1 + $0x70] sm:$0xff]  ;;  %v1415_v42 = vld [vmem:[%s7617_s1 + $0x68] sm:$0xff] }
   0xd   : > { %s5087_s23 = scalar_lea.vmem %s7616_s0, %s4598_s20  ;;  %1548 = vmatpush.msra.mxu1 %v1417_v33  ;;  %v4386_v48 = vld [vmem:[%s7617_s1 + $0xe0] sm:$0xff]  ;;  %v4385_v59 = vld [vmem:[%s7617_s1 + $0xd8] sm:$0xff]  ;;  %v1411_v33 = vld [vmem:[%s7617_s1 + $0x48] sm:$0xff]  ;;  %s7260_s30 = scalar_lea.vmem %s7621_s5, %s4598_s20 }
   0xe   : > { %v5090_v0 = vld [vmem:[%s5087_s23] sm:$0xff]  ;;  %v5093_v1 = vld [vmem:[%s5087_s23 + $0x10] sm:$0xff]  ;;  %v5096_v2 = vld [vmem:[%s5087_s23 + $0x8] sm:$0xff]  ;;  %1436 = vmatpush.msra.mxu0 %v4388_v30 }
   0xf   : > { %v674_v3 = vmax.f32 %v5090_v0, 0.0  ;;  %v676_v4 = vmax.f32 %v5093_v1, 0.0  ;;  %v5101_v5 = vld [vmem:[%s5087_s23 + $0x18] sm:$0xff]  ;;  %v675_v6 = vmax.f32 %v5096_v2, 0.0  ;;  %v5110_v10 = vld [vmem:[%s5087_s23 + $0x30] sm:$0xff]  ;;  %v5115_v13 = vld [vmem:[%s5087_s23 + $0x20] sm:$0xff]  ;;  %1549 = vmatpush.msra.mxu1 %v1416_v37 }
  0x10   : > { %v677_v7 = vmax.f32 %v5101_v5, 0.0  ;;  %v706_v14 = vmin.f32 %v5090_v0, 0.0  ;;  %v708_v17 = vmin.f32 %v5093_v1, 0.0  ;;  %v680_v19 = vmax.f32 %v5110_v10, 0.0  ;;  %v5124_v22 = vld [vmem:[%s5087_s23 + $0x38] sm:$0xff]  ;;  %v5130_v25 = vld [vmem:[%s5087_s23 + $0x28] sm:$0xff]  ;;  %1437 = vmatpush.msra.mxu0 %v4387_v36 }
  0x11   : > { %v898_v8 = vsub.f32 0.0, %v674_v3  ;;  %v900_v9 = vsub.f32 0.0, %v676_v4  ;;  %v899_v12 = vsub.f32 0.0, %v675_v6  ;;  %v678_v21 = vmax.f32 %v5115_v13, 0.0  ;;  %v5159_v41 = vld [vmem:[%s5087_s23 + $0x48] sm:$0xff]  ;;  %v1414_v53 = vld [vmem:[%s7617_s1 + $0x60] sm:$0xff]  ;;  %1550 = vmatpush.msra.mxu1 %v1415_v42 }
  0x12   : > { %v901_v16 = vsub.f32 0.0, %v677_v7  ;;  %v707_v23 = vmin.f32 %v5096_v2, 0.0  ;;  %v904_v24 = vsub.f32 0.0, %v680_v19  ;;  %v866_v26 = vsub.f32 0.0, %v706_v14  ;;  %v5181_v58 = vld [vmem:[%s5087_s23 + $0x50] sm:$0xff]  ;;  %1438 = vmatpush.msra.mxu0 %v4386_v48  ;;  %v1413_v62 = vld [vmem:[%s7617_s1 + $0x58] sm:$0xff] }
  0x13   : > { %v930_v11 = vmul.f32 1.442695, %v898_v8  ;;  %v934_v15 = vmul.f32 1.442695, %v900_v9  ;;  %v932_v18 = vmul.f32 1.442695, %v899_v12  ;;  %1551 = vmatpush.msra.mxu1 %v1414_v53 }
  0x14   : > { %v936_v20 = vmul.f32 1.442695, %v901_v16  ;;  %v709_v27 = vmin.f32 %v5101_v5, 0.0  ;;  %v902_v28 = vsub.f32 0.0, %v678_v21  ;;  %v868_v31 = vsub.f32 0.0, %v708_v17  ;;  %v5190_v63 = vld [vmem:[%s5087_s23 + $0x40] sm:$0xff]  ;;  %1439 = vmatpush.msra.mxu0 %v4385_v59 }
  0x15   : > { %4612 = vpow2.f32 %v930_v11  ;;  %v681_v32 = vmax.f32 %v5124_v22, 0.0  ;;  %v679_v35 = vmax.f32 %v5130_v25, 0.0  ;;  %v942_v39 = vmul.f32 1.442695, %v904_v24  ;;  %v4452_v8 = vld [vmem:[%s7617_s1 + $0x1f8] sm:$0xff]  ;;  %v4384_v16 = vld [vmem:[%s7617_s1 + $0xd0] sm:$0xff]  ;;  %1552 = vmatpush.msra.mxu1 %v1413_v62 }
  0x16   : > { %4614 = vpow2.f32 %v934_v15  ;;  %v938_v34 = vmul.f32 1.442695, %v902_v28  ;;  %v867_v45 = vsub.f32 0.0, %v707_v23  ;;  %v869_v46 = vsub.f32 0.0, %v709_v27  ;;  %v4451_v28 = vld [vmem:[%s7617_s1 + $0x1f0] sm:$0xff]  ;;  %v4420_v29 = vld [vmem:[%s7617_s1 + $0x178] sm:$0xff]  ;;  %1880 = vmatpush.msra.mxu3 %v4452_v8  ;;  %1440 = vmatpush.msra.mxu0 %v4384_v16 }
  0x17   : > { %4616 = vpow2.f32 %v932_v18  ;;  %v905_v40 = vsub.f32 0.0, %v681_v32  ;;  %v712_v47 = vmin.f32 %v5110_v10, 0.0  ;;  %v710_v50 = vmin.f32 %v5115_v13, 0.0  ;;  %1718 = vmatpush.msra.mxu2 %v4420_v29  ;;  %v5225_v37 = vld [vmem:[%s5087_s23 + $0x60] sm:$0xff]  ;;  %v2770_v13 = vld [vmem:[%s7619_s3 + $0x78] sm:$0xff]  ;;  %v2769_v10 = vld [vmem:[%s7619_s3 + $0x70] sm:$0xff] }
  0x18   : > { %4618 = vpow2.f32 %v936_v20  ;;  %v903_v52 = vsub.f32 0.0, %v679_v35  ;;  %v713_v56 = vmin.f32 %v5124_v22, 0.0  ;;  %v683_v57 = vmax.f32 %v5159_v41, 0.0  ;;  %1881 = vmatpush.msra.mxu3 %v4451_v28  ;;  %v4449_v28 = vld [vmem:[%s7617_s1 + $0x1e0] sm:$0xff] }
  0x19   : > { %v944_v51 = vmul.f32 1.442695, %v905_v40  ;;  %4620 = vpow2.f32 %v938_v34  ;;  %v711_v12 = vmin.f32 %v5130_v25, 0.0  ;;  %v870_v20 = vsub.f32 0.0, %v710_v50  ;;  %v4417_v29 = vld [vmem:[%s7617_s1 + $0x160] sm:$0xff] }
  0x1a   : > { %4622 = vpow2.f32 %v942_v39  ;;  %v940_v61 = vmul.f32 1.442695, %v903_v52  ;;  %v907_v15 = vsub.f32 0.0, %v683_v57  ;;  %v684_v24 = vmax.f32 %v5181_v58, 0.0  ;;  %v4419_v39 = vld [vmem:[%s7617_s1 + $0x170] sm:$0xff] }
  0x1b   : > { %v4613_v38 = vpop.eup %4612  ;;  %4624 = vpow2.f32 %v944_v51  ;;  %v682_v30 = vmax.f32 %v5190_v63, 0.0  ;;  %1719 = vmatpush.msra.mxu2 %v4419_v39  ;;  %v716_v8 = vmin.f32 %v5181_v58, 0.0 }
  0x1c   : > { %v4615_v43 = vpop.eup %4614  ;;  %v994_v44 = vadd.f32 %v4613_v38, %v866_v26  ;;  %v1412_v26 = vld [vmem:[%s7617_s1 + $0x50] sm:$0xff]  ;;  %4626 = vpow2.f32 %v940_v61  ;;  %v948_v34 = vmul.f32 1.442695, %v907_v15  ;;  %v908_v36 = vsub.f32 0.0, %v684_v24  ;;  %v4450_v38 = vld [vmem:[%s7617_s1 + $0x1e8] sm:$0xff]  ;;  %v1409_v15 = vld [vmem:[%s7617_s1 + $0x38] sm:$0xff] }
  0x1d   : > { %v996_v49 = vadd.f32 %v4615_v43, %v868_v31  ;;  %v4617_v54 = vpop.eup %4616  ;;  %v4383_v31 = vld [vmem:[%s7617_s1 + $0xc8] sm:$0xff]  ;;  %v872_v43 = vsub.f32 0.0, %v712_v47  ;;  %1553 = vmatpush.msra.mxu1 %v1412_v26  ;;  %v906_v53 = vsub.f32 0.0, %v682_v30  ;;  %v686_v61 = vmax.f32 %v5225_v37, 0.0  ;;  %1882 = vmatpush.msra.mxu3 %v4450_v38  ;;  %v1408_v38 = vld [vmem:[%s7617_s1 + $0x30] sm:$0xff] }
  0x1e   : > { %v4342_v55 = vadd.f32 -1.0, %v994_v44  ;;  %v4619_v9 = vpop.eup %4618  ;;  %v995_v11 = vadd.f32 %v4617_v54, %v867_v45  ;;  %v873_v44 = vsub.f32 0.0, %v713_v56  ;;  %v871_v45 = vsub.f32 0.0, %v711_v12  ;;  %1441 = vmatpush.msra.mxu0 %v4383_v31  ;;  %v1410_v54 = vld [vmem:[%s7617_s1 + $0x40] sm:$0xff]  ;;  %v5270_v31 = vld [vmem:[%s5087_s23 + $0x68] sm:$0xff] }
  0x1f   : > { %v4344_v60 = vadd.f32 -1.0, %v996_v49  ;;  %v997_v18 = vadd.f32 %v4619_v9, %v869_v46  ;;  %v4621_v40 = vpop.eup %4620  ;;  %v4382_v46 = vld [vmem:[%s7617_s1 + $0xc0] sm:$0xff]  ;;  %v950_v52 = vmul.f32 1.442695, %v908_v36  ;;  %1554 = vmatpush.msra.mxu1 %v1411_v33  ;;  %4628 = vpow2.f32 %v948_v34  ;;  %v4380_v36 = vld [vmem:[%s7617_s1 + $0xb0] sm:$0xff]  ;;  %1883 = vmatpush.msra.mxu3 %v4449_v28 }
  0x20   : > { %1090 = vrot.lane.b32.xlu0 %v4342_v55, %s5039_s25  ;;  %v4343_v42 = vadd.f32 -1.0, %v995_v11  ;;  %v4623_v48 = vpop.eup %4622  ;;  %v998_v51 = vadd.f32 %v4621_v40, %v870_v20  ;;  %v4418_v55 = vld [vmem:[%s7617_s1 + $0x168] sm:$0xff]  ;;  %v946_v9 = vmul.f32 1.442695, %v906_v53  ;;  %1442 = vmatpush.msra.mxu0 %v4382_v46  ;;  %v4381_v11 = vld [vmem:[%s7617_s1 + $0xb8] sm:$0xff]  ;;  %v714_v20 = vmin.f32 %v5190_v63, 0.0 }
  0x21   : > { %1094 = vrot.lane.b32.xlu1 %v4344_v60, %s5039_s25  ;;  %v4345_v49 = vadd.f32 -1.0, %v997_v18  ;;  %v4625_v59 = vpop.eup %4624  ;;  %v715_v60 = vmin.f32 %v5159_v41, 0.0  ;;  %1720 = vmatpush.msra.mxu2 %v4418_v55  ;;  %v1000_v18 = vadd.f32 %v4623_v48, %v872_v43  ;;  %4630 = vpow2.f32 %v950_v52  ;;  %v4448_v40 = vld [vmem:[%s7617_s1 + $0x1d8] sm:$0xff]  ;;  %v4447_v52 = vld [vmem:[%s7617_s1 + $0x1d0] sm:$0xff]  ;;  %v1406_v28 = vld [vmem:[%s7617_s1 + $0x20] sm:$0xff] }
  0x22   : > { %v4346_v62 = vadd.f32 -1.0, %v998_v51  ;;  %v4627_v16 = vpop.eup %4626  ;;  %1555 = vmatpush.msra.mxu1 %v1410_v54  ;;  %v910_v26 = vsub.f32 0.0, %v686_v61  ;;  %v1001_v33 = vadd.f32 %v4625_v59, %v873_v44  ;;  %4632 = vpow2.f32 %v946_v9  ;;  %1443 = vmatpush.msra.mxu0 %v4381_v11  ;;  %v4379_v44 = vld [vmem:[%s7617_s1 + $0xa8] sm:$0xff]  ;;  %v4415_v53 = vld [vmem:[%s7617_s1 + $0x150] sm:$0xff]  ;;  %v4378_v9 = vld [vmem:[%s7617_s1 + $0xa0] sm:$0xff] }
  0x23   : > { %v999_v34 = vadd.f32 %v4627_v16, %v871_v45  ;;  %v687_v39 = vmax.f32 %v5270_v31, 0.0  ;;  %v1407_v45 = vld [vmem:[%s7617_s1 + $0x28] sm:$0xff]  ;;  %1721 = vmatpush.msra.mxu2 %v4417_v29  ;;  %v4348_v48 = vadd.f32 -1.0, %v1000_v18  ;;  %v876_v51 = vsub.f32 0.0, %v716_v8  ;;  %1884 = vmatpush.msra.mxu3 %v4448_v40  ;;  %v5311_v16 = vld [vmem:[%s5087_s23 + $0x58] sm:$0xff] }
  0x24   : > { %1098 = vrot.lane.b32.xlu2 %v4346_v62, %s5039_s25  ;;  %1556 = vmatpush.msra.mxu1 %v1409_v15  ;;  %v954_v43 = vmul.f32 1.442695, %v910_v26  ;;  %v4349_v55 = vadd.f32 -1.0, %v1001_v33  ;;  %v874_v62 = vsub.f32 0.0, %v714_v20  ;;  %v4377_v26 = vld [vmem:[%s7617_s1 + $0x98] sm:$0xff]  ;;  %v685_v29 = vmax.f32 %v5311_v16, 0.0 }
  0x25   : > { %v911_v46 = vsub.f32 0.0, %v687_v39  ;;  %1444 = vmatpush.msra.mxu0 %v4380_v36  ;;  %v4629_v54 = vpop.eup %4628  ;;  %v4347_v59 = vadd.f32 -1.0, %v999_v34  ;;  %1885 = vmatpush.msra.mxu3 %v4447_v52  ;;  %v718_v34 = vmin.f32 %v5225_v37, 0.0  ;;  %v719_v36 = vmin.f32 %v5270_v31, 0.0  ;;  %v4414_v40 = vld [vmem:[%s7617_s1 + $0x148] sm:$0xff] }
  0x26   : > { %1557 = vmatpush.msra.mxu1 %v1408_v38  ;;  %4634 = vpow2.f32 %v954_v43  ;;  %v4446_v38 = vld [vmem:[%s7617_s1 + $0x1c8] sm:$0xff] }
  0x27   : > { %v956_v11 = vmul.f32 1.442695, %v911_v46  ;;  %v4631_v15 = vpop.eup %4630  ;;  %1445 = vmatpush.msra.mxu0 %v4379_v44  ;;  %v4376_v44 = vld [vmem:[%s7617_s1 + $0x90] sm:$0xff]  ;;  %v909_v46 = vsub.f32 0.0, %v685_v29  ;;  %v4375_v52 = vld [vmem:[%s7617_s1 + $0x88] sm:$0xff]  ;;  %1886 = vmatpush.msra.mxu3 %v4446_v38  ;;  %v4374_v38 = vld [vmem:[%s7617_s1 + $0x80] sm:$0xff] }
  0x28   : > { %1092 = vrot.lane.b32.xlu0 %v4343_v42, %s5039_s25  ;;  %v4416_v42 = vld [vmem:[%s7617_s1 + $0x158] sm:$0xff]  ;;  %1558 = vmatpush.msra.mxu1 %v1407_v45  ;;  %v4633_v18 = vpop.eup %4632 }
  0x29   : > { %1096 = vrot.lane.b32.xlu1 %v4345_v49, %s5039_s25  ;;  %v875_v49 = vsub.f32 0.0, %v715_v60  ;;  %1722 = vmatpush.msra.mxu2 %v4416_v42  ;;  %4636 = vpow2.f32 %v956_v11  ;;  %v1004_v42 = vadd.f32 %v4631_v15, %v876_v51  ;;  %v1002_v43 = vadd.f32 %v4633_v18, %v874_v62  ;;  %v1405_v45 = vld [vmem:[%s7617_s1 + $0x18] sm:$0xff] }
  0x2a   : > { %1446 = vmatpush.msra.mxu0 %v4378_v9  ;;  %1559 = vmatpush.msra.mxu1 %v1406_v28  ;;  %v5346_v51 = vld [vmem:[%s5087_s23 + $0x78] sm:$0xff]  ;;  %v878_v62 = vsub.f32 0.0, %v718_v34  ;;  %v879_v9 = vsub.f32 0.0, %v719_v36  ;;  %v717_v18 = vmin.f32 %v5311_v16, 0.0 }
  0x2b   : > { %1723 = vmatpush.msra.mxu2 %v4415_v53  ;;  %v1003_v33 = vadd.f32 %v4629_v54, %v875_v49  ;;  %v4413_v49 = vld [vmem:[%s7617_s1 + $0x140] sm:$0xff]  ;;  %v1404_v53 = vld [vmem:[%s7617_s1 + $0x10] sm:$0xff]  ;;  %v952_v54 = vmul.f32 1.442695, %v909_v46  ;;  %v4444_v11 = vld [vmem:[%s7617_s1 + $0x1b8] sm:$0xff]  ;;  %v4352_v28 = vadd.f32 -1.0, %v1004_v42 }
  0x2c   : > { %1100 = vrot.lane.b32.xlu2 %v4347_v59, %s5039_s25  ;;  %1447 = vmatpush.msra.mxu0 %v4377_v26  ;;  %v4412_v15 = vld [vmem:[%s7617_s1 + $0x138] sm:$0xff]  ;;  %v4635_v26 = vpop.eup %4634  ;;  %v4443_v46 = vld [vmem:[%s7617_s1 + $0x1b0] sm:$0xff] }
  0x2d   : > { %1724 = vmatpush.msra.mxu2 %v4414_v40  ;;  %v4351_v59 = vadd.f32 -1.0, %v1003_v33  ;;  %1560 = vmatpush.msra.mxu1 %v1405_v45  ;;  %v4350_v33 = vadd.f32 -1.0, %v1002_v43  ;;  %4638 = vpow2.f32 %v952_v54  ;;  %v1403_v45 = vld [vmem:[%s7617_s1 + $0x8] sm:$0xff]  ;;  %v1006_v43 = vadd.f32 %v4635_v26, %v878_v62  ;;  %v1402_v54 = vld [vmem:[%s7617_s1] sm:$0xff] }
  0x2e   : > { %1448 = vmatpush.msra.mxu0 %v4376_v44  ;;  %v4442_v62 = vld [vmem:[%s7617_s1 + $0x1a8] sm:$0xff] }
  0x2f   : > { %1725 = vmatpush.msra.mxu2 %v4413_v49  ;;  %v4637_v44 = vpop.eup %4636  ;;  %1561 = vmatpush.msra.mxu1 %v1404_v53  ;;  %v4411_v49 = vld [vmem:[%s7617_s1 + $0x130] sm:$0xff] }
  0x30   : > { %1102 = vrot.lane.b32.xlu0 %v4348_v48, %s5039_s25  ;;  %v4445_v48 = vld [vmem:[%s7617_s1 + $0x1c0] sm:$0xff]  ;;  %1449 = vmatpush.msra.mxu0 %v4375_v52  ;;  %v721_v52 = vmin.f32 %v5346_v51, 0.0  ;;  %v1007_v53 = vadd.f32 %v4637_v44, %v879_v9  ;;  %v4410_v9 = vld [vmem:[%s7617_s1 + $0x128] sm:$0xff] }
  0x31   : > { %1104 = vrot.lane.b32.xlu1 %v4349_v55, %s5039_s25  ;;  %v7630_v55 = vmax.f32 %v5346_v51, 0.0  ;;  %1887 = vmatpush.msra.mxu3 %v4445_v48  ;;  %v877_v48 = vsub.f32 0.0, %v717_v18 }
  0x32   : > { %1726 = vmatpush.msra.mxu2 %v4412_v15  ;;  %1450 = vmatpush.msra.mxu0 %v4374_v38  ;;  %v4354_v15 = vadd.f32 -1.0, %v1006_v43  ;;  %v4355_v38 = vadd.f32 -1.0, %v1007_v53  ;;  %v4408_v43 = vld [vmem:[%s7617_s1 + $0x118] sm:$0xff]  ;;  %v4438_v53 = vld [vmem:[%s7617_s1 + $0x188] sm:$0xff] }
  0x33   : > { %v913_v40 = vsub.f32 0.0, %v7630_v55  ;;  %1888 = vmatpush.msra.mxu3 %v4444_v11  ;;  %1562 = vmatpush.msra.mxu1 %v1403_v45  ;;  %v4639_v11 = vpop.eup %4638 }
  0x34   : > { %1106 = vrot.lane.b32.xlu2 %v4350_v33, %s5039_s25  ;;  %1727 = vmatpush.msra.mxu2 %v4411_v49  ;;  %v1005_v26 = vadd.f32 %v4639_v11, %v877_v48  ;;  %v881_v33 = vsub.f32 0.0, %v721_v52  ;;  %v4439_v48 = vld [vmem:[%s7617_s1 + $0x190] sm:$0xff] }
  0x35   : > { %v960_v42 = vmul.f32 1.442695, %v913_v40  ;;  %1889 = vmatpush.msra.mxu3 %v4443_v46  ;;  %1563 = vmatpush.msra.mxu1 %v1402_v54  ;;  %v4409_v40 = vld [vmem:[%s7617_s1 + $0x120] sm:$0xff]  ;;  %v4407_v49 = vld [vmem:[%s7617_s1 + $0x110] sm:$0xff] }
  0x36   : > { %v4353_v44 = vadd.f32 -1.0, %v1005_v26  ;;  %1728 = vmatpush.msra.mxu2 %v4410_v9  ;;  %v5433_v26 = vld [vmem:[%s5087_s23 + $0x70] sm:$0xff] }
  0x37   : > { %4640 = vpow2.f32 %v960_v42  ;;  %1890 = vmatpush.msra.mxu3 %v4442_v62  ;;  %v4440_v42 = vld [vmem:[%s7617_s1 + $0x198] sm:$0xff]  ;;  %v5427_v62 = vld [vmem:[%s5087_s23 + $0x80] sm:$0xff]  ;;  %2901 = vmatpush.msrb.mxu1 %v2770_v13 }
  0x38   : > { %1108 = vrot.lane.b32.xlu0 %v4351_v59, %s5039_s25  ;;  %v7622_v59 = vmov 0.0   ;;  %1729 = vmatpush.msra.mxu2 %v4409_v40  ;;  %v7627_v11 = vmax.f32 %v5427_v62, 0.0  ;;  %v4437_v40 = vld [vmem:[%s7617_s1 + $0x180] sm:$0xff] }
  0x39   : > { %1110 = vrot.lane.b32.xlu1 %v4352_v28, %s5039_s25  ;;  %1451 = vmatmul.f32.vlgmr.msra.gmra.mxu0 %v7622_v59  ;;  %v4441_v28 = vld [vmem:[%s7617_s1 + $0x1a0] sm:$0xff] }
  0x3a   : > { %1564 = vmatmul.f32.vlgmr.msra.gmra.mxu1 %v7622_v59  ;;  %1891 = vmatpush.msra.mxu3 %v4441_v28  ;;  %v914_v9 = vsub.f32 0.0, %v7627_v11  ;;  %v688_v28 = vmax.f32 %v5433_v26, 0.0 }
  0x3b   : > { %1730 = vmatpush.msra.mxu2 %v4408_v43  ;;  %2902 = vmatpush.msrb.mxu1 %v2769_v10 }
  0x3c   : > { %1112 = vrot.lane.b32.xlu2 %v4353_v44, %s5039_s25  ;;  %1892 = vmatpush.msra.mxu3 %v4440_v42  ;;  %v4406_v42 = vld [vmem:[%s7617_s1 + $0x108] sm:$0xff] }
  0x3d   : > { %v4641_v45 = vpop.eup %4640  ;;  %1731 = vmatpush.msra.mxu2 %v4407_v49 }
  0x3e   : > { %v1009_v46 = vadd.f32 %v4641_v45, %v881_v33  ;;  %1893 = vmatpush.msra.mxu3 %v4439_v48  ;;  %v722_v33 = vmin.f32 %v5427_v62, 0.0 }
  0x3f   : > { %1732 = vmatpush.msra.mxu2 %v4406_v42  ;;  %v746_v42 = vmul.f32 1.442695, %v710_v50 }
  0x40   : > { %1114 = vrot.lane.b32.xlu0 %v4354_v15, %s5039_s25  ;;  %v4357_v54 = vadd.f32 -1.0, %v1009_v46  ;;  %1894 = vmatpush.msra.mxu3 %v4438_v53  ;;  %v962_v15 = vmul.f32 1.442695, %v914_v9  ;;  %v882_v44 = vsub.f32 0.0, %v722_v33  ;;  %v4405_v46 = vld [vmem:[%s7617_s1 + $0x100] sm:$0xff]  ;;  %v5451_v53 = vld [vmem:[%s5087_s23 + $0x90] sm:$0xff] }
  0x41   : > { %1116 = vrot.lane.b32.xlu1 %v4355_v38, %s5039_s25  ;;  %1454 = vmatmul.f32.gmra.mxu0 %v7622_v59  ;;  %v912_v38 = vsub.f32 0.0, %v688_v28  ;;  %v720_v9 = vmin.f32 %v5433_v26, 0.0 }
  0x42   : > { %1567 = vmatmul.f32.gmra.mxu1 %v7622_v59  ;;  %4642 = vpow2.f32 %v962_v15  ;;  %1895 = vmatpush.msra.mxu3 %v4437_v40  ;;  %v742_v59 = vmul.f32 1.442695, %v708_v17 }
  0x43   : > { %v958_v43 = vmul.f32 1.442695, %v912_v38  ;;  %1733 = vmatpush.msra.mxu2 %v4405_v46  ;;  %v880_v38 = vsub.f32 0.0, %v720_v9 }
  0x45   : > { %4644 = vpow2.f32 %v958_v43  ;;  %v738_v43 = vmul.f32 1.442695, %v706_v14  ;;  %v748_v14 = vmul.f32 1.442695, %v711_v12  ;;  %v744_v12 = vmul.f32 1.442695, %v709_v27 }
  0x48   : > { %1120 = vrot.lane.b32.xlu0 %v4357_v54, %s5039_s25  ;;  %v4643_v45 = vpop.eup %4642  ;;  %v7625_v54 = vmax.f32 %v5451_v53, 0.0 }
  0x49   : > { %v1010_v48 = vadd.f32 %v4643_v45, %v882_v44 }
  0x4a   : > { %v916_v15 = vsub.f32 0.0, %v7625_v54 }
  0x4b   : > { %v4358_v49 = vadd.f32 -1.0, %v1010_v48  ;;  %v4645_v40 = vpop.eup %4644  ;;  %v5465_v48 = vld [vmem:[%s5087_s23 + $0x98] sm:$0xff] }
  0x4c   : > { %v966_v44 = vmul.f32 1.442695, %v916_v15  ;;  %v1008_v45 = vadd.f32 %v4645_v40, %v880_v38  ;;  %v7626_v15 = vmin.f32 %v5451_v53, 0.0  ;;  %v257_v38 = vlaneseq }
  0x4d   : > { %1122 = vrot.lane.b32.xlu1 %v4358_v49, %s5039_s25  ;;  %v7624_v49 = vmax.f32 %v5465_v48, 0.0 }
  0x4e   : > { %4646 = vpow2.f32 %v966_v44  ;;  %v4356_v46 = vadd.f32 -1.0, %v1008_v45  ;;  %v884_v40 = vsub.f32 0.0, %v7626_v15 }
  0x4f   : > { %4648 = vpow2.f32 %v746_v42  ;;  %v917_v50 = vsub.f32 0.0, %v7624_v49  ;;  %v5480_v42 = vshrl.u32 %v257_v38, 7 }
  0x50   : > { %1118 = vrot.lane.b32.xlu2 %v4356_v46, %s5039_s25  ;;  %4650 = vpow2.f32 %v738_v43  ;;  %v740_v46 = vmul.f32 1.442695, %v707_v23  ;;  %v5483_v43 = vld [vmem:[%s5087_s23 + $0x88] sm:$0xff]  ;;  %v4595_v23 = vld [vmem:[%s7619_s3 + $0x1f8] sm:$0xff] }
  0x51   : > { %v968_v45 = vmul.f32 1.442695, %v917_v50  ;;  %4652 = vpow2.f32 %v742_v59  ;;  %v4563_v50 = vld [vmem:[%s7619_s3 + $0x178] sm:$0xff]  ;;  %3233 = vmatpush.msrb.mxu3 %v4595_v23  ;;  %v750_v23 = vmul.f32 1.442695, %v712_v47 }
  0x52   : > { %3071 = vmatpush.msrb.mxu2 %v4563_v50 }
  0x53   : > { %4654 = vpow2.f32 %v968_v45  ;;  %v260_v45 = vadd.s32 16, %v5480_v42 }
  0x54   : > { %v4647_v44 = vpop.eup %4646  ;;  %4656 = vpow2.f32 %v748_v14  ;;  %v7628_v14 = vmax.f32 %v5483_v43, 0.0 }
  0x55   : > { %v1012_v17 = vadd.f32 %v4647_v44, %v884_v40  ;;  %v4649_v54 = vpop.eup %4648  ;;  %v7629_v40 = vmin.f32 %v5465_v48, 0.0  ;;  %4658 = vpow2.f32 %v740_v46 }
  0x56   : > { %v4651_v38 = vpop.eup %4650  ;;  %v915_v27 = vsub.f32 0.0, %v7628_v14  ;;  %v806_v15 = vadd.f32 %v4649_v54, %v678_v21  ;;  %4660 = vpow2.f32 %v744_v12  ;;  %v4532_v14 = vld [vmem:[%s7619_s3 + $0xf8] sm:$0xff]  ;;  %v308_v54 = vand.u32 15, %v260_v45  ;;  %v5514_v12 = vld [vmem:[%s5087_s23 + $0xa8] sm:$0xff] }
  0x57   : > { %v4360_v49 = vadd.f32 -1.0, %v1012_v17  ;;  %v4653_v44 = vpop.eup %4652  ;;  %v885_v17 = vsub.f32 0.0, %v7629_v40  ;;  %2788 = vmatpush.msrb.mxu0 %v4532_v14  ;;  %v695_v55 = vmax.f32 %v5514_v12, 0.0 }
  0x58   : > { %v964_v46 = vmul.f32 1.442695, %v915_v27  ;;  %v804_v47 = vadd.f32 %v4653_v44, %v676_v4  ;;  %vm5528_vm2 = vcmp.ge.s32.totalorder %v308_v54, 1 }
  0x59   : > { %1126 = vrot.lane.b32.xlu0 %v4360_v49, %s5039_s25  ;;  %v4655_v11 = vpop.eup %4654  ;;  %v802_v49 = vadd.f32 %v4651_v38, %v674_v3  ;;  %v4314_v3 = vadd.f32 -1.0, %v806_v15  ;;  %v723_v15 = vmin.f32 %v5483_v43, 0.0  ;;  %v919_v4 = vsub.f32 0.0, %v695_v55 }
  0x5a   : > { %v4657_v50 = vpop.eup %4656  ;;  %v1013_v21 = vadd.f32 %v4655_v11, %v885_v17  ;;  %4662 = vpow2.f32 %v964_v46  ;;  %v294_v11 = vand.u32 15, %v5480_v42  ;;  %v752_v17 = vmul.f32 1.442695, %v713_v56 }
  0x5b   : > { %v4659_v38 = vpop.eup %4658  ;;  %v4310_v27 = vadd.f32 -1.0, %v802_v49  ;;  %v807_v40 = vadd.f32 %v4657_v50, %v679_v35  ;;  %4664 = vpow2.f32 %v750_v23  ;;  %v883_v46 = vsub.f32 0.0, %v723_v15 }
  0x5c   : > { %v4361_v0 = vadd.f32 -1.0, %v1013_v21  ;;  %v4661_v45 = vpop.eup %4660  ;;  %v803_v44 = vadd.f32 %v4659_v38, %v675_v6  ;;  %v4312_v23 = vadd.f32 -1.0, %v804_v47  ;;  %v972_v21 = vmul.f32 1.442695, %v919_v4 }
  0x5d   : > { %v4315_v1 = vadd.f32 -1.0, %v807_v40  ;;  %vm5543_vm3 = vcmp.ge.s32.totalorder %v294_v11, 1  ;;  %v4562_v11 = vld [vmem:[%s7619_s3 + $0x170] sm:$0xff] }
  0x5e   : > { %1128 = vrot.lane.b32.xlu1 %v4361_v0, %s5039_s25  ;;  %4666 = vpow2.f32 %v972_v21  ;;  %v4311_v5 = vadd.f32 -1.0, %v803_v44  ;;  %3072 = vmatpush.msrb.mxu2 %v4562_v11 }
  0x5f   : > { %4668 = vpow2.f32 %v752_v17 }
  0x60   : > { %v4663_v56 = vpop.eup %4662 }
  0x61   : > { %v1011_v54 = vadd.f32 %v4663_v56, %v883_v46  ;;  %v4665_v38 = vpop.eup %4664  ;;  %v754_v46 = vmul.f32 1.442695, %v714_v20  ;;  %v262_v20 = vadd.s32 32, %v5480_v42 }
  0x63   : > { %v4359_v47 = vadd.f32 -1.0, %v1011_v54  ;;  %v808_v54 = vadd.f32 %v4665_v38, %v680_v19 }
  0x65   : > { %1124 = vrot.lane.b32.xlu2 %v4359_v47, %s5039_s25 }
  0x7e   : > { %v1099_v59 = vpop.permute.xlu2 %1098 }
  0x7f   : > { %v5535_v49 = vsel %vm7641_vm0, %v4314_v3, %v1099_v59  ;;  %v805_v59 = vadd.f32 %v4661_v45, %v677_v7  ;;  %v4594_v45 = vld [vmem:[%s7619_s3 + $0x1f0] sm:$0xff] }
  0x80   : > { %v1257_v0 = vrot.slane %v5535_v49, 7  ;;  %3234 = vmatpush.msrb.mxu3 %v4594_v45 }
  0x81   : > { %v4313_v4 = vadd.f32 -1.0, %v805_v59 }
  0x86   : > { %v1101_v14 = vpop.permute.xlu2 %1100 }
  0x87   : > { %v5541_v13 = vsel %vm7641_vm0, %v4315_v1, %v1101_v14  ;;  %v5553_v14 = vld [vmem:[%s5087_s23 + $0xb0] sm:$0xff] }
  0x88   : > { %v1259_v3 = vrot.slane %v5541_v13, 7  ;;  %v7631_v1 = vmax.f32 %v5553_v14, 0.0 }
  0x8a   : > { %v5569_v17 = vsel %vm7640_vm1, %v1257_v0, %v1259_v3  ;;  %v920_v44 = vsub.f32 0.0, %v7631_v1  ;;  %v4531_v1 = vld [vmem:[%s7619_s3 + $0xf0] sm:$0xff] }
  0x8b   : > { %2789 = vmatpush.msrb.mxu0 %v4531_v1 }
  0x92   : > { %v1091_v25 = vpop.permute.xlu0 %1090 }
  0x93   : > { %v1187_v40 = vsel %vm7641_vm0, %v4310_v27, %v1091_v25  ;;  %v1095_v50 = vpop.permute.xlu1 %1094  ;;  %v727_v25 = vmin.f32 %v5514_v12, 0.0 }
  0x94   : > { %1457 = vmatmul.f32.gmra.mxu0 %v1187_v40  ;;  %1896 = vmatmul.f32.vlgmr.msra.gmra.mxu3 %v1187_v40  ;;  %v1250_v2 = vrot.slane %v1187_v40, 7  ;;  %v1189_v7 = vsel %vm7641_vm0, %v4312_v23, %v1095_v50  ;;  %v4667_v23 = vpop.eup %4666 }
  0x95   : > { %v1253_v40 = vrot.slane %v1189_v7, 7  ;;  %v887_v50 = vsub.f32 0.0, %v727_v25  ;;  %v4669_v47 = vpop.eup %4668 }
  0x96   : > { %v1339_v27 = vsel %vm7640_vm1, 0.0, %v1250_v2  ;;  %v809_v1 = vadd.f32 %v4669_v47, %v681_v32 }
  0x97   : > { %4390 = vmatmul.msk.f32.gmra.mxu1 %vm5528_vm2, %v1339_v27  ;;  %4421 = vmatmul.msk.f32.vlgmr.msra.gmra.mxu2 %vm5543_vm3, %v1339_v27  ;;  %v974_v27 = vmul.f32 1.442695, %v920_v44  ;;  %v1015_v19 = vadd.f32 %v4667_v23, %v887_v50  ;;  %v4316_v23 = vadd.f32 -1.0, %v808_v54 }
  0x99   : > { %4670 = vpow2.f32 %v974_v27  ;;  %v4363_v44 = vadd.f32 -1.0, %v1015_v19  ;;  %v4317_v27 = vadd.f32 -1.0, %v809_v1  ;;  %v5634_v1 = vld [vmem:[%s5087_s23 + $0xc0] sm:$0xff] }
  0x9a   : > { %v1093_v56 = vpop.permute.xlu0 %1092  ;;  %4672 = vpow2.f32 %v754_v46  ;;  %v322_v46 = vand.u32 15, %v262_v20 }
  0x9b   : > { %v1188_v21 = vsel %vm7641_vm0, %v4311_v5, %v1093_v56  ;;  %v1097_v59 = vpop.permute.xlu1 %1096  ;;  %v5597_v56 = vld [vmem:[%s5087_s23 + $0xa0] sm:$0xff]  ;;  %1132 = vrot.lane.b32.xlu0 %v4363_v44, %s5039_s25 }
  0x9c   : > { %v1251_v11 = vrot.slane %v1188_v21, 7  ;;  %1460 = vmatmul.f32.gmra.mxu0 %v1188_v21  ;;  %1899 = vmatmul.f32.gmra.mxu3 %v1188_v21  ;;  %v5585_v45 = vsel %vm7641_vm0, %v4313_v4, %v1097_v59  ;;  %v694_v59 = vmax.f32 %v5597_v56, 0.0  ;;  %vm5619_vm4 = vcmp.ge.s32.totalorder %v322_v46, 1  ;;  %v4561_v46 = vld [vmem:[%s7619_s3 + $0x168] sm:$0xff] }
  0x9d   : > { %v1255_v38 = vrot.slane %v5585_v45, 7  ;;  %3073 = vmatpush.msrb.mxu2 %v4561_v46 }
  0x9e   : > { %v1252_v5 = vsel %vm7640_vm1, %v1250_v2, %v1251_v11  ;;  %v1254_v4 = vsel %vm7640_vm1, %v1251_v11, %v1253_v40  ;;  %v728_v2 = vmin.f32 %v5553_v14, 0.0  ;;  %v756_v11 = vmul.f32 1.442695, %v715_v60 }
  0x9f   : > { %1573 = vmatmul.f32.gmra.mxu1 %v1252_v5  ;;  %1737 = vmatmul.f32.gmra.mxu2 %v1252_v5  ;;  %v5600_v21 = vsel %vm7640_vm1, %v1253_v40, %v1255_v38  ;;  %v5603_v50 = vsel %vm7640_vm1, %v1255_v38, %v1257_v0  ;;  %v918_v54 = vsub.f32 0.0, %v694_v59  ;;  %v4671_v22 = vpop.eup %4670 }
  0xa0   : > { %v888_v0 = vsub.f32 0.0, %v728_v2  ;;  %v4673_v20 = vpop.eup %4672  ;;  %4674 = vpow2.f32 %v756_v11 }
  0xa1   : > { %v970_v44 = vmul.f32 1.442695, %v918_v54  ;;  %v810_v11 = vadd.f32 %v4673_v20, %v682_v30  ;;  %v758_v54 = vmul.f32 1.442695, %v716_v8  ;;  %v4530_v8 = vld [vmem:[%s7619_s3 + $0xe8] sm:$0xff] }
  0xa2   : > { %v1103_v40 = vpop.permute.xlu0 %1102  ;;  %v1016_v19 = vadd.f32 %v4671_v22, %v888_v0  ;;  %v698_v0 = vmax.f32 %v5634_v1, 0.0  ;;  %2790 = vmatpush.msrb.mxu0 %v4530_v8 }
  0xa3   : > { %v1105_v32 = vpop.permute.xlu1 %1104  ;;  %v5617_v47 = vsel %vm7641_vm0, %v4316_v23, %v1103_v40  ;;  %4676 = vpow2.f32 %v970_v44  ;;  %v1107_v40 = vpop.permute.xlu2 %1106  ;;  %v4318_v22 = vadd.f32 -1.0, %v810_v11  ;;  %v5677_v11 = vld [vmem:[%s5087_s23 + $0xc8] sm:$0xff] }
  0xa4   : > { %1463 = vmatmul.f32.gmra.mxu0 %v1189_v7  ;;  %1902 = vmatmul.f32.gmra.mxu3 %v1189_v7  ;;  %v1261_v60 = vrot.slane %v5617_v47, 7  ;;  %v5625_v38 = vsel %vm7641_vm0, %v4317_v27, %v1105_v32  ;;  %v4364_v7 = vadd.f32 -1.0, %v1016_v19  ;;  %v4593_v27 = vld [vmem:[%s7619_s3 + $0x1e8] sm:$0xff]  ;;  %v922_v63 = vsub.f32 0.0, %v698_v0 }
  0xa5   : > { %v1263_v5 = vrot.slane %v5625_v38, 7  ;;  %3235 = vmatpush.msrb.mxu3 %v4593_v27  ;;  %v5661_v30 = vsel %vm7641_vm0, %v4318_v22, %v1107_v40  ;;  %v2768_v19 = vld [vmem:[%s7619_s3 + $0x68] sm:$0xff]  ;;  %4678 = vpow2.f32 %v758_v54  ;;  %v699_v22 = vmax.f32 %v5677_v11, 0.0 }
  0xa6   : > { %v5631_v23 = vsel %vm7640_vm1, %v1259_v3, %v1261_v60  ;;  %1134 = vrot.lane.b32.xlu1 %v4364_v7, %s5039_s25  ;;  %v4675_v20 = vpop.eup %4674  ;;  %v1265_v44 = vrot.slane %v5661_v30, 7  ;;  %v978_v7 = vmul.f32 1.442695, %v922_v63  ;;  %2903 = vmatpush.msrb.mxu1 %v2768_v19 }
  0xa7   : > { %4391 = vmatmul.msk.f32.gmra.mxu1 %vm5619_vm4, %v1254_v4  ;;  %4422 = vmatmul.msk.f32.gmra.mxu2 %vm5528_vm2, %v1254_v4  ;;  %v5647_v3 = vsel %vm7640_vm1, %v1261_v60, %v1263_v5  ;;  %v726_v4 = vmin.f32 %v5597_v56, 0.0  ;;  %v264_v60 = vadd.s32 48, %v5480_v42  ;;  %v811_v40 = vadd.f32 %v4675_v20, %v683_v57 }
  0xa8   : > { %4680 = vpow2.f32 %v978_v7  ;;  %v760_v7 = vmul.f32 1.442695, %v717_v18 }
  0xa9   : > { %v886_v32 = vsub.f32 0.0, %v726_v4  ;;  %v4677_v46 = vpop.eup %4676  ;;  %v336_v63 = vand.u32 15, %v264_v60  ;;  %v4319_v19 = vadd.f32 -1.0, %v811_v40 }
  0xaa   : > { %v1109_v8 = vpop.permute.xlu0 %1108 }
  0xab   : > { %v1014_v27 = vadd.f32 %v4677_v46, %v886_v32  ;;  %v730_v32 = vmin.f32 %v5634_v1, 0.0  ;;  %v4679_v57 = vpop.eup %4678  ;;  %vm5697_vm5 = vcmp.ge.s32.totalorder %v336_v63, 1  ;;  %v4560_v63 = vld [vmem:[%s7619_s3 + $0x160] sm:$0xff] }
  0xac   : > { %1466 = vmatmul.f32.gmra.mxu0 %v5585_v45  ;;  %1905 = vmatmul.f32.gmra.mxu3 %v5585_v45  ;;  %v5674_v45 = vsel %vm7640_vm1, %v1263_v5, %v1265_v44  ;;  %v923_v5 = vsub.f32 0.0, %v699_v22 }
  0xad   : > { %v4362_v54 = vadd.f32 -1.0, %v1014_v27  ;;  %v890_v41 = vsub.f32 0.0, %v730_v32  ;;  %3074 = vmatpush.msrb.mxu2 %v4560_v63  ;;  %v2767_v63 = vld [vmem:[%s7619_s3 + $0x60] sm:$0xff] }
  0xae   : > { %v980_v20 = vmul.f32 1.442695, %v923_v5  ;;  %v4681_v60 = vpop.eup %4680  ;;  %v1111_v5 = vpop.permute.xlu1 %1110  ;;  %2904 = vmatpush.msrb.mxu1 %v2767_v63  ;;  %v764_v63 = vmul.f32 1.442695, %v719_v36 }
  0xaf   : > { %1579 = vmatmul.f32.gmra.mxu1 %v5600_v21  ;;  %1743 = vmatmul.f32.gmra.mxu2 %v5600_v21  ;;  %v5693_v21 = vsel %vm7641_vm0, %v4319_v19, %v1109_v8  ;;  %v1018_v27 = vadd.f32 %v4681_v60, %v890_v41  ;;  %v812_v8 = vadd.f32 %v4679_v57, %v684_v24 }
  0xb0   : > { %1130 = vrot.lane.b32.xlu2 %v4362_v54, %s5039_s25  ;;  %v1267_v18 = vrot.slane %v5693_v21, 7  ;;  %4682 = vpow2.f32 %v980_v20  ;;  %v5706_v54 = vld [vmem:[%s5087_s23 + $0xb8] sm:$0xff]  ;;  %v762_v20 = vmul.f32 1.442695, %v718_v34  ;;  %v4529_v34 = vld [vmem:[%s7619_s3 + $0xe0] sm:$0xff] }
  0xb1   : > { %4684 = vpow2.f32 %v760_v7  ;;  %v697_v19 = vmax.f32 %v5706_v54, 0.0  ;;  %v731_v7 = vmin.f32 %v5677_v11, 0.0  ;;  %2791 = vmatpush.msrb.mxu0 %v4529_v34 }
  0xb2   : > { %v5703_v40 = vsel %vm7640_vm1, %v1265_v44, %v1267_v18  ;;  %v4592_v44 = vld [vmem:[%s7619_s3 + $0x1e0] sm:$0xff] }
  0xb3   : > { %3236 = vmatpush.msrb.mxu3 %v4592_v44  ;;  %v921_v41 = vsub.f32 0.0, %v697_v19  ;;  %v891_v58 = vsub.f32 0.0, %v731_v7 }
  0xb4   : > { %1469 = vmatmul.f32.gmra.mxu0 %v5535_v49  ;;  %1908 = vmatmul.f32.gmra.mxu3 %v5535_v49  ;;  %v4366_v49 = vadd.f32 -1.0, %v1018_v27 }
  0xb5   : > { %v976_v60 = vmul.f32 1.442695, %v921_v41 }
  0xb6   : > { %1138 = vrot.lane.b32.xlu0 %v4366_v49, %s5039_s25  ;;  %v4683_v24 = vpop.eup %4682  ;;  %v266_v49 = vadd.s32 64, %v5480_v42 }
  0xb7   : > { %4392 = vmatmul.msk.f32.gmra.mxu1 %vm5697_vm5, %v5603_v50  ;;  %4423 = vmatmul.msk.f32.gmra.mxu2 %vm5619_vm4, %v5603_v50  ;;  %v4320_v50 = vadd.f32 -1.0, %v812_v8  ;;  %v4685_v27 = vpop.eup %4684  ;;  %v1019_v44 = vadd.f32 %v4683_v24, %v891_v58  ;;  %4686 = vpow2.f32 %v976_v60  ;;  %v1113_v60 = vpop.permute.xlu2 %1112 }
  0xb8   : > { %4688 = vpow2.f32 %v762_v20  ;;  %v813_v41 = vadd.f32 %v4685_v27, %v685_v29  ;;  %v350_v24 = vand.u32 15, %v266_v49  ;;  %v729_v20 = vmin.f32 %v5706_v54, 0.0 }
  0xb9   : > { %v5732_v57 = vsel %vm7641_vm0, %v4320_v50, %v1111_v5  ;;  %v4367_v5 = vadd.f32 -1.0, %v1019_v44  ;;  %v5748_v50 = vld [vmem:[%s5087_s23 + $0xd8] sm:$0xff] }
  0xba   : > { %v1269_v8 = vrot.slane %v5732_v57, 7  ;;  %v7632_v58 = vmax.f32 %v5748_v50, 0.0  ;;  %v4321_v34 = vadd.f32 -1.0, %v813_v41  ;;  %v889_v16 = vsub.f32 0.0, %v729_v20 }
  0xbb   : > { %1140 = vrot.lane.b32.xlu1 %v4367_v5, %s5039_s25  ;;  %vm5768_vm6 = vcmp.ge.s32.totalorder %v350_v24, 1  ;;  %v4591_v24 = vld [vmem:[%s7619_s3 + $0x1d8] sm:$0xff] }
  0xbc   : > { %1472 = vmatmul.f32.gmra.mxu0 %v5541_v13  ;;  %1911 = vmatmul.f32.gmra.mxu3 %v5541_v13  ;;  %v5745_v13 = vsel %vm7640_vm1, %v1267_v18, %v1269_v8  ;;  %v925_v18 = vsub.f32 0.0, %v7632_v58 }
  0xbd   : > { %v4687_v29 = vpop.eup %4686  ;;  %3237 = vmatpush.msrb.mxu3 %v4591_v24 }
  0xbe   : > { %v984_v27 = vmul.f32 1.442695, %v925_v18  ;;  %v4689_v49 = vpop.eup %4688  ;;  %v1017_v5 = vadd.f32 %v4687_v29, %v889_v16  ;;  %v1115_v18 = vpop.permute.xlu0 %1114  ;;  %v766_v29 = vmul.f32 1.442695, %v720_v9  ;;  %v4528_v9 = vld [vmem:[%s7619_s3 + $0xd8] sm:$0xff] }
  0xbf   : > { %1585 = vmatmul.f32.gmra.mxu1 %v5569_v17  ;;  %1749 = vmatmul.f32.gmra.mxu2 %v5569_v17  ;;  %v5764_v17 = vsel %vm7641_vm0, %v4321_v34, %v1113_v60  ;;  %v5777_v60 = vld [vmem:[%s5087_s23 + $0xe0] sm:$0xff] }
  0xc0   : > { %v1271_v36 = vrot.slane %v5764_v17, 7  ;;  %4690 = vpow2.f32 %v984_v27  ;;  %v4365_v41 = vadd.f32 -1.0, %v1017_v5  ;;  %v7633_v34 = vmax.f32 %v5777_v60, 0.0  ;;  %2792 = vmatpush.msrb.mxu0 %v4528_v9 }
  0xc1   : > { %4692 = vpow2.f32 %v764_v63  ;;  %v733_v63 = vmin.f32 %v5748_v50, 0.0 }
  0xc2   : > { %v5774_v58 = vsel %vm7640_vm1, %v1269_v8, %v1271_v36  ;;  %v814_v8 = vadd.f32 %v4689_v49, %v686_v61  ;;  %1136 = vrot.lane.b32.xlu2 %v4365_v41, %s5039_s25  ;;  %v926_v16 = vsub.f32 0.0, %v7633_v34  ;;  %v268_v41 = vadd.s32 80, %v5480_v42 }
  0xc3   : > { %v893_v37 = vsub.f32 0.0, %v733_v63  ;;  %v792_v11 = vmul.f32 1.442695, %v733_v63 }
  0xc4   : > { %1475 = vmatmul.f32.gmra.mxu0 %v5617_v47  ;;  %1914 = vmatmul.f32.gmra.mxu3 %v5617_v47  ;;  %v4559_v47 = vld [vmem:[%s7619_s3 + $0x158] sm:$0xff]  ;;  %v986_v49 = vmul.f32 1.442695, %v926_v16 }
  0xc5   : > { %3075 = vmatpush.msrb.mxu2 %v4559_v47  ;;  %v2766_v47 = vld [vmem:[%s7619_s3 + $0x58] sm:$0xff] }
  0xc6   : > { %v4691_v61 = vpop.eup %4690  ;;  %2905 = vmatpush.msrb.mxu1 %v2766_v47  ;;  %4694 = vpow2.f32 %v986_v49  ;;  %v1117_v49 = vpop.permute.xlu1 %1116  ;;  %v768_v47 = vmul.f32 1.442695, %v721_v52 }
  0xc7   : > { %4393 = vmatmul.msk.f32.gmra.mxu1 %vm5768_vm6, %v5631_v23  ;;  %4424 = vmatmul.msk.f32.gmra.mxu2 %vm5697_vm5, %v5631_v23  ;;  %v4322_v23 = vadd.f32 -1.0, %v814_v8  ;;  %v4693_v5 = vpop.eup %4692  ;;  %v1021_v24 = vadd.f32 %v4691_v61, %v893_v37  ;;  %4696 = vpow2.f32 %v766_v29  ;;  %v364_v61 = vand.u32 15, %v268_v41 }
  0xc8   : > { %v815_v16 = vadd.f32 %v4693_v5, %v687_v39  ;;  %v7636_v29 = vmin.f32 %v5777_v60, 0.0 }
  0xc9   : > { %v5803_v27 = vsel %vm7641_vm0, %v4322_v23, %v1115_v18  ;;  %v4369_v18 = vadd.f32 -1.0, %v1021_v24  ;;  %v5819_v23 = vld [vmem:[%s5087_s23 + $0xd0] sm:$0xff]  ;;  %vm5839_vm7 = vcmp.ge.s32.totalorder %v364_v61, 1 }
  0xca   : > { %v1273_v8 = vrot.slane %v5803_v27, 7  ;;  %v700_v37 = vmax.f32 %v5819_v23, 0.0  ;;  %v4323_v9 = vadd.f32 -1.0, %v815_v16  ;;  %v894_v31 = vsub.f32 0.0, %v7636_v29  ;;  %v4590_v61 = vld [vmem:[%s7619_s3 + $0x1d0] sm:$0xff] }
  0xcb   : > { %1144 = vrot.lane.b32.xlu0 %v4369_v18, %s5039_s25  ;;  %3238 = vmatpush.msrb.mxu3 %v4590_v61 }
  0xcc   : > { %1478 = vmatmul.f32.gmra.mxu0 %v5625_v38  ;;  %1917 = vmatmul.f32.gmra.mxu3 %v5625_v38  ;;  %v5816_v38 = vsel %vm7640_vm1, %v1271_v36, %v1273_v8  ;;  %v924_v36 = vsub.f32 0.0, %v700_v37  ;;  %v4695_v39 = vpop.eup %4694 }
  0xcd   : > { %v4697_v41 = vpop.eup %4696  ;;  %v1022_v18 = vadd.f32 %v4695_v39, %v894_v31  ;;  %v770_v31 = vmul.f32 1.442695, %v722_v33  ;;  %v1119_v39 = vpop.permute.xlu2 %1118  ;;  %v4527_v33 = vld [vmem:[%s7619_s3 + $0xd0] sm:$0xff] }
  0xce   : > { %v982_v5 = vmul.f32 1.442695, %v924_v36  ;;  %v732_v36 = vmin.f32 %v5819_v23, 0.0  ;;  %2793 = vmatpush.msrb.mxu0 %v4527_v33  ;;  %v7676_v23 = vmin.f32 %v5777_v60, 0.0 }
  0xcf   : > { %1591 = vmatmul.f32.gmra.mxu1 %v5647_v3  ;;  %1755 = vmatmul.f32.gmra.mxu2 %v5647_v3  ;;  %v5835_v3 = vsel %vm7641_vm0, %v4323_v9, %v1117_v49  ;;  %v4370_v16 = vadd.f32 -1.0, %v1022_v18  ;;  %v5848_v49 = vld [vmem:[%s5087_s23 + $0xf0] sm:$0xff] }
  0xd0   : > { %v1275_v52 = vrot.slane %v5835_v3, 7  ;;  %4698 = vpow2.f32 %v982_v5  ;;  %v7634_v9 = vmax.f32 %v5848_v49, 0.0  ;;  %v892_v26 = vsub.f32 0.0, %v732_v36 }
  0xd1   : > { %4700 = vpow2.f32 %v768_v47  ;;  %1146 = vrot.lane.b32.xlu1 %v4370_v16, %s5039_s25  ;;  %v270_v16 = vadd.s32 96, %v5480_v42  ;;  %v790_v1 = vmul.f32 1.442695, %v732_v36 }
  0xd2   : > { %v5845_v34 = vsel %vm7640_vm1, %v1273_v8, %v1275_v52  ;;  %v816_v8 = vadd.f32 %v4697_v41, %v688_v28  ;;  %v928_v47 = vsub.f32 0.0, %v7634_v9 }
  0xd3   : > { %v378_v9 = vand.u32 15, %v270_v16 }
  0xd4   : > { %1481 = vmatmul.f32.gmra.mxu0 %v5661_v30  ;;  %1920 = vmatmul.f32.gmra.mxu3 %v5661_v30  ;;  %v4558_v30 = vld [vmem:[%s7619_s3 + $0x150] sm:$0xff]  ;;  %v990_v41 = vmul.f32 1.442695, %v928_v47  ;;  %v7656_v47 = vmax.f32 %v5346_v51, 0.0 }
  0xd5   : > { %3076 = vmatpush.msrb.mxu2 %v4558_v30  ;;  %v2765_v30 = vld [vmem:[%s7619_s3 + $0x50] sm:$0xff]  ;;  %vm5904_vm8 = vcmp.ge.s32.totalorder %v378_v9, 1  ;;  %v4589_v9 = vld [vmem:[%s7619_s3 + $0x1c8] sm:$0xff] }
  0xd6   : > { %v4699_v28 = vpop.eup %4698  ;;  %2906 = vmatpush.msrb.mxu1 %v2765_v30  ;;  %4702 = vpow2.f32 %v990_v41  ;;  %3239 = vmatpush.msrb.mxu3 %v4589_v9  ;;  %v2764_v9 = vld [vmem:[%s7619_s3 + $0x48] sm:$0xff] }
  0xd7   : > { %4394 = vmatmul.msk.f32.gmra.mxu1 %vm5839_vm7, %v5674_v45  ;;  %4425 = vmatmul.msk.f32.gmra.mxu2 %vm5768_vm6, %v5674_v45  ;;  %v4324_v45 = vadd.f32 -1.0, %v816_v8  ;;  %v4701_v18 = vpop.eup %4700  ;;  %v1020_v61 = vadd.f32 %v4699_v28, %v892_v26  ;;  %4704 = vpow2.f32 %v770_v31  ;;  %v1121_v26 = vpop.permute.xlu0 %1120  ;;  %v7635_v28 = vmin.f32 %v5848_v49, 0.0 }
  0xd8   : > { %2907 = vmatpush.msrb.mxu1 %v2764_v9 }
  0xd9   : > { %v5874_v5 = vsel %vm7641_vm0, %v4324_v45, %v1119_v39  ;;  %v4368_v45 = vadd.f32 -1.0, %v1020_v61  ;;  %v817_v39 = vadd.f32 %v4701_v18, %v7656_v47  ;;  %v896_v41 = vsub.f32 0.0, %v7635_v28  ;;  %v5916_v47 = vld [vmem:[%s5087_s23 + $0xf8] sm:$0xff] }
  0xda   : > { %v1277_v8 = vrot.slane %v5874_v5, 7 }
  0xdb   : > { %1142 = vrot.lane.b32.xlu2 %v4368_v45, %s5039_s25  ;;  %v4325_v31 = vadd.f32 -1.0, %v817_v39  ;;  %v5913_v45 = vld [vmem:[%s5087_s23 + $0xe8] sm:$0xff] }
  0xdc   : > { %1484 = vmatmul.f32.gmra.mxu0 %v5693_v21  ;;  %1923 = vmatmul.f32.gmra.mxu3 %v5693_v21  ;;  %v5887_v21 = vsel %vm7640_vm1, %v1275_v52, %v1277_v8  ;;  %v772_v52 = vmul.f32 1.442695, %v723_v15  ;;  %v4703_v33 = vpop.eup %4702 }
  0xdd   : > { %v4705_v51 = vpop.eup %4704  ;;  %v1024_v16 = vadd.f32 %v4703_v33, %v896_v41 }
  0xde   : > { %4706 = vpow2.f32 %v772_v52  ;;  %v7660_v52 = vmin.f32 %v5451_v53, 0.0 }
  0xdf   : > { %1597 = vmatmul.f32.gmra.mxu1 %v5703_v40  ;;  %1761 = vmatmul.f32.gmra.mxu2 %v5703_v40  ;;  %v5900_v40 = vsel %vm7641_vm0, %v4325_v31, %v1121_v26  ;;  %v4372_v15 = vadd.f32 -1.0, %v1024_v16  ;;  %v7638_v26 = vmax.f32 %v5913_v45, 0.0  ;;  %v7637_v31 = vmax.f32 %v5916_v47, 0.0 }
  0xe0   : > { %v1279_v30 = vrot.slane %v5900_v40, 7  ;;  %v774_v41 = vmul.f32 1.442695, %v7660_v52 }
  0xe1   : > { %1150 = vrot.lane.b32.xlu0 %v4372_v15, %s5039_s25  ;;  %v927_v33 = vsub.f32 0.0, %v7638_v26  ;;  %v929_v16 = vsub.f32 0.0, %v7637_v31  ;;  %v272_v15 = vadd.s32 112, %v5480_v42 }
  0xe2   : > { %v5910_v61 = vsel %vm7640_vm1, %v1277_v8, %v1279_v30  ;;  %v7659_v8 = vmax.f32 %v5427_v62, 0.0  ;;  %v1123_v62 = vpop.permute.xlu1 %1122  ;;  %4708 = vpow2.f32 %v774_v41 }
  0xe3   : > { %v992_v28 = vmul.f32 1.442695, %v929_v16  ;;  %v7639_v16 = vmin.f32 %v5916_v47, 0.0 }
  0xe4   : > { %1487 = vmatmul.f32.gmra.mxu0 %v5732_v57  ;;  %1926 = vmatmul.f32.gmra.mxu3 %v5732_v57  ;;  %v4557_v57 = vld [vmem:[%s7619_s3 + $0x148] sm:$0xff]  ;;  %v818_v39 = vadd.f32 %v4705_v51, %v7659_v8  ;;  %v988_v8 = vmul.f32 1.442695, %v927_v33  ;;  %v4707_v29 = vpop.eup %4706  ;;  %v735_v33 = vmin.f32 %v5913_v45, 0.0 }
  0xe5   : > { %3077 = vmatpush.msrb.mxu2 %v4557_v57  ;;  %v4526_v57 = vld [vmem:[%s7619_s3 + $0xc8] sm:$0xff] }
  0xe6   : > { %2794 = vmatpush.msrb.mxu0 %v4526_v57  ;;  %4710 = vpow2.f32 %v988_v8  ;;  %v7662_v8 = vmin.f32 %v5465_v48, 0.0 }
  0xe7   : > { %4395 = vmatmul.msk.f32.gmra.mxu1 %vm5904_vm8, %v5745_v13  ;;  %4426 = vmatmul.msk.f32.gmra.mxu2 %vm5839_vm7, %v5745_v13  ;;  %v4326_v13 = vadd.f32 -1.0, %v818_v39  ;;  %4712 = vpow2.f32 %v992_v28  ;;  %v895_v28 = vsub.f32 0.0, %v735_v33 }
  0xe8   : > { %v4709_v57 = vpop.eup %4708  ;;  %v776_v9 = vmul.f32 1.442695, %v7662_v8 }
  0xe9   : > { %v5942_v51 = vsel %vm7641_vm0, %v4326_v13, %v1123_v62  ;;  %v392_v13 = vand.u32 15, %v272_v15 }
  0xea   : > { %v1281_v39 = vrot.slane %v5942_v51, 7  ;;  %4714 = vpow2.f32 %v776_v9  ;;  %v778_v9 = vmul.f32 1.442695, %v726_v4  ;;  %v7666_v4 = vmax.f32 %v5465_v48, 0.0 }
  0xeb   : > { %vm5974_vm9 = vcmp.ge.s32.totalorder %v392_v13, 1  ;;  %v7665_v13 = vmax.f32 %v5451_v53, 0.0  ;;  %v274_v53 = vadd.s32 128, %v5480_v42 }
  0xec   : > { %1490 = vmatmul.f32.gmra.mxu0 %v5764_v17  ;;  %1929 = vmatmul.f32.gmra.mxu3 %v5764_v17  ;;  %v5955_v52 = vsel %vm7640_vm1, %v1279_v30, %v1281_v39  ;;  %v7661_v17 = vmax.f32 %v5483_v43, 0.0  ;;  %v1125_v30 = vpop.permute.xlu2 %1124  ;;  %v4711_v31 = vpop.eup %4710  ;;  %4716 = vpow2.f32 %v778_v9  ;;  %v2763_v9 = vld [vmem:[%s7619_s3 + $0x40] sm:$0xff] }
  0xed   : > { %2908 = vmatpush.msrb.mxu1 %v2763_v9 }
  0xee   : > { %v819_v41 = vadd.f32 %v4707_v29, %v7661_v17  ;;  %v4713_v29 = vpop.eup %4712  ;;  %v1023_v17 = vadd.f32 %v4711_v31, %v895_v28  ;;  %v820_v31 = vadd.f32 %v4709_v57, %v7665_v13  ;;  %v1452_v57 = vpop.f32.mrf.mxu0 }
  0xef   : > { %1603 = vmatmul.f32.gmra.mxu1 %v5774_v58  ;;  %1767 = vmatmul.f32.gmra.mxu2 %v5774_v58  ;;  %v897_v58 = vsub.f32 0.0, %v7639_v16  ;;  %v1129_v13 = vpop.permute.xlu1 %1128 }
  0xf0   : > { %v4327_v62 = vadd.f32 -1.0, %v819_v41  ;;  %v4371_v26 = vadd.f32 -1.0, %v1023_v17  ;;  %v4715_v28 = vpop.eup %4714  ;;  %v1565_v17 = vpop.f32.mrf.mxu1 }
  0xf1   : > { %v1025_v8 = vadd.f32 %v4713_v29, %v897_v58  ;;  %v821_v29 = vadd.f32 %v4715_v28, %v7666_v4  ;;  %v782_v28 = vmul.f32 1.442695, %v728_v2  ;;  %v276_v4 = vadd.s32 144, %v5480_v42  ;;  %v4555_v2 = vld [vmem:[%s7619_s3 + $0x138] sm:$0xff] }
  0xf2   : > { %v5970_v43 = vsel %vm7641_vm0, %v4327_v62, %v1125_v30  ;;  %1148 = vrot.lane.b32.xlu2 %v4371_v26, %s5039_s25  ;;  %v4328_v62 = vadd.f32 -1.0, %v820_v31  ;;  %v1127_v30 = vpop.permute.xlu0 %1126  ;;  %v1566_v9 = vadd.f32 %v1565_v17, %v1452_v57  ;;  %v2762_v57 = vld [vmem:[%s7619_s3 + $0x38] sm:$0xff]  ;;  %v7671_v17 = vmax.f32 %v5553_v14, 0.0 }
  0xf3   : > { %v1283_v41 = vrot.slane %v5970_v43, 7  ;;  %2909 = vmatpush.msrb.mxu1 %v2762_v57 }
  0xf4   : > { %1493 = vmatmul.f32.gmra.mxu0 %v5803_v27  ;;  %1932 = vmatmul.f32.gmra.mxu3 %v5803_v27  ;;  %v4373_v27 = vadd.f32 -1.0, %v1025_v8  ;;  %v406_v8 = vand.u32 15, %v274_v53 }
  0xf5   : > { %v5980_v16 = vsel %vm7640_vm1, %v1281_v39, %v1283_v41  ;;  %v4556_v39 = vld [vmem:[%s7619_s3 + $0x140] sm:$0xff] }
  0xf6   : > { %1152 = vrot.lane.b32.xlu1 %v4373_v27, %s5039_s25  ;;  %3078 = vmatpush.msrb.mxu2 %v4556_v39  ;;  %v4329_v27 = vadd.f32 -1.0, %v821_v29  ;;  %v4717_v39 = vpop.eup %4716  ;;  %vm6018_vm10 = vcmp.ge.s32.totalorder %v406_v8, 1 }
  0xf7   : > { %4396 = vmatmul.msk.f32.gmra.mxu1 %vm5974_vm9, %v5816_v38  ;;  %4427 = vmatmul.msk.f32.gmra.mxu2 %vm5904_vm8, %v5816_v38  ;;  %v5998_v38 = vsel %vm7641_vm0, %v4328_v62, %v1127_v30  ;;  %v4525_v62 = vld [vmem:[%s7619_s3 + $0xc0] sm:$0xff]  ;;  %v822_v30 = vadd.f32 %v4717_v39, %v694_v59  ;;  %v784_v39 = vmul.f32 1.442695, %v729_v20 }
  0xf8   : > { %v1285_v26 = vrot.slane %v5998_v38, 7  ;;  %v6014_v31 = vsel %vm7641_vm0, %v4329_v27, %v1129_v13  ;;  %2795 = vmatpush.msrb.mxu0 %v4525_v62  ;;  %v1568_v53 = vpop.f32.mrf.mxu1  ;;  %3079 = vmatpush.msrb.mxu2 %v4555_v2 }
  0xf9   : > { %v1287_v48 = vrot.slane %v6014_v31, 7 }
  0xfa   : > { %v6005_v58 = vsel %vm7640_vm1, %v1283_v41, %v1285_v26 }
  0xfb   : > { %v6024_v41 = vsel %vm7640_vm1, %v1285_v26, %v1287_v48 }
  0xfc   : > { %1496 = vmatmul.f32.gmra.mxu0 %v5835_v3  ;;  %1935 = vmatmul.f32.gmra.mxu3 %v5835_v3  ;;  %v780_v3 = vmul.f32 1.442695, %v727_v25  ;;  %v6032_v25 = vpop.f32.mrf.mxu0 }
  0xfe   : > { %4718 = vpow2.f32 %v780_v3 }
  0xff   : > { %1609 = vmatmul.f32.gmra.mxu1 %v5845_v34  ;;  %1773 = vmatmul.f32.gmra.mxu2 %v5845_v34  ;;  %4720 = vpow2.f32 %v782_v28 }
 0x100   : > { %4722 = vpow2.f32 %v784_v39 }
 0x104   : > { %1499 = vmatmul.f32.gmra.mxu0 %v5874_v5  ;;  %1938 = vmatmul.f32.gmra.mxu3 %v5874_v5  ;;  %v4588_v5 = vld [vmem:[%s7619_s3 + $0x1c0] sm:$0xff]  ;;  %v4719_v26 = vpop.eup %4718 }
 0x105   : > { %3240 = vmatpush.msrb.mxu3 %v4588_v5  ;;  %v823_v59 = vadd.f32 %v4719_v26, %v695_v55  ;;  %v4721_v62 = vpop.eup %4720 }
 0x106   : > { %v824_v28 = vadd.f32 %v4721_v62, %v7671_v17 }
 0x107   : > { %4397 = vmatmul.msk.f32.gmra.mxu1 %vm6018_vm10, %v5887_v21  ;;  %4428 = vmatmul.msk.f32.gmra.mxu2 %vm5974_vm9, %v5887_v21  ;;  %v4330_v21 = vadd.f32 -1.0, %v822_v30  ;;  %v4331_v13 = vadd.f32 -1.0, %v823_v59  ;;  %v4587_v30 = vld [vmem:[%s7619_s3 + $0x1b8] sm:$0xff]  ;;  %v6107_v59 = vld [vmem:[%s7618_s2] ss:$0 sm:$0xff] }
 0x108   : > { %3241 = vmatpush.msrb.mxu3 %v4587_v30 }
 0x10a   : > { %v1131_v29 = vpop.permute.xlu2 %1130 }
 0x10b   : > { %v6051_v8 = vsel %vm7641_vm0, %v4330_v21, %v1131_v29  ;;  %v4524_v21 = vld [vmem:[%s7619_s3 + $0xb8] sm:$0xff] }
 0x10c   : > { %1502 = vmatmul.f32.gmra.mxu0 %v5900_v40  ;;  %1941 = vmatmul.f32.gmra.mxu3 %v5900_v40  ;;  %v1289_v56 = vrot.slane %v6051_v8, 7  ;;  %v420_v40 = vand.u32 15, %v276_v4  ;;  %v786_v4 = vmul.f32 1.442695, %v730_v32  ;;  %v278_v32 = vadd.s32 160, %v5480_v42 }
 0x10d   : > { %v1133_v5 = vpop.permute.xlu0 %1132  ;;  %2796 = vmatpush.msrb.mxu0 %v4524_v21 }
 0x10e   : > { %v6062_v27 = vsel %vm7640_vm1, %v1287_v48, %v1289_v56  ;;  %vm6075_vm11 = vcmp.ge.s32.totalorder %v420_v40, 1  ;;  %v4723_v40 = vpop.eup %4722  ;;  %4724 = vpow2.f32 %v786_v4  ;;  %v434_v57 = vand.u32 15, %v278_v32 }
 0x10f   : > { %1615 = vmatmul.f32.gmra.mxu1 %v5910_v61  ;;  %1779 = vmatmul.f32.gmra.mxu2 %v5910_v61  ;;  %v6069_v61 = vsel %vm7641_vm0, %v4331_v13, %v1133_v5 }
 0x110   : > { %v1291_v48 = vrot.slane %v6069_v61, 7  ;;  %vm6138_vm12 = vcmp.ge.s32.totalorder %v434_v57, 1 }
 0x111   : > { %v6064_v3 = vpop.f32.mrf.mxu0 }
 0x112   : > { %v6081_v20 = vsel %vm7640_vm1, %v1289_v56, %v1291_v48 }
 0x114   : > { %1505 = vmatmul.f32.gmra.mxu0 %v5942_v51  ;;  %v6072_v12 = vpop.f32.mrf.mxu1  ;;  %1944 = vmatmul.f32.gmra.mxu3 %v5942_v51 }
 0x115   : > { %v1572_v57 = vadd.f32 %v6072_v12, %v6064_v3 }
 0x117   : > { %4398 = vmatmul.msk.f32.gmra.mxu1 %vm6075_vm11, %v5955_v52  ;;  %4429 = vmatmul.msk.f32.gmra.mxu2 %vm6018_vm10, %v5955_v52  ;;  %v1897_v51 = vpop.f32.mrf.mxu3  ;;  %v4332_v52 = vadd.f32 -1.0, %v824_v28 }
 0x118   : > { %v1135_v56 = vpop.permute.xlu1 %1134 }
 0x119   : > { %v6100_v26 = vpop.f32.mrf.mxu0  ;;  %v6110_v14 = vsel %vm7641_vm0, %v4332_v52, %v1135_v56 }
 0x11a   : > { %v1735_v29 = vpop.f32.mrf.mxu2  ;;  %v1293_v39 = vrot.slane %v6110_v14, 7 }
 0x11b   : > { %v1831_v2 = vadd.f32 %v1735_v29, %v1566_v9  ;;  %v1569_v9 = vadd.f32 %v1568_v53, %v6032_v25  ;;  %v788_v53 = vmul.f32 1.442695, %v731_v7 }
 0x11c   : > { %1508 = vmatmul.f32.gmra.mxu0 %v5970_v43  ;;  %v6113_v13 = vpop.f32.mrf.mxu1  ;;  %1947 = vmatmul.f32.gmra.mxu3 %v5970_v43  ;;  %v6119_v62 = vsel %vm7640_vm1, %v1291_v48, %v1293_v39  ;;  %v4554_v43 = vld [vmem:[%s7619_s3 + $0x130] sm:$0xff] }
 0x11d   : > { %v1993_v5 = vadd.f32 %v1897_v51, %v1831_v2  ;;  %v825_v51 = vadd.f32 %v4723_v40, %v697_v19  ;;  %3080 = vmatpush.msrb.mxu2 %v4554_v43  ;;  %v4725_v2 = vpop.eup %4724  ;;  %v2761_v43 = vld [vmem:[%s7619_s3 + $0x30] sm:$0xff] }
 0x11e   : > { %2910 = vmatpush.msrb.mxu1 %v2761_v43 }
 0x11f   : > { %v2029_v30 = vadd.f32 %v6107_v59, %v1993_v5  ;;  %1621 = vmatmul.f32.gmra.mxu1 %v5980_v16  ;;  %1785 = vmatmul.f32.gmra.mxu2 %v5980_v16  ;;  %v1900_v21 = vpop.f32.mrf.mxu3  ;;  %v4333_v25 = vadd.f32 -1.0, %v825_v51  ;;  %v1137_v16 = vpop.permute.xlu2 %1136  ;;  %v826_v51 = vadd.f32 %v4725_v2, %v698_v0 }
 0x121   : > { %v2061_v48 = vmax.f32 %v2029_v30, 0.0  ;;  %v2093_v17 = vmin.f32 %v2029_v30, 0.0  ;;  %v6130_v28 = vpop.f32.mrf.mxu0  ;;  %v6143_v40 = vsel %vm7641_vm0, %v4333_v25, %v1137_v16  ;;  %v4586_v30 = vld [vmem:[%s7619_s3 + $0x1b0] sm:$0xff]  ;;  %v4334_v16 = vadd.f32 -1.0, %v826_v51 }
 0x122   : > { %v1738_v52 = vpop.f32.mrf.mxu2  ;;  %v1295_v5 = vrot.slane %v6143_v40, 7  ;;  %3242 = vmatpush.msrb.mxu3 %v4586_v30 }
 0x123   : > { %v2125_v4 = vmul.f32 1.442695, %v2093_v17  ;;  %v2285_v29 = vsub.f32 0.0, %v2061_v48  ;;  %v1832_v56 = vadd.f32 %v1738_v52, %v1569_v9  ;;  %v2253_v12 = vsub.f32 0.0, %v2093_v17 }
 0x124   : > { %1511 = vmatmul.f32.gmra.mxu0 %v5998_v38  ;;  %v6135_v54 = vpop.f32.mrf.mxu1  ;;  %1950 = vmatmul.f32.gmra.mxu3 %v5998_v38 }
 0x125   : > { %4726 = vpow2.f32 %v2125_v4  ;;  %v2317_v7 = vmul.f32 1.442695, %v2285_v29  ;;  %v1994_v32 = vadd.f32 %v1900_v21, %v1832_v56  ;;  %v4523_v21 = vld [vmem:[%s7619_s3 + $0xb0] sm:$0xff] }
 0x126   : > { %4728 = vpow2.f32 %v788_v53  ;;  %2797 = vmatpush.msrb.mxu0 %v4523_v21 }
 0x127   : > { %4730 = vpow2.f32 %v2317_v7  ;;  %v6147_v9 = vadd.f32 %v6107_v59, %v1994_v32  ;;  %4399 = vmatmul.msk.f32.gmra.mxu1 %vm6138_vm12, %v6005_v58  ;;  %4430 = vmatmul.msk.f32.gmra.mxu2 %vm6075_vm11, %v6005_v58  ;;  %v1903_v38 = vpop.f32.mrf.mxu3  ;;  %v6167_v58 = vsel %vm7640_vm1, %v1293_v39, %v1295_v5  ;;  %v280_v32 = vadd.s32 176, %v5480_v42 }
 0x128   : > { %v1139_v2 = vpop.permute.xlu0 %1138 }
 0x129   : > { %v2062_v25 = vmax.f32 %v6147_v9, 0.0  ;;  %v2094_v53 = vmin.f32 %v6147_v9, 0.0  ;;  %v6173_v52 = vpop.f32.mrf.mxu0  ;;  %v6183_v9 = vsel %vm7641_vm0, %v4334_v16, %v1139_v2  ;;  %v448_v16 = vand.u32 15, %v280_v32 }
 0x12a   : > { %v1741_v0 = vpop.f32.mrf.mxu2 }
 0x12b   : > { %v4727_v4 = vpop.eup %4726  ;;  %v2127_v29 = vmul.f32 1.442695, %v2094_v53  ;;  %v2286_v56 = vsub.f32 0.0, %v2062_v25  ;;  %v1833_v39 = vadd.f32 %v1741_v0, %v1572_v57  ;;  %v1297_v57 = vrot.slane %v6183_v9, 7 }
 0x12c   : > { %v4729_v7 = vpop.eup %4728  ;;  %1514 = vmatmul.f32.gmra.mxu0 %v6014_v31  ;;  %v6178_v3 = vpop.f32.mrf.mxu1  ;;  %1953 = vmatmul.f32.gmra.mxu3 %v6014_v31  ;;  %v6185_v36 = vadd.f32 %v4727_v4, %v2061_v48  ;;  %v4553_v48 = vld [vmem:[%s7619_s3 + $0x128] sm:$0xff]  ;;  %v1575_v4 = vadd.f32 %v6113_v13, %v6100_v26  ;;  %vm6214_vm13 = vcmp.ge.s32.totalorder %v448_v16, 1  ;;  %v2254_v63 = vsub.f32 0.0, %v2094_v53 }
 0x12d   : > { %v4731_v30 = vpop.eup %4730  ;;  %4732 = vpow2.f32 %v2127_v29  ;;  %v2319_v21 = vmul.f32 1.442695, %v2286_v56  ;;  %v1995_v43 = vadd.f32 %v1903_v38, %v1833_v39  ;;  %v827_v17 = vadd.f32 %v4729_v7, %v699_v22  ;;  %3081 = vmatpush.msrb.mxu2 %v4553_v48  ;;  %v1141_v2 = vpop.permute.xlu1 %1140  ;;  %v4585_v53 = vld [vmem:[%s7619_s3 + $0x1a8] sm:$0xff] }
 0x12e   : > { %4734 = vpow2.f32 %v790_v1  ;;  %v2381_v51 = vadd.f32 %v4731_v30, %v2253_v12  ;;  %v6199_v1 = vsel %vm7640_vm1, %v1295_v5, %v1297_v57  ;;  %v2760_v16 = vld [vmem:[%s7619_s3 + $0x28] sm:$0xff]  ;;  %3243 = vmatpush.msrb.mxu3 %v4585_v53 }
 0x12f   : > { %4736 = vpow2.f32 %v2319_v21  ;;  %v6189_v0 = vadd.f32 %v6107_v59, %v1995_v43  ;;  %1627 = vmatmul.f32.gmra.mxu1 %v6024_v41  ;;  %1791 = vmatmul.f32.gmra.mxu2 %v6024_v41  ;;  %v1906_v31 = vpop.f32.mrf.mxu3  ;;  %v4335_v39 = vadd.f32 -1.0, %v827_v17 }
 0x130   : > { %v4485_v38 = vadd.f32 -1.0, %v2381_v51  ;;  %2911 = vmatpush.msrb.mxu1 %v2760_v16 }
 0x131   : > { %v2063_v29 = vmax.f32 %v6189_v0, 0.0  ;;  %v2095_v41 = vmin.f32 %v6189_v0, 0.0  ;;  %v6205_v56 = vpop.f32.mrf.mxu0  ;;  %v6219_v21 = vsel %vm7641_vm0, %v4335_v39, %v1141_v2 }
 0x132   : > { %2477 = vrot.lane.b32.xlu2 %v4485_v38, %s5039_s25  ;;  %v1744_v22 = vpop.f32.mrf.mxu2  ;;  %v1299_v38 = vrot.slane %v6219_v21, 7 }
 0x133   : > { %v4733_v7 = vpop.eup %4732  ;;  %v2129_v5 = vmul.f32 1.442695, %v2095_v41  ;;  %v2287_v12 = vsub.f32 0.0, %v2063_v29  ;;  %v1834_v32 = vadd.f32 %v1744_v22, %v1575_v4 }
 0x134   : > { %v4735_v30 = vpop.eup %4734  ;;  %1517 = vmatmul.f32.gmra.mxu0 %v6051_v8  ;;  %v6211_v26 = vpop.f32.mrf.mxu1  ;;  %1956 = vmatmul.f32.gmra.mxu3 %v6051_v8  ;;  %v6221_v43 = vadd.f32 %v4733_v7, %v2062_v25 }
 0x135   : > { %v4737_v51 = vpop.eup %4736  ;;  %4738 = vpow2.f32 %v2129_v5  ;;  %v2321_v0 = vmul.f32 1.442695, %v2287_v12  ;;  %v1996_v48 = vadd.f32 %v1906_v31, %v1834_v32  ;;  %v4522_v31 = vld [vmem:[%s7619_s3 + $0xa8] sm:$0xff]  ;;  %v828_v4 = vadd.f32 %v4735_v30, %v700_v37  ;;  %v1143_v32 = vpop.permute.xlu2 %1142 }
 0x136   : > { %4740 = vpow2.f32 %v792_v11  ;;  %v2382_v17 = vadd.f32 %v4737_v51, %v2254_v63  ;;  %2798 = vmatpush.msrb.mxu0 %v4522_v31  ;;  %v1578_v11 = vadd.f32 %v6135_v54, %v6130_v28  ;;  %v794_v37 = vmul.f32 1.442695, %v7676_v23 }
 0x137   : > { %4742 = vpow2.f32 %v2321_v0  ;;  %v6225_v8 = vadd.f32 %v6107_v59, %v1996_v48  ;;  %4400 = vmatmul.msk.f32.gmra.mxu1 %vm6214_vm13, %v6062_v27  ;;  %4431 = vmatmul.msk.f32.gmra.mxu2 %vm6138_vm12, %v6062_v27  ;;  %v1909_v25 = vpop.f32.mrf.mxu3  ;;  %v6245_v27 = vsel %vm7640_vm1, %v1297_v57, %v1299_v38  ;;  %v4336_v5 = vadd.f32 -1.0, %v828_v4 }
 0x138   : > { %v4486_v39 = vadd.f32 -1.0, %v2382_v17  ;;  %v2255_v0 = vsub.f32 0.0, %v2095_v41  ;;  %v282_v48 = vadd.s32 192, %v5480_v42  ;;  %v7677_v41 = vmax.f32 %v5748_v50, 0.0 }
 0x139   : > { %v2064_v22 = vmax.f32 %v6225_v8, 0.0  ;;  %v2096_v2 = vmin.f32 %v6225_v8, 0.0  ;;  %v6251_v7 = vpop.f32.mrf.mxu0  ;;  %v6262_v17 = vsel %vm7641_vm0, %v4336_v5, %v1143_v32  ;;  %v796_v50 = vmul.f32 1.442695, %v735_v33 }
 0x13a   : > { %2479 = vrot.lane.b32.xlu0 %v4486_v39, %s5039_s25  ;;  %v1747_v12 = vpop.f32.mrf.mxu2  ;;  %v1301_v39 = vrot.slane %v6262_v17, 7  ;;  %v462_v23 = vand.u32 15, %v282_v48 }
 0x13b   : > { %v4739_v57 = vpop.eup %4738  ;;  %v2131_v30 = vmul.f32 1.442695, %v2096_v2  ;;  %v2288_v63 = vsub.f32 0.0, %v2064_v22  ;;  %v1835_v51 = vadd.f32 %v1747_v12, %v1578_v11  ;;  %v1581_v12 = vadd.f32 %v6178_v3, %v6173_v52 }
 0x13c   : > { %v4741_v28 = vpop.eup %4740  ;;  %1520 = vmatmul.f32.gmra.mxu0 %v6069_v61  ;;  %v6257_v54 = vpop.f32.mrf.mxu1  ;;  %1959 = vmatmul.f32.gmra.mxu3 %v6069_v61  ;;  %v6264_v8 = vadd.f32 %v4739_v57, %v2063_v29  ;;  %v4552_v29 = vld [vmem:[%s7619_s3 + $0x120] sm:$0xff]  ;;  %vm6293_vm14 = vcmp.ge.s32.totalorder %v462_v23, 1  ;;  %v2256_v33 = vsub.f32 0.0, %v2096_v2  ;;  %v7680_v23 = vmax.f32 %v5777_v60, 0.0 }
 0x13d   : > { %v4743_v53 = vpop.eup %4742  ;;  %4744 = vpow2.f32 %v2131_v30  ;;  %v2323_v31 = vmul.f32 1.442695, %v2288_v63  ;;  %v1997_v16 = vadd.f32 %v1909_v25, %v1835_v51  ;;  %v829_v25 = vadd.f32 %v4741_v28, %v7677_v41  ;;  %3082 = vmatpush.msrb.mxu2 %v4552_v29  ;;  %v1145_v51 = vpop.permute.xlu0 %1144  ;;  %v4584_v2 = vld [vmem:[%s7619_s3 + $0x1a0] sm:$0xff] }
 0x13e   : > { %4746 = vpow2.f32 %v794_v37  ;;  %v2383_v4 = vadd.f32 %v4743_v53, %v2255_v0  ;;  %v6278_v37 = vsel %vm7640_vm1, %v1299_v38, %v1301_v39  ;;  %3244 = vmatpush.msrb.mxu3 %v4584_v2  ;;  %v7681_v60 = vmin.f32 %v5848_v49, 0.0 }
 0x13f   : > { %4748 = vpow2.f32 %v2323_v31  ;;  %v6268_v11 = vadd.f32 %v6107_v59, %v1997_v16  ;;  %1633 = vmatmul.f32.gmra.mxu1 %v6081_v20  ;;  %1797 = vmatmul.f32.gmra.mxu2 %v6081_v20  ;;  %v1912_v61 = vpop.f32.mrf.mxu3  ;;  %v4337_v30 = vadd.f32 -1.0, %v829_v25 }
 0x140   : > { %v4487_v5 = vadd.f32 -1.0, %v2383_v4 }
 0x141   : > { %v2065_v32 = vmax.f32 %v6268_v11, 0.0  ;;  %v2097_v20 = vmin.f32 %v6268_v11, 0.0  ;;  %v6284_v57 = vpop.f32.mrf.mxu0  ;;  %v6298_v31 = vsel %vm7641_vm0, %v4337_v30, %v1145_v51 }
 0x142   : > { %2481 = vrot.lane.b32.xlu1 %v4487_v5, %s5039_s25  ;;  %v1750_v63 = vpop.f32.mrf.mxu2  ;;  %v1303_v25 = vrot.slane %v6298_v31, 7  ;;  %v2759_v5 = vld [vmem:[%s7619_s3 + $0x20] sm:$0xff] }
 0x143   : > { %v4745_v28 = vpop.eup %4744  ;;  %v2133_v38 = vmul.f32 1.442695, %v2097_v20  ;;  %v2289_v0 = vsub.f32 0.0, %v2065_v32  ;;  %v1836_v48 = vadd.f32 %v1750_v63, %v1581_v12  ;;  %2912 = vmatpush.msrb.mxu1 %v2759_v5 }
 0x144   : > { %v4747_v53 = vpop.eup %4746  ;;  %1523 = vmatmul.f32.gmra.mxu0 %v6110_v14  ;;  %v6290_v52 = vpop.f32.mrf.mxu1  ;;  %1962 = vmatmul.f32.gmra.mxu3 %v6110_v14  ;;  %v6300_v16 = vadd.f32 %v4745_v28, %v2064_v22 }
 0x145   : > { %v4749_v4 = vpop.eup %4748  ;;  %4750 = vpow2.f32 %v2133_v38  ;;  %v2325_v11 = vmul.f32 1.442695, %v2289_v0  ;;  %v1998_v29 = vadd.f32 %v1912_v61, %v1836_v48  ;;  %v4521_v61 = vld [vmem:[%s7619_s3 + $0xa0] sm:$0xff]  ;;  %v830_v12 = vadd.f32 %v4747_v53, %v7680_v23  ;;  %v1147_v53 = vpop.permute.xlu1 %1146 }
 0x146   : > { %4752 = vpow2.f32 %v796_v50  ;;  %v2384_v41 = vadd.f32 %v4749_v4, %v2256_v33  ;;  %2799 = vmatpush.msrb.mxu0 %v4521_v61  ;;  %v1584_v50 = vadd.f32 %v6211_v26, %v6205_v56  ;;  %v798_v0 = vmul.f32 1.442695, %v7681_v60 }
 0x147   : > { %4754 = vpow2.f32 %v2325_v11  ;;  %v6304_v14 = vadd.f32 %v6107_v59, %v1998_v29  ;;  %4401 = vmatmul.msk.f32.gmra.mxu1 %vm6293_vm14, %v6119_v62  ;;  %4432 = vmatmul.msk.f32.gmra.mxu2 %vm6214_vm13, %v6119_v62  ;;  %v1915_v22 = vpop.f32.mrf.mxu3  ;;  %v6324_v62 = vsel %vm7640_vm1, %v1301_v39, %v1303_v25  ;;  %v4338_v38 = vadd.f32 -1.0, %v830_v12 }
 0x148   : > { %v4488_v30 = vadd.f32 -1.0, %v2384_v41  ;;  %v2257_v29 = vsub.f32 0.0, %v2097_v20  ;;  %v284_v41 = vadd.s32 208, %v5480_v42  ;;  %v7682_v20 = vmax.f32 %v5913_v45, 0.0 }
 0x149   : > { %v2066_v63 = vmax.f32 %v6304_v14, 0.0  ;;  %v2098_v51 = vmin.f32 %v6304_v14, 0.0  ;;  %v6330_v28 = vpop.f32.mrf.mxu0  ;;  %v6341_v14 = vsel %vm7641_vm0, %v4338_v38, %v1147_v53 }
 0x14a   : > { %v1753_v48 = vpop.f32.mrf.mxu2  ;;  %2483 = vrot.lane.b32.xlu2 %v4488_v30, %s5039_s25  ;;  %v1305_v30 = vrot.slane %v6341_v14, 7  ;;  %v476_v60 = vand.u32 15, %v284_v41 }
 0x14b   : > { %v4751_v39 = vpop.eup %4750  ;;  %v2135_v33 = vmul.f32 1.442695, %v2098_v51  ;;  %v2290_v4 = vsub.f32 0.0, %v2066_v63  ;;  %v1837_v11 = vadd.f32 %v1753_v48, %v1584_v50  ;;  %v1587_v48 = vadd.f32 %v6257_v54, %v6251_v7 }
 0x14c   : > { %v4753_v56 = vpop.eup %4752  ;;  %1526 = vmatmul.f32.gmra.mxu0 %v6143_v40  ;;  %v6336_v26 = vpop.f32.mrf.mxu1  ;;  %1965 = vmatmul.f32.gmra.mxu3 %v6143_v40  ;;  %v6343_v2 = vadd.f32 %v4751_v39, %v2065_v32  ;;  %v4551_v32 = vld [vmem:[%s7619_s3 + $0x118] sm:$0xff]  ;;  %vm6370_vm15 = vcmp.ge.s32.totalorder %v476_v60, 1  ;;  %v2258_v54 = vsub.f32 0.0, %v2098_v51  ;;  %v7685_v60 = vmax.f32 %v5848_v49, 0.0 }
 0x14d   : > { %v4755_v61 = vpop.eup %4754  ;;  %4756 = vpow2.f32 %v2135_v33  ;;  %v2327_v5 = vmul.f32 1.442695, %v2290_v4  ;;  %v1999_v23 = vadd.f32 %v1915_v22, %v1837_v11  ;;  %v831_v22 = vadd.f32 %v4753_v56, %v7682_v20  ;;  %3083 = vmatpush.msrb.mxu2 %v4551_v32  ;;  %v1149_v45 = vpop.permute.xlu2 %1148  ;;  %v4583_v51 = vld [vmem:[%s7619_s3 + $0x198] sm:$0xff] }
 0x14e   : > { %4758 = vpow2.f32 %v798_v0  ;;  %v2385_v12 = vadd.f32 %v4755_v61, %v2257_v29  ;;  %v6357_v0 = vsel %vm7640_vm1, %v1303_v25, %v1305_v30  ;;  %3245 = vmatpush.msrb.mxu3 %v4583_v51  ;;  %v7686_v49 = vmin.f32 %v5916_v47, 0.0 }
 0x14f   : > { %4760 = vpow2.f32 %v2327_v5  ;;  %v6347_v50 = vadd.f32 %v6107_v59, %v1999_v23  ;;  %1639 = vmatmul.f32.gmra.mxu1 %v6167_v58  ;;  %1803 = vmatmul.f32.gmra.mxu2 %v6167_v58  ;;  %v1918_v40 = vpop.f32.mrf.mxu3  ;;  %v4339_v33 = vadd.f32 -1.0, %v831_v22 }
 0x150   : > { %v4489_v38 = vadd.f32 -1.0, %v2385_v12 }
 0x151   : > { %v2067_v53 = vmax.f32 %v6347_v50, 0.0  ;;  %v2099_v58 = vmin.f32 %v6347_v50, 0.0  ;;  %v6363_v39 = vpop.f32.mrf.mxu0  ;;  %v6375_v5 = vsel %vm7641_vm0, %v4339_v33, %v1149_v45 }
 0x152   : > { %v1756_v4 = vpop.f32.mrf.mxu2  ;;  %2485 = vrot.lane.b32.xlu0 %v4489_v38, %s5039_s25  ;;  %v1307_v22 = vrot.slane %v6375_v5, 7  ;;  %v2758_v38 = vld [vmem:[%s7619_s3 + $0x18] sm:$0xff] }
 0x153   : > { %v4757_v11 = vpop.eup %4756  ;;  %v2137_v56 = vmul.f32 1.442695, %v2099_v58  ;;  %v2291_v29 = vsub.f32 0.0, %v2067_v53  ;;  %v1838_v41 = vadd.f32 %v1756_v4, %v1587_v48  ;;  %v1590_v4 = vadd.f32 %v6290_v52, %v6284_v57  ;;  %2913 = vmatpush.msrb.mxu1 %v2758_v38 }
 0x154   : > { %v4759_v25 = vpop.eup %4758  ;;  %1529 = vmatmul.f32.gmra.mxu0 %v6183_v9  ;;  %v6367_v61 = vpop.f32.mrf.mxu1  ;;  %1968 = vmatmul.f32.gmra.mxu3 %v6183_v9  ;;  %v6377_v23 = vadd.f32 %v4757_v11, %v2066_v63  ;;  %v2259_v52 = vsub.f32 0.0, %v2099_v58 }
 0x155   : > { %v4761_v12 = vpop.eup %4760  ;;  %4762 = vpow2.f32 %v2137_v56  ;;  %v2329_v50 = vmul.f32 1.442695, %v2291_v29  ;;  %v2000_v32 = vadd.f32 %v1918_v40, %v1838_v41  ;;  %v4520_v40 = vld [vmem:[%s7619_s3 + $0x98] sm:$0xff]  ;;  %v832_v48 = vadd.f32 %v4759_v25, %v7685_v60 }
 0x156   : > { %v2386_v20 = vadd.f32 %v4761_v12, %v2258_v54  ;;  %2800 = vmatpush.msrb.mxu0 %v4520_v40  ;;  %v800_v41 = vmul.f32 1.442695, %v7686_v49  ;;  %v1151_v54 = vpop.permute.xlu0 %1150  ;;  %v4518_v49 = vld [vmem:[%s7619_s3 + $0x88] sm:$0xff] }
 0x157   : > { %4764 = vpow2.f32 %v2329_v50  ;;  %v6381_v9 = vadd.f32 %v6107_v59, %v2000_v32  ;;  %4402 = vmatmul.msk.f32.gmra.mxu1 %vm6370_vm15, %v6199_v1  ;;  %4433 = vmatmul.msk.f32.gmra.mxu2 %vm6293_vm14, %v6199_v1  ;;  %v1921_v63 = vpop.f32.mrf.mxu3  ;;  %v6401_v1 = vsel %vm7640_vm1, %v1305_v30, %v1307_v22  ;;  %v4340_v29 = vadd.f32 -1.0, %v832_v48 }
 0x158   : > { %v4490_v33 = vadd.f32 -1.0, %v2386_v20  ;;  %v286_v20 = vadd.s32 224, %v5480_v42 }
 0x159   : > { %v2068_v45 = vmax.f32 %v6381_v9, 0.0  ;;  %v2100_v11 = vmin.f32 %v6381_v9, 0.0  ;;  %v6407_v56 = vpop.f32.mrf.mxu0  ;;  %v6418_v9 = vsel %vm7641_vm0, %v4340_v29, %v1151_v54 }
 0x15a   : > { %v1759_v25 = vpop.f32.mrf.mxu2  ;;  %2487 = vrot.lane.b32.xlu1 %v4490_v33, %s5039_s25  ;;  %v4519_v33 = vld [vmem:[%s7619_s3 + $0x90] sm:$0xff]  ;;  %v490_v29 = vand.u32 15, %v286_v20  ;;  %v2756_v20 = vld [vmem:[%s7619_s3 + $0x8] sm:$0xff] }
 0x15b   : > { %v4763_v30 = vpop.eup %4762  ;;  %v2139_v12 = vmul.f32 1.442695, %v2100_v11  ;;  %v2292_v50 = vsub.f32 0.0, %v2068_v45  ;;  %v1839_v32 = vadd.f32 %v1759_v25, %v1590_v4  ;;  %2801 = vmatpush.msrb.mxu0 %v4519_v33 }
 0x15c   : > { %1532 = vmatmul.f32.gmra.mxu0 %v6219_v21  ;;  %v6413_v57 = vpop.f32.mrf.mxu1  ;;  %1971 = vmatmul.f32.gmra.mxu3 %v6219_v21  ;;  %v6420_v51 = vadd.f32 %v4763_v30, %v2067_v53  ;;  %v1663_v21 = vrot.slane %v6418_v9, 7 }
 0x15d   : > { %v4765_v40 = vpop.eup %4764  ;;  %4766 = vpow2.f32 %v2139_v12  ;;  %v2331_v38 = vmul.f32 1.442695, %v2292_v50  ;;  %v2001_v60 = vadd.f32 %v1921_v63, %v1839_v32  ;;  %v4550_v63 = vld [vmem:[%s7619_s3 + $0x110] sm:$0xff]  ;;  %2802 = vmatpush.msrb.mxu0 %v4518_v49  ;;  %v2755_v49 = vld [vmem:[%s7619_s3] sm:$0xff] }
 0x15e   : > { %4768 = vpow2.f32 %v800_v41  ;;  %v2387_v48 = vadd.f32 %v4765_v40, %v2259_v52  ;;  %3084 = vmatpush.msrb.mxu2 %v4550_v63  ;;  %v6440_v41 = vsel %vm7640_vm1, %v1307_v22, %v1663_v21  ;;  %v2757_v12 = vld [vmem:[%s7619_s3 + $0x10] sm:$0xff]  ;;  %v4517_v22 = vld [vmem:[%s7619_s3 + $0x80] sm:$0xff]  ;;  %vm6462_vm1 = vcmp.ge.s32.totalorder %v490_v29, 1 }
 0x15f   : > { %4770 = vpow2.f32 %v2331_v38  ;;  %v6427_v58 = vadd.f32 %v6107_v59, %v2001_v60  ;;  %1645 = vmatmul.f32.gmra.mxu1 %v6245_v27  ;;  %1809 = vmatmul.f32.gmra.mxu2 %v6245_v27  ;;  %v1924_v53 = vpop.f32.mrf.mxu3  ;;  %v1593_v27 = vadd.f32 %v6336_v26, %v6330_v28 }
 0x160   : > { %v4491_v4 = vadd.f32 -1.0, %v2387_v48  ;;  %2914 = vmatpush.msrb.mxu1 %v2757_v12  ;;  %v2260_v48 = vsub.f32 0.0, %v2100_v11  ;;  %2803 = vmatpush.msrb.mxu0 %v4517_v22  ;;  %v4582_v11 = vld [vmem:[%s7619_s3 + $0x190] sm:$0xff] }
 0x161   : > { %v2069_v25 = vmax.f32 %v6427_v58, 0.0  ;;  %v2101_v54 = vmin.f32 %v6427_v58, 0.0  ;;  %v6446_v30 = vpop.f32.mrf.mxu0  ;;  %3246 = vmatpush.msrb.mxu3 %v4582_v11 }
 0x162   : > { %v1762_v50 = vpop.f32.mrf.mxu2  ;;  %2489 = vrot.lane.b32.xlu2 %v4491_v4, %s5039_s25  ;;  %2915 = vmatpush.msrb.mxu1 %v2756_v20 }
 0x163   : > { %v4767_v32 = vpop.eup %4766  ;;  %v2141_v28 = vmul.f32 1.442695, %v2101_v54  ;;  %v2293_v26 = vsub.f32 0.0, %v2069_v25  ;;  %v1840_v52 = vadd.f32 %v1762_v50, %v1593_v27  ;;  %v1596_v50 = vadd.f32 %v6367_v61, %v6363_v39 }
 0x164   : > { %v4769_v40 = vpop.eup %4768  ;;  %1535 = vmatmul.f32.gmra.mxu0 %v6262_v17  ;;  %v6459_v38 = vpop.f32.mrf.mxu1  ;;  %1974 = vmatmul.f32.gmra.mxu3 %v6262_v17  ;;  %v6466_v33 = vadd.f32 %v4767_v32, %v2068_v45  ;;  %v2261_v39 = vsub.f32 0.0, %v2101_v54  ;;  %v288_v61 = vadd.s32 240, %v5480_v42 }
 0x165   : > { %v4771_v58 = vpop.eup %4770  ;;  %4772 = vpow2.f32 %v2141_v28  ;;  %v2333_v63 = vmul.f32 1.442695, %v2293_v26  ;;  %v2002_v4 = vadd.f32 %v1924_v53, %v1840_v52  ;;  %v7689_v53 = vmax.f32 %v5916_v47, 0.0  ;;  %2916 = vmatpush.msrb.mxu1 %v2755_v49 }
 0x166   : > { %v2388_v27 = vadd.f32 %v4771_v58, %v2260_v48  ;;  %v504_v54 = vand.u32 15, %v288_v61 }
 0x167   : > { %4774 = vpow2.f32 %v2333_v63  ;;  %v6472_v17 = vadd.f32 %v6107_v59, %v2002_v4  ;;  %4403 = vmatmul.msk.f32.gmra.mxu1 %vm6462_vm1, %v6278_v37  ;;  %4434 = vmatmul.msk.f32.gmra.mxu2 %vm6370_vm15, %v6278_v37  ;;  %v1927_v45 = vpop.f32.mrf.mxu3  ;;  %v833_v29 = vadd.f32 %v4769_v40, %v7689_v53 }
 0x168   : > { %v4492_v12 = vadd.f32 -1.0, %v2388_v27  ;;  %v1153_v48 = vpop.permute.xlu1 %1152 }
 0x169   : > { %v2070_v22 = vmax.f32 %v6472_v17, 0.0  ;;  %v2102_v32 = vmin.f32 %v6472_v17, 0.0  ;;  %v6489_v28 = vpop.f32.mrf.mxu0  ;;  %v4341_v37 = vadd.f32 -1.0, %v833_v29 }
 0x16a   : > { %v1765_v26 = vpop.f32.mrf.mxu2  ;;  %2491 = vrot.lane.b32.xlu0 %v4492_v12, %s5039_s25 }
 0x16b   : > { %v4773_v52 = vpop.eup %4772  ;;  %v2143_v20 = vmul.f32 1.442695, %v2102_v32  ;;  %v2294_v47 = vsub.f32 0.0, %v2070_v22  ;;  %v1841_v40 = vadd.f32 %v1765_v26, %v1596_v50  ;;  %v6498_v63 = vsel %vm7641_vm0, %v4341_v37, %v1153_v48 }
 0x16c   : > { %1538 = vmatmul.f32.gmra.mxu0 %v6298_v31  ;;  %v6493_v58 = vpop.f32.mrf.mxu1  ;;  %1977 = vmatmul.f32.gmra.mxu3 %v6298_v31  ;;  %v6500_v4 = vadd.f32 %v4773_v52, %v2069_v25  ;;  %v1665_v53 = vrot.slane %v6498_v63, 7  ;;  %v4549_v31 = vld [vmem:[%s7619_s3 + $0x108] sm:$0xff]  ;;  %vm7690_vm0 = vcmask 1040384  }
 0x16d   : > { %v4775_v49 = vpop.eup %4774  ;;  %4776 = vpow2.f32 %v2143_v20  ;;  %v2335_v27 = vmul.f32 1.442695, %v2294_v47  ;;  %v2003_v17 = vadd.f32 %v1927_v45, %v1841_v40  ;;  %3085 = vmatpush.msrb.mxu2 %v4549_v31  ;;  %v4581_v45 = vld [vmem:[%s7619_s3 + $0x188] sm:$0xff]  ;;  %v4580_v20 = vld [vmem:[%s7619_s3 + $0x180] sm:$0xff] }
 0x16e   : > { %v2389_v11 = vadd.f32 %v4775_v49, %v2261_v39  ;;  %v6515_v12 = vsel %vm7690_vm0, %v1663_v21, %v1665_v53  ;;  %3247 = vmatpush.msrb.mxu3 %v4581_v45  ;;  %vm6529_vm0 = vcmp.ge.s32.totalorder %v504_v54, 1  ;;  %v2262_v39 = vsub.f32 0.0, %v2102_v32  ;;  %v4548_v53 = vld [vmem:[%s7619_s3 + $0x100] sm:$0xff] }
 0x16f   : > { %4778 = vpow2.f32 %v2335_v27  ;;  %v2039_v29 = vadd.f32 %v6107_v59, %v2003_v17  ;;  %1651 = vmatmul.f32.gmra.mxu1 %v6324_v62  ;;  %1815 = vmatmul.f32.gmra.mxu2 %v6324_v62  ;;  %v1930_v42 = vpop.f32.mrf.mxu3  ;;  %v1599_v62 = vadd.f32 %v6413_v57, %v6407_v56  ;;  %v7691_v57 = vmov 0 }
 0x170   : > { %v4493_v25 = vadd.f32 -1.0, %v2389_v11  ;;  %3248 = vmatpush.msrb.mxu3 %v4580_v20  ;;  %v7692_v57 = vsel %vm6529_vm0, 4294967295, %v7691_v57  ;;  %3086 = vmatpush.msrb.mxu2 %v4548_v53  ;;  %v1602_v32 = vadd.f32 %v6459_v38, %v6446_v30 }
 0x171   : > { %v2071_v50 = vmax.f32 %v2039_v29, 0.0  ;;  %v2103_v37 = vmin.f32 %v2039_v29, 0.0  ;;  %v6519_v26 = vpop.f32.mrf.mxu0 }
 0x172   : > { %v1768_v52 = vpop.f32.mrf.mxu2  ;;  %2493 = vrot.lane.b32.xlu1 %v4493_v25, %s5039_s25 }
 0x173   : > { %v4777_v47 = vpop.eup %4776  ;;  %v2145_v40 = vmul.f32 1.442695, %v2103_v37  ;;  %v2295_v48 = vsub.f32 0.0, %v2071_v50  ;;  %v1842_v21 = vadd.f32 %v1768_v52, %v1599_v62 }
 0x174   : > { %1541 = vmatmul.f32.gmra.mxu0 %v6341_v14  ;;  %v6526_v56 = vpop.f32.mrf.mxu1  ;;  %1980 = vmatmul.f32.gmra.mxu3 %v6341_v14  ;;  %v6533_v61 = vadd.f32 %v4777_v47, %v2070_v22  ;;  %v2263_v47 = vsub.f32 0.0, %v2103_v37 }
 0x175   : > { %v4779_v49 = vpop.eup %4778  ;;  %4780 = vpow2.f32 %v2145_v40  ;;  %v2337_v27 = vmul.f32 1.442695, %v2295_v48  ;;  %v2004_v17 = vadd.f32 %v1930_v42, %v1842_v21 }
 0x176   : > { %v2390_v11 = vadd.f32 %v4779_v49, %v2262_v39 }
 0x177   : > { %4782 = vpow2.f32 %v2337_v27  ;;  %v2040_v29 = vadd.f32 %v6107_v59, %v2004_v17  ;;  %4404 = vmatmul.msk.f32.gmra.mxu1 %vm6529_vm0, %v6357_v0  ;;  %4435 = vmatmul.msk.f32.gmra.mxu2 %vm6462_vm1, %v6357_v0  ;;  %v1933_v14 = vpop.f32.mrf.mxu3 }
 0x178   : > { %v4494_v22 = vadd.f32 -1.0, %v2390_v11 }
 0x179   : > { %v2072_v42 = vmax.f32 %v2040_v29, 0.0  ;;  %v2104_v31 = vmin.f32 %v2040_v29, 0.0  ;;  %v6547_v25 = vpop.f32.mrf.mxu0 }
 0x17a   : > { %v1771_v54 = vpop.f32.mrf.mxu2  ;;  %2495 = vrot.lane.b32.xlu2 %v4494_v22, %s5039_s25 }
 0x17b   : > { %v4781_v45 = vpop.eup %4780  ;;  %v2147_v62 = vmul.f32 1.442695, %v2104_v31  ;;  %v2296_v52 = vsub.f32 0.0, %v2072_v42  ;;  %v1843_v20 = vadd.f32 %v1771_v54, %v1602_v32  ;;  %v2264_v54 = vsub.f32 0.0, %v2104_v31 }
 0x17c   : > { %1544 = vmatmul.f32.gmra.mxu0 %v6375_v5  ;;  %v6551_v0 = vpop.f32.mrf.mxu1  ;;  %1983 = vmatmul.f32.gmra.mxu3 %v6375_v5  ;;  %v6554_v40 = vadd.f32 %v4781_v45, %v2071_v50  ;;  %v1605_v5 = vadd.f32 %v6493_v58, %v6489_v28 }
 0x17d   : > { %v4783_v30 = vpop.eup %4782  ;;  %4784 = vpow2.f32 %v2147_v62  ;;  %v2339_v38 = vmul.f32 1.442695, %v2296_v52  ;;  %v2005_v48 = vadd.f32 %v1933_v14, %v1843_v20 }
 0x17e   : > { %v2391_v21 = vadd.f32 %v4783_v30, %v2263_v47 }
 0x17f   : > { %4786 = vpow2.f32 %v2339_v38  ;;  %v2041_v39 = vadd.f32 %v6107_v59, %v2005_v48  ;;  %1657 = vmatmul.f32.gmra.mxu1 %v6401_v1  ;;  %1821 = vmatmul.f32.gmra.mxu2 %v6401_v1  ;;  %v1936_v49 = vpop.f32.mrf.mxu3  ;;  %v7693_v1 = vmov 0.0  }
 0x180   : > { %v4495_v27 = vadd.f32 -1.0, %v2391_v21 }
 0x181   : > { %v2073_v37 = vmax.f32 %v2041_v39, 0.0  ;;  %v2105_v50 = vmin.f32 %v2041_v39, 0.0  ;;  %v6561_v17 = vpop.f32.mrf.mxu0 }
 0x182   : > { %v1774_v11 = vpop.f32.mrf.mxu2  ;;  %2497 = vrot.lane.b32.xlu0 %v4495_v27, %s5039_s25 }
 0x183   : > { %v4785_v53 = vpop.eup %4784  ;;  %v2149_v29 = vmul.f32 1.442695, %v2105_v50  ;;  %v2297_v14 = vsub.f32 0.0, %v2073_v37  ;;  %v1844_v22 = vadd.f32 %v1774_v11, %v1605_v5  ;;  %v2265_v5 = vsub.f32 0.0, %v2105_v50 }
 0x184   : > { %v6564_v32 = vpop.f32.mrf.mxu1  ;;  %1986 = vmatmul.f32.gmra.mxu3 %v6418_v9  ;;  %2804 = vmatmul.f32.vlgmr.msrb.gmra.mxu0 %v7693_v1  ;;  %v6568_v45 = vadd.f32 %v4785_v53, %v2072_v42  ;;  %v1608_v42 = vadd.f32 %v6526_v56, %v6519_v26 }
 0x185   : > { %v4787_v28 = vpop.eup %4786  ;;  %4788 = vpow2.f32 %v2149_v29  ;;  %v2341_v58 = vmul.f32 1.442695, %v2297_v14  ;;  %v2006_v62 = vadd.f32 %v1936_v49, %v1844_v22  ;;  %v4453_v29 = vadd.f32 -1.0, %v6185_v36 }
 0x186   : > { %v2392_v52 = vadd.f32 %v4787_v28, %v2264_v54  ;;  %v1611_v36 = vadd.f32 %v6551_v0, %v6547_v25 }
 0x187   : > { %4790 = vpow2.f32 %v2341_v58  ;;  %v2042_v20 = vadd.f32 %v6107_v59, %v2006_v62  ;;  %4436 = vmatmul.msk.f32.gmra.mxu2 %vm6529_vm0, %v6440_v41  ;;  %v1939_v47 = vpop.f32.mrf.mxu3  ;;  %2917 = vmatmul.f32.vlgmr.msrb.gmra.mxu1 %v7693_v1  ;;  %vm7694_vm0 = vcmask 523264  }
 0x188   : > { %v4496_v9 = vadd.f32 -1.0, %v2392_v52 }
 0x189   : > { %v2074_v31 = vmax.f32 %v2042_v20, 0.0  ;;  %v2106_v30 = vmin.f32 %v2042_v20, 0.0  ;;  %v6577_v38 = vpop.f32.mrf.mxu0 }
 0x18a   : > { %v1777_v48 = vpop.f32.mrf.mxu2  ;;  %2499 = vrot.lane.b32.xlu1 %v4496_v9, %s5039_s25 }
 0x18b   : > { %v4789_v21 = vpop.eup %4788  ;;  %v2151_v59 = vmul.f32 1.442695, %v2106_v30  ;;  %v2298_v39 = vsub.f32 0.0, %v2074_v31  ;;  %v1845_v49 = vadd.f32 %v1777_v48, %v1608_v42  ;;  %v2266_v48 = vsub.f32 0.0, %v2106_v30 }
 0x18c   : > { %1989 = vmatmul.f32.gmra.mxu3 %v6498_v63  ;;  %2807 = vmatmul.f32.gmra.mxu0 %v7693_v1  ;;  %v2478_v41 = vpop.permute.xlu2 %2477  ;;  %v6582_v27 = vpop.f32.mrf.mxu1  ;;  %v6584_v26 = vadd.f32 %v4789_v21, %v2073_v37  ;;  %v6590_v63 = vld [vmem:[%s7618_s2] ss:$0 sm:$0xff]  ;;  %v1614_v30 = vadd.f32 %v6564_v32, %v6561_v17 }
 0x18d   : > { %v4791_v56 = vpop.eup %4790  ;;  %4792 = vpow2.f32 %v2151_v59  ;;  %v2343_v11 = vmul.f32 1.442695, %v2298_v39  ;;  %v2007_v53 = vadd.f32 %v1939_v47, %v1845_v49  ;;  %v6596_v37 = vsel %vm7694_vm0, %v4453_v29, %v2478_v41 }
 0x18e   : > { %v2393_v14 = vadd.f32 %v4791_v56, %v2265_v5  ;;  %v2635_v20 = vrot.slane %v6596_v37, 7  ;;  %vm7695_vm0 = vcmask 1040384  }
 0x18f   : > { %4794 = vpow2.f32 %v2343_v11  ;;  %v2043_v22 = vadd.f32 %v6590_v63, %v2007_v53  ;;  %1827 = vmatmul.f32.gmra.mxu2 %v6515_v12  ;;  %v1942_v50 = vpop.f32.mrf.mxu3  ;;  %2920 = vmatmul.f32.gmra.mxu1 %v7693_v1 }
 0x190   : > { %v4497_v54 = vadd.f32 -1.0, %v2393_v14  ;;  %v2724_v39 = vsel %vm7695_vm0, 0.0, %v2635_v20 }
 0x191   : > { %v2075_v28 = vmax.f32 %v2043_v22, 0.0  ;;  %v2107_v58 = vmin.f32 %v2043_v22, 0.0  ;;  %v6600_v62 = vpop.f32.mrf.mxu0 }
 0x192   : > { %v1780_v52 = vpop.f32.mrf.mxu2  ;;  %2501 = vrot.lane.b32.xlu2 %v4497_v54, %s5039_s25 }
 0x193   : > { %v4793_v12 = vpop.eup %4792  ;;  %v2153_v47 = vmul.f32 1.442695, %v2107_v58  ;;  %v2299_v9 = vsub.f32 0.0, %v2075_v28  ;;  %v1846_v1 = vadd.f32 %v1780_v52, %v1611_v36  ;;  %v2267_v52 = vsub.f32 0.0, %v2107_v58 }
 0x194   : > { %v1619_v42 = vpop.f32.mrf.mxu1  ;;  %2810 = vmatmul.f32.gmra.mxu0 %v6596_v37  ;;  %3249 = vmatmul.f32.vlgmr.msrb.gmra.mxu3 %v6596_v37  ;;  %v6606_v25 = vadd.f32 %v4793_v12, %v2074_v31 }
 0x195   : > { %v4795_v0 = vpop.eup %4794  ;;  %4796 = vpow2.f32 %v2153_v47  ;;  %v2345_v21 = vmul.f32 1.442695, %v2299_v9  ;;  %v2008_v59 = vadd.f32 %v1942_v50, %v1846_v1 }
 0x196   : > { %v2394_v49 = vadd.f32 %v4795_v0, %v2266_v48  ;;  %v1617_v0 = vadd.f32 %v6582_v27, %v6577_v38 }
 0x197   : > { %4798 = vpow2.f32 %v2345_v21  ;;  %v2044_v41 = vadd.f32 %v6590_v63, %v2008_v59  ;;  %v1945_v5 = vpop.f32.mrf.mxu3  ;;  %4533 = vmatmul.msk.f32.gmra.mxu1 %vm5528_vm2, %v2724_v39  ;;  %4564 = vmatmul.msk.f32.vlgmr.msrb.gmra.mxu2 %vm5543_vm3, %v2724_v39  ;;  %vm7696_vm3 = vcmask 523264  }
 0x198   : > { %v4498_v31 = vadd.f32 -1.0, %v2394_v49 }
 0x199   : > { %v2076_v56 = vmax.f32 %v2044_v41, 0.0  ;;  %v2108_v11 = vmin.f32 %v2044_v41, 0.0  ;;  %v6618_v53 = vpop.f32.mrf.mxu0 }
 0x19a   : > { %v1783_v29 = vpop.f32.mrf.mxu2  ;;  %2503 = vrot.lane.b32.xlu0 %v4498_v31, %s5039_s25 }
 0x19b   : > { %v4797_v14 = vpop.eup %4796  ;;  %v2155_v22 = vmul.f32 1.442695, %v2108_v11  ;;  %v2300_v50 = vsub.f32 0.0, %v2076_v56  ;;  %v1847_v54 = vadd.f32 %v1783_v29, %v1614_v30  ;;  %v2268_v30 = vsub.f32 0.0, %v2108_v11 }
 0x19c   : > { %v1622_v36 = vpop.f32.mrf.mxu1  ;;  %v6621_v12 = vadd.f32 %v4797_v14, %v2075_v28 }
 0x19d   : > { %v4799_v6 = vpop.eup %4798  ;;  %4800 = vpow2.f32 %v2155_v22  ;;  %v2347_v47 = vmul.f32 1.442695, %v2300_v50  ;;  %v2009_v9 = vadd.f32 %v1945_v5, %v1847_v54 }
 0x19e   : > { %v2395_v17 = vadd.f32 %v4799_v6, %v2267_v52  ;;  %v1620_v6 = vadd.f32 %v1619_v42, %v6600_v62 }
 0x19f   : > { %4802 = vpow2.f32 %v2347_v47  ;;  %v2045_v32 = vadd.f32 %v6590_v63, %v2009_v9  ;;  %v1948_v1 = vpop.f32.mrf.mxu3 }
 0x1a0   : > { %v4499_v48 = vadd.f32 -1.0, %v2395_v17 }
 0x1a1   : > { %v2077_v21 = vmax.f32 %v2045_v32, 0.0  ;;  %v2109_v59 = vmin.f32 %v2045_v32, 0.0  ;;  %v6626_v39 = vpop.f32.mrf.mxu0 }
 0x1a2   : > { %v1786_v58 = vpop.f32.mrf.mxu2  ;;  %2505 = vrot.lane.b32.xlu1 %v4499_v48, %s5039_s25 }
 0x1a3   : > { %v4801_v28 = vpop.eup %4800  ;;  %v2157_v49 = vmul.f32 1.442695, %v2109_v59  ;;  %v2301_v41 = vsub.f32 0.0, %v2077_v21  ;;  %v1848_v5 = vadd.f32 %v1786_v58, %v1617_v0 }
 0x1a4   : > { %v6629_v31 = vpop.f32.mrf.mxu1  ;;  %v6631_v29 = vadd.f32 %v4801_v28, %v2076_v56  ;;  %v4454_v28 = vadd.f32 -1.0, %v6221_v43  ;;  %v1623_v43 = vadd.f32 %v1622_v36, %v6618_v53 }
 0x1a5   : > { %v4803_v14 = vpop.eup %4802  ;;  %4804 = vpow2.f32 %v2157_v49  ;;  %v2349_v22 = vmul.f32 1.442695, %v2301_v41  ;;  %v2010_v38 = vadd.f32 %v1948_v1, %v1848_v5  ;;  %v2269_v49 = vsub.f32 0.0, %v2109_v59  ;;  %v2484_v59 = vpop.permute.xlu2 %2483 }
 0x1a6   : > { %v2396_v27 = vadd.f32 %v4803_v14, %v2268_v30 }
 0x1a7   : > { %4806 = vpow2.f32 %v2349_v22  ;;  %v2046_v50 = vadd.f32 %v6590_v63, %v2010_v38  ;;  %v1951_v54 = vpop.f32.mrf.mxu3 }
 0x1a8   : > { %v4500_v52 = vadd.f32 -1.0, %v2396_v27 }
 0x1a9   : > { %v2078_v47 = vmax.f32 %v2046_v50, 0.0  ;;  %v2110_v9 = vmin.f32 %v2046_v50, 0.0  ;;  %v6635_v17 = vpop.f32.mrf.mxu0 }
 0x1aa   : > { %v1789_v32 = vpop.f32.mrf.mxu2  ;;  %2507 = vrot.lane.b32.xlu2 %v4500_v52, %s5039_s25 }
 0x1ab   : > { %v4805_v56 = vpop.eup %4804  ;;  %v2159_v11 = vmul.f32 1.442695, %v2110_v9  ;;  %v2302_v48 = vsub.f32 0.0, %v2078_v47  ;;  %v1849_v0 = vadd.f32 %v1789_v32, %v1620_v6 }
 0x1ac   : > { %v2480_v1 = vpop.permute.xlu0 %2479  ;;  %v6638_v58 = vpop.f32.mrf.mxu1  ;;  %v6641_v41 = vadd.f32 %v4805_v56, %v2077_v21  ;;  %v4456_v56 = vadd.f32 -1.0, %v6300_v16 }
 0x1ad   : > { %v4807_v62 = vpop.eup %4806  ;;  %4808 = vpow2.f32 %v2159_v11  ;;  %v2351_v42 = vmul.f32 1.442695, %v2302_v48  ;;  %v2011_v5 = vadd.f32 %v1951_v54, %v1849_v0  ;;  %v2574_v30 = vsel %vm7696_vm3, %v4454_v28, %v2480_v1 }
 0x1ae   : > { %v2397_v14 = vadd.f32 %v4807_v62, %v2269_v49  ;;  %v2636_v38 = vrot.slane %v2574_v30, 7  ;;  %2813 = vmatmul.f32.gmra.mxu0 %v2574_v30  ;;  %3252 = vmatmul.f32.gmra.mxu3 %v2574_v30  ;;  %v4455_v28 = vadd.f32 -1.0, %v6264_v8  ;;  %v2270_v49 = vsub.f32 0.0, %v2110_v9 }
 0x1af   : > { %4810 = vpow2.f32 %v2351_v42  ;;  %v2047_v22 = vadd.f32 %v6590_v63, %v2011_v5  ;;  %v1954_v27 = vpop.f32.mrf.mxu3  ;;  %v6657_v37 = vsel %vm7696_vm3, %v4456_v56, %v2484_v59 }
 0x1b0   : > { %v4501_v50 = vadd.f32 -1.0, %v2397_v14  ;;  %v2637_v54 = vsel %vm7695_vm0, %v2635_v20, %v2636_v38  ;;  %vm7697_vm0 = vmmov %vm7696_vm3  ;;  %v2640_v9 = vrot.slane %v6657_v37, 7  ;;  %vm7698_vm3 = vcmask 1040384  }
 0x1b1   : > { %v2079_v21 = vmax.f32 %v2047_v22, 0.0  ;;  %v2111_v52 = vmin.f32 %v2047_v22, 0.0  ;;  %v6646_v6 = vpop.f32.mrf.mxu0  ;;  %2926 = vmatmul.f32.gmra.mxu1 %v2637_v54  ;;  %3090 = vmatmul.f32.gmra.mxu2 %v2637_v54 }
 0x1b2   : > { %v1792_v32 = vpop.f32.mrf.mxu2  ;;  %2509 = vrot.lane.b32.xlu0 %v4501_v50, %s5039_s25 }
 0x1b3   : > { %v4809_v11 = vpop.eup %4808  ;;  %v2161_v48 = vmul.f32 1.442695, %v2111_v52  ;;  %v2303_v0 = vsub.f32 0.0, %v2079_v21  ;;  %v1850_v1 = vadd.f32 %v1792_v32, %v1623_v43 }
 0x1b4   : > { %v2482_v53 = vpop.permute.xlu1 %2481  ;;  %v6653_v36 = vpop.f32.mrf.mxu1  ;;  %v6659_v20 = vadd.f32 %v4809_v11, %v2078_v47  ;;  %v1626_v47 = vadd.f32 %v6629_v31, %v6626_v39 }
 0x1b5   : > { %v4811_v62 = vpop.eup %4810  ;;  %4812 = vpow2.f32 %v2161_v48  ;;  %v2353_v16 = vmul.f32 1.442695, %v2303_v0  ;;  %v2012_v42 = vadd.f32 %v1954_v27, %v1850_v1  ;;  %v2575_v5 = vsel %vm7697_vm0, %v4455_v28, %v2482_v53  ;;  %vm7699_vm0 = vmmov %vm7698_vm3 }
 0x1b6   : > { %v2398_v30 = vadd.f32 %v4811_v62, %v2270_v49  ;;  %v2638_v22 = vrot.slane %v2575_v5, 7  ;;  %2816 = vmatmul.f32.gmra.mxu0 %v2575_v5  ;;  %3255 = vmatmul.f32.gmra.mxu3 %v2575_v5  ;;  %v1629_v5 = vadd.f32 %v6638_v58, %v6635_v17 }
 0x1b7   : > { %4814 = vpow2.f32 %v2353_v16  ;;  %v2048_v14 = vadd.f32 %v6590_v63, %v2012_v42  ;;  %v1957_v8 = vpop.f32.mrf.mxu3 }
 0x1b8   : > { %v4502_v50 = vadd.f32 -1.0, %v2398_v30  ;;  %v2639_v27 = vsel %vm7698_vm3, %v2636_v38, %v2638_v22  ;;  %v2641_v32 = vsel %vm7699_vm0, %v2638_v22, %v2640_v9  ;;  %v2271_v38 = vsub.f32 0.0, %v2111_v52  ;;  %vm7701_vm3 = vmmov %vm7699_vm0 }
 0x1b9   : > { %v2080_v43 = vmax.f32 %v2048_v14, 0.0  ;;  %v2112_v59 = vmin.f32 %v2048_v14, 0.0  ;;  %v6666_v54 = vpop.f32.mrf.mxu0  ;;  %4534 = vmatmul.msk.f32.gmra.mxu1 %vm5619_vm4, %v2639_v27  ;;  %4565 = vmatmul.msk.f32.gmra.mxu2 %vm5528_vm2, %v2639_v27  ;;  %vm7700_vm2 = vcmask 523264  }
 0x1ba   : > { %v1795_v56 = vpop.f32.mrf.mxu2  ;;  %2511 = vrot.lane.b32.xlu1 %v4502_v50, %s5039_s25  ;;  %vm7702_vm0 = vmmov %vm7700_vm2 }
 0x1bb   : > { %v4813_v11 = vpop.eup %4812  ;;  %v2163_v39 = vmul.f32 1.442695, %v2112_v59  ;;  %v2304_v31 = vsub.f32 0.0, %v2080_v43  ;;  %v1851_v48 = vadd.f32 %v1795_v56, %v1626_v47 }
 0x1bc   : > { %v6677_v0 = vpop.f32.mrf.mxu1  ;;  %v6679_v1 = vadd.f32 %v4813_v11, %v2079_v21  ;;  %v4457_v11 = vadd.f32 -1.0, %v6343_v2  ;;  %v1632_v2 = vadd.f32 %v6653_v36, %v6646_v6 }
 0x1bd   : > { %v4815_v53 = vpop.eup %4814  ;;  %4816 = vpow2.f32 %v2163_v39  ;;  %v2355_v28 = vmul.f32 1.442695, %v2304_v31  ;;  %v2013_v49 = vadd.f32 %v1957_v8, %v1851_v48  ;;  %v2272_v39 = vsub.f32 0.0, %v2112_v59 }
 0x1be   : > { %v2399_v62 = vadd.f32 %v4815_v53, %v2271_v38  ;;  %2819 = vmatmul.f32.gmra.mxu0 %v6657_v37  ;;  %3258 = vmatmul.f32.gmra.mxu3 %v6657_v37 }
 0x1bf   : > { %4818 = vpow2.f32 %v2355_v28  ;;  %v2049_v35 = vadd.f32 %v6590_v63, %v2013_v49  ;;  %v1960_v16 = vpop.f32.mrf.mxu3 }
 0x1c0   : > { %v4503_v42 = vadd.f32 -1.0, %v2399_v62 }
 0x1c1   : > { %v2081_v52 = vmax.f32 %v2049_v35, 0.0  ;;  %v2113_v21 = vmin.f32 %v2049_v35, 0.0  ;;  %v6686_v30 = vpop.f32.mrf.mxu0  ;;  %2932 = vmatmul.f32.gmra.mxu1 %v2641_v32  ;;  %3096 = vmatmul.f32.gmra.mxu2 %v2641_v32 }
 0x1c2   : > { %v1798_v14 = vpop.f32.mrf.mxu2  ;;  %2513 = vrot.lane.b32.xlu2 %v4503_v42, %s5039_s25 }
 0x1c3   : > { %v4817_v22 = vpop.eup %4816  ;;  %v2165_v8 = vmul.f32 1.442695, %v2113_v21  ;;  %v2305_v47 = vsub.f32 0.0, %v2081_v52  ;;  %v1852_v50 = vadd.f32 %v1798_v14, %v1629_v5  ;;  %v4459_v14 = vadd.f32 -1.0, %v6420_v51 }
 0x1c4   : > { %v6689_v27 = vpop.f32.mrf.mxu1  ;;  %v2486_v56 = vpop.permute.xlu0 %2485  ;;  %v6692_v17 = vadd.f32 %v4817_v22, %v2080_v43 }
 0x1c5   : > { %v4819_v58 = vpop.eup %4818  ;;  %4820 = vpow2.f32 %v2165_v8  ;;  %v2357_v31 = vmul.f32 1.442695, %v2305_v47  ;;  %v2014_v48 = vadd.f32 %v1960_v16, %v1852_v50  ;;  %v2577_v32 = vsel %vm7700_vm2, %v4457_v11, %v2486_v56  ;;  %v2490_v43 = vpop.permute.xlu2 %2489  ;;  %vm7704_vm2 = vmmov %vm7701_vm3 }
 0x1c6   : > { %v2400_v38 = vadd.f32 %v4819_v58, %v2272_v39  ;;  %v2642_v28 = vrot.slane %v2577_v32, 7  ;;  %2822 = vmatmul.f32.gmra.mxu0 %v2577_v32  ;;  %3261 = vmatmul.f32.gmra.mxu3 %v2577_v32  ;;  %v2273_v47 = vsub.f32 0.0, %v2113_v21  ;;  %v6711_v50 = vsel %vm7702_vm0, %v4459_v14, %v2490_v43 }
 0x1c7   : > { %4822 = vpow2.f32 %v2357_v31  ;;  %v2050_v53 = vadd.f32 %v6590_v63, %v2014_v48  ;;  %v1963_v49 = vpop.f32.mrf.mxu3  ;;  %v2646_v21 = vrot.slane %v6711_v50, 7 }
 0x1c8   : > { %v4504_v62 = vadd.f32 -1.0, %v2400_v38  ;;  %v2643_v16 = vsel %vm7701_vm3, %v2640_v9, %v2642_v28  ;;  %v4458_v9 = vadd.f32 -1.0, %v6377_v23  ;;  %vm7705_vm3 = vmmov %vm7704_vm2 }
 0x1c9   : > { %v2082_v59 = vmax.f32 %v2050_v53, 0.0  ;;  %v2114_v35 = vmin.f32 %v2050_v53, 0.0  ;;  %v6701_v42 = vpop.f32.mrf.mxu0  ;;  %4535 = vmatmul.msk.f32.gmra.mxu1 %vm5697_vm5, %v2643_v16  ;;  %4566 = vmatmul.msk.f32.gmra.mxu2 %vm5619_vm4, %v2643_v16  ;;  %vm7703_vm4 = vmmov %vm7702_vm0 }
 0x1ca   : > { %v1801_v5 = vpop.f32.mrf.mxu2  ;;  %2515 = vrot.lane.b32.xlu0 %v4504_v62, %s5039_s25 }
 0x1cb   : > { %v4821_v22 = vpop.eup %4820  ;;  %v2167_v6 = vmul.f32 1.442695, %v2114_v35  ;;  %v2306_v36 = vsub.f32 0.0, %v2082_v59  ;;  %v1853_v8 = vadd.f32 %v1801_v5, %v1632_v2 }
 0x1cc   : > { %v2488_v37 = vpop.permute.xlu1 %2487  ;;  %v6713_v56 = vadd.f32 %v4821_v22, %v2081_v52  ;;  %v6715_v51 = vpop.f32.mrf.mxu1  ;;  %v1635_v52 = vadd.f32 %v6677_v0, %v6666_v54  ;;  %v2274_v54 = vsub.f32 0.0, %v2114_v35 }
 0x1cd   : > { %v4823_v10 = vpop.eup %4822  ;;  %4824 = vpow2.f32 %v2167_v6  ;;  %v2359_v11 = vmul.f32 1.442695, %v2306_v36  ;;  %v2015_v39 = vadd.f32 %v1963_v49, %v1853_v8  ;;  %v2578_v58 = vsel %vm7703_vm4, %v4458_v9, %v2488_v37 }
 0x1ce   : > { %v2401_v31 = vadd.f32 %v4823_v10, %v2273_v47  ;;  %v2644_v32 = vrot.slane %v2578_v58, 7  ;;  %2825 = vmatmul.f32.gmra.mxu0 %v2578_v58  ;;  %3264 = vmatmul.f32.gmra.mxu3 %v2578_v58 }
 0x1cf   : > { %4826 = vpow2.f32 %v2359_v11  ;;  %v2051_v48 = vadd.f32 %v6590_v63, %v2015_v39  ;;  %v1966_v23 = vpop.f32.mrf.mxu3 }
 0x1d0   : > { %v4505_v38 = vadd.f32 -1.0, %v2401_v31  ;;  %v2645_v62 = vsel %vm7704_vm2, %v2642_v28, %v2644_v32  ;;  %v2647_v2 = vsel %vm7705_vm3, %v2644_v32, %v2646_v21 }
 0x1d1   : > { %v2083_v53 = vmax.f32 %v2051_v48, 0.0  ;;  %v2115_v49 = vmin.f32 %v2051_v48, 0.0  ;;  %2938 = vmatmul.f32.gmra.mxu1 %v2645_v62  ;;  %3102 = vmatmul.f32.gmra.mxu2 %v2645_v62  ;;  %v6727_v6 = vpop.f32.mrf.mxu0 }
 0x1d2   : > { %v1804_v43 = vpop.f32.mrf.mxu2  ;;  %2517 = vrot.lane.b32.xlu1 %v4505_v38, %s5039_s25  ;;  %v4460_v38 = vadd.f32 -1.0, %v6466_v33 }
 0x1d3   : > { %v4825_v16 = vpop.eup %4824  ;;  %v2169_v5 = vmul.f32 1.442695, %v2115_v49  ;;  %v2307_v14 = vsub.f32 0.0, %v2083_v53  ;;  %v1854_v22 = vadd.f32 %v1804_v43, %v1635_v52  ;;  %v2275_v62 = vsub.f32 0.0, %v2115_v49 }
 0x1d4   : > { %v6729_v0 = vadd.f32 %v4825_v16, %v2082_v59  ;;  %v6732_v47 = vpop.f32.mrf.mxu1  ;;  %v1638_v59 = vadd.f32 %v6689_v27, %v6686_v30  ;;  %v2496_v49 = vpop.permute.xlu2 %2495 }
 0x1d5   : > { %v4827_v36 = vpop.eup %4826  ;;  %4828 = vpow2.f32 %v2169_v5  ;;  %v2361_v28 = vmul.f32 1.442695, %v2307_v14  ;;  %v2016_v8 = vadd.f32 %v1966_v23, %v1854_v22 }
 0x1d6   : > { %v2402_v37 = vadd.f32 %v4827_v36, %v2274_v54  ;;  %2828 = vmatmul.f32.gmra.mxu0 %v6711_v50  ;;  %3267 = vmatmul.f32.gmra.mxu3 %v6711_v50 }
 0x1d7   : > { %4830 = vpow2.f32 %v2361_v28  ;;  %v2052_v9 = vadd.f32 %v6590_v63, %v2016_v8  ;;  %v1969_v10 = vpop.f32.mrf.mxu3 }
 0x1d8   : > { %v4506_v11 = vadd.f32 -1.0, %v2402_v37 }
 0x1d9   : > { %v2084_v35 = vmax.f32 %v2052_v9, 0.0  ;;  %v2116_v39 = vmin.f32 %v2052_v9, 0.0  ;;  %4536 = vmatmul.msk.f32.gmra.mxu1 %vm5768_vm6, %v2647_v2  ;;  %4567 = vmatmul.msk.f32.gmra.mxu2 %vm5697_vm5, %v2647_v2  ;;  %v6746_v5 = vpop.f32.mrf.mxu0  ;;  %vm7706_vm5 = vmmov %vm7702_vm0 }
 0x1da   : > { %v1807_v58 = vpop.f32.mrf.mxu2  ;;  %2519 = vrot.lane.b32.xlu2 %v4506_v11, %s5039_s25  ;;  %vm7707_vm0 = vmmov %vm7704_vm2 }
 0x1db   : > { %v4829_v31 = vpop.eup %4828  ;;  %v2171_v48 = vmul.f32 1.442695, %v2116_v39  ;;  %v2308_v32 = vsub.f32 0.0, %v2084_v35  ;;  %v1855_v23 = vadd.f32 %v1807_v58, %v1638_v59  ;;  %vm7708_vm2 = vmmov %vm7703_vm4 }
 0x1dc   : > { %v2492_v52 = vpop.permute.xlu0 %2491  ;;  %v6744_v30 = vadd.f32 %v4829_v31, %v2083_v53  ;;  %v1641_v53 = vadd.f32 %v6715_v51, %v6701_v42  ;;  %v1646_v8 = vpop.f32.mrf.mxu1  ;;  %v4461_v51 = vadd.f32 -1.0, %v6500_v4  ;;  %vm7709_vm3 = vmmov %vm7707_vm0 }
 0x1dd   : > { %v4831_v27 = vpop.eup %4830  ;;  %4832 = vpow2.f32 %v2171_v48  ;;  %v2363_v43 = vmul.f32 1.442695, %v2308_v32  ;;  %v2017_v16 = vadd.f32 %v1969_v10, %v1855_v23  ;;  %v2580_v46 = vsel %vm7706_vm5, %v4460_v38, %v2492_v52  ;;  %vm7710_vm5 = vmmov %vm7707_vm0 }
 0x1de   : > { %v2403_v2 = vadd.f32 %v4831_v27, %v2275_v62  ;;  %v2648_v22 = vrot.slane %v2580_v46, 7  ;;  %2831 = vmatmul.f32.gmra.mxu0 %v2580_v46  ;;  %3270 = vmatmul.f32.gmra.mxu3 %v2580_v46  ;;  %v4462_v10 = vadd.f32 -1.0, %v6533_v61  ;;  %v2276_v48 = vsub.f32 0.0, %v2116_v39 }
 0x1df   : > { %4834 = vpow2.f32 %v2363_v43  ;;  %v2053_v14 = vadd.f32 %v6590_v63, %v2017_v16  ;;  %v1972_v54 = vpop.f32.mrf.mxu3 }
 0x1e0   : > { %v4507_v33 = vadd.f32 -1.0, %v2403_v2  ;;  %v2649_v37 = vsel %vm7707_vm0, %v2646_v21, %v2648_v22  ;;  %v6759_v32 = vsel %vm7703_vm4, %v4462_v10, %v2496_v49  ;;  %vm7712_vm4 = vmmov %vm7708_vm2 }
 0x1e1   : > { %v2085_v36 = vmax.f32 %v2053_v14, 0.0  ;;  %v2117_v28 = vmin.f32 %v2053_v14, 0.0  ;;  %2944 = vmatmul.f32.gmra.mxu1 %v2649_v37  ;;  %3108 = vmatmul.f32.gmra.mxu2 %v2649_v37  ;;  %v2652_v39 = vrot.slane %v6759_v32, 7  ;;  %v1536_v43 = vpop.f32.mrf.mxu0 }
 0x1e2   : > { %v1810_v9 = vpop.f32.mrf.mxu2  ;;  %2521 = vrot.lane.b32.xlu0 %v4507_v33, %s5039_s25 }
 0x1e3   : > { %v4833_v11 = vpop.eup %4832  ;;  %v2173_v59 = vmul.f32 1.442695, %v2117_v28  ;;  %v2309_v58 = vsub.f32 0.0, %v2085_v36  ;;  %v1856_v31 = vadd.f32 %v1810_v9, %v1641_v53  ;;  %v2277_v9 = vsub.f32 0.0, %v2117_v28 }
 0x1e4   : > { %v2494_v42 = vpop.permute.xlu1 %2493  ;;  %v6761_v50 = vadd.f32 %v4833_v11, %v2084_v35  ;;  %v1644_v35 = vadd.f32 %v6732_v47, %v6727_v6  ;;  %v1649_v47 = vpop.f32.mrf.mxu1 }
 0x1e5   : > { %v4835_v21 = vpop.eup %4834  ;;  %4836 = vpow2.f32 %v2173_v59  ;;  %v2365_v23 = vmul.f32 1.442695, %v2309_v58  ;;  %v2018_v52 = vadd.f32 %v1972_v54, %v1856_v31  ;;  %v2581_v61 = vsel %vm7708_vm2, %v4461_v51, %v2494_v42 }
 0x1e6   : > { %v2404_v38 = vadd.f32 %v4835_v21, %v2276_v48  ;;  %v2650_v27 = vrot.slane %v2581_v61, 7  ;;  %2834 = vmatmul.f32.gmra.mxu0 %v2581_v61  ;;  %3273 = vmatmul.f32.gmra.mxu3 %v2581_v61  ;;  %v1647_v51 = vadd.f32 %v1646_v8, %v6746_v5 }
 0x1e7   : > { %4838 = vpow2.f32 %v2365_v23  ;;  %v2054_v62 = vadd.f32 %v6590_v63, %v2018_v52  ;;  %v1975_v4 = vpop.f32.mrf.mxu3 }
 0x1e8   : > { %v4508_v16 = vadd.f32 -1.0, %v2404_v38  ;;  %v2651_v14 = vsel %vm7709_vm3, %v2648_v22, %v2650_v27  ;;  %v2653_v54 = vsel %vm7710_vm5, %v2650_v27, %v2652_v39  ;;  %v4463_v27 = vadd.f32 -1.0, %v6554_v40  ;;  %vm7715_vm3 = vmmov %vm7707_vm0 }
 0x1e9   : > { %v2086_v46 = vmax.f32 %v2054_v62, 0.0  ;;  %v2118_v2 = vmin.f32 %v2054_v62, 0.0  ;;  %4537 = vmatmul.msk.f32.gmra.mxu1 %vm5839_vm7, %v2651_v14  ;;  %4568 = vmatmul.msk.f32.gmra.mxu2 %vm5768_vm6, %v2651_v14  ;;  %vm7711_vm6 = vmmov %vm7708_vm2  ;;  %v1650_v40 = vadd.f32 %v1649_v47, %v1536_v43 }
 0x1ea   : > { %v1813_v33 = vpop.f32.mrf.mxu2  ;;  %2523 = vrot.lane.b32.xlu1 %v4508_v16, %s5039_s25  ;;  %vm7716_vm5 = vmmov %vm7712_vm4 }
 0x1eb   : > { %v4837_v53 = vpop.eup %4836  ;;  %v2175_v49 = vmul.f32 1.442695, %v2118_v2  ;;  %v2310_v6 = vsub.f32 0.0, %v2086_v46  ;;  %v1857_v37 = vadd.f32 %v1813_v33, %v1644_v35 }
 0x1ec   : > { %v6777_v22 = vadd.f32 %v4837_v53, %v2085_v36  ;;  %v1539_v36 = vpop.f32.mrf.mxu0  ;;  %v1652_v8 = vpop.f32.mrf.mxu1 }
 0x1ed   : > { %v4839_v10 = vpop.eup %4838  ;;  %4840 = vpow2.f32 %v2175_v49  ;;  %v2367_v11 = vmul.f32 1.442695, %v2310_v6  ;;  %v2019_v59 = vadd.f32 %v1975_v4, %v1857_v37  ;;  %v2278_v4 = vsub.f32 0.0, %v2118_v2  ;;  %v2502_v2 = vpop.permute.xlu2 %2501 }
 0x1ee   : > { %v2405_v58 = vadd.f32 %v4839_v10, %v2277_v9  ;;  %2837 = vmatmul.f32.gmra.mxu0 %v6759_v32  ;;  %3276 = vmatmul.f32.gmra.mxu3 %v6759_v32  ;;  %v4464_v32 = vadd.f32 -1.0, %v6568_v45 }
 0x1ef   : > { %4842 = vpow2.f32 %v2367_v11  ;;  %v2055_v44 = vadd.f32 %v6590_v63, %v2019_v59  ;;  %v1978_v31 = vpop.f32.mrf.mxu3  ;;  %v4465_v59 = vadd.f32 -1.0, %v6584_v26 }
 0x1f0   : > { %v4509_v42 = vadd.f32 -1.0, %v2405_v58 }
 0x1f1   : > { %v2087_v48 = vmax.f32 %v2055_v44, 0.0  ;;  %v2119_v28 = vmin.f32 %v2055_v44, 0.0  ;;  %2950 = vmatmul.f32.gmra.mxu1 %v2653_v54  ;;  %3114 = vmatmul.f32.gmra.mxu2 %v2653_v54 }
 0x1f2   : > { %v1816_v21 = vpop.f32.mrf.mxu2  ;;  %2525 = vrot.lane.b32.xlu2 %v4509_v42, %s5039_s25 }
 0x1f3   : > { %v4841_v23 = vpop.eup %4840  ;;  %v2177_v52 = vmul.f32 1.442695, %v2119_v28  ;;  %v2311_v61 = vsub.f32 0.0, %v2087_v48  ;;  %v1858_v38 = vadd.f32 %v1816_v21, %v1647_v51  ;;  %v6800_v51 = vsel %vm7712_vm4, %v4465_v59, %v2502_v2 }
 0x1f4   : > { %v2498_v62 = vpop.permute.xlu0 %2497  ;;  %v6785_v35 = vadd.f32 %v4841_v23, %v2086_v46  ;;  %v1542_v47 = vpop.f32.mrf.mxu0 }
 0x1f5   : > { %v4843_v16 = vpop.eup %4842  ;;  %4844 = vpow2.f32 %v2177_v52  ;;  %v2369_v5 = vmul.f32 1.442695, %v2311_v61  ;;  %v2020_v14 = vadd.f32 %v1978_v31, %v1858_v38  ;;  %v2583_v54 = vsel %vm7711_vm6, %v4463_v27, %v2498_v62  ;;  %v1655_v38 = vpop.f32.mrf.mxu1  ;;  %vm7718_vm6 = vmmov %vm7712_vm4 }
 0x1f6   : > { %v2406_v33 = vadd.f32 %v4843_v16, %v2278_v4  ;;  %v2654_v49 = vrot.slane %v2583_v54, 7  ;;  %2840 = vmatmul.f32.gmra.mxu0 %v2583_v54  ;;  %3279 = vmatmul.f32.gmra.mxu3 %v2583_v54  ;;  %v1653_v4 = vadd.f32 %v1652_v8, %v1539_v36 }
 0x1f7   : > { %4846 = vpow2.f32 %v2369_v5  ;;  %v2056_v53 = vadd.f32 %v6590_v63, %v2020_v14  ;;  %v1981_v6 = vpop.f32.mrf.mxu3 }
 0x1f8   : > { %v4510_v37 = vadd.f32 -1.0, %v2406_v33  ;;  %v2655_v10 = vsel %vm7707_vm0, %v2652_v39, %v2654_v49  ;;  %v2279_v39 = vsub.f32 0.0, %v2119_v28  ;;  %v2658_v28 = vrot.slane %v6800_v51, 7 }
 0x1f9   : > { %v2088_v46 = vmax.f32 %v2056_v53, 0.0  ;;  %v2120_v9 = vmin.f32 %v2056_v53, 0.0  ;;  %4538 = vmatmul.msk.f32.gmra.mxu1 %vm5904_vm8, %v2655_v10  ;;  %4569 = vmatmul.msk.f32.gmra.mxu2 %vm5839_vm7, %v2655_v10  ;;  %vm7713_vm7 = vmmov %vm7708_vm2 }
 0x1fa   : > { %v1819_v11 = vpop.f32.mrf.mxu2  ;;  %2527 = vrot.lane.b32.xlu0 %v4510_v37, %s5039_s25  ;;  %vm7714_vm2 = vmmov %vm7707_vm0 }
 0x1fb   : > { %v4845_v58 = vpop.eup %4844  ;;  %v2179_v44 = vmul.f32 1.442695, %v2120_v9  ;;  %v2312_v31 = vsub.f32 0.0, %v2088_v46  ;;  %v1859_v43 = vadd.f32 %v1819_v11, %v1650_v40  ;;  %v2280_v2 = vsub.f32 0.0, %v2120_v9 }
 0x1fc   : > { %v2500_v42 = vpop.permute.xlu1 %2499  ;;  %v6802_v21 = vadd.f32 %v4845_v58, %v2087_v48  ;;  %v1545_v11 = vpop.f32.mrf.mxu0 }
 0x1fd   : > { %v4847_v24 = vpop.eup %4846  ;;  %4848 = vpow2.f32 %v2179_v44  ;;  %v2371_v23 = vmul.f32 1.442695, %v2312_v31  ;;  %v2021_v26 = vadd.f32 %v1981_v6, %v1859_v43  ;;  %v2584_v52 = vsel %vm7713_vm7, %v4464_v32, %v2500_v42  ;;  %v1658_v42 = vpop.f32.mrf.mxu1  ;;  %vm7721_vm7 = vmmov %vm7714_vm2 }
 0x1fe   : > { %v2407_v61 = vadd.f32 %v4847_v24, %v2279_v39  ;;  %v2656_v27 = vrot.slane %v2584_v52, 7  ;;  %2843 = vmatmul.f32.gmra.mxu0 %v2584_v52  ;;  %3282 = vmatmul.f32.gmra.mxu3 %v2584_v52  ;;  %v1656_v43 = vadd.f32 %v1655_v38, %v1542_v47 }
 0x1ff   : > { %4850 = vpow2.f32 %v2371_v23  ;;  %v2057_v62 = vadd.f32 %v6590_v63, %v2021_v26  ;;  %v1984_v45 = vpop.f32.mrf.mxu3 }
 0x200   : > { %v4511_v48 = vadd.f32 -1.0, %v2407_v61  ;;  %v2657_v14 = vsel %vm7714_vm2, %v2654_v49, %v2656_v27  ;;  %v2659_v54 = vsel %vm7715_vm3, %v2656_v27, %v2658_v28  ;;  %v4466_v61 = vadd.f32 -1.0, %v6606_v25 }
 0x201   : > { %v2089_v16 = vmax.f32 %v2057_v62, 0.0  ;;  %v2121_v5 = vmin.f32 %v2057_v62, 0.0  ;;  %2956 = vmatmul.f32.gmra.mxu1 %v2657_v14  ;;  %3120 = vmatmul.f32.gmra.mxu2 %v2657_v14 }
 0x202   : > { %v1822_v33 = vpop.f32.mrf.mxu2  ;;  %2529 = vrot.lane.b32.xlu1 %v4511_v48, %s5039_s25 }
 0x203   : > { %v4849_v53 = vpop.eup %4848  ;;  %v2181_v6 = vmul.f32 1.442695, %v2121_v5  ;;  %v2313_v37 = vsub.f32 0.0, %v2089_v16  ;;  %v1860_v40 = vadd.f32 %v1822_v33, %v1653_v4  ;;  %v2281_v47 = vsub.f32 0.0, %v2121_v5 }
 0x204   : > { %v6812_v36 = vadd.f32 %v4849_v53, %v2088_v46  ;;  %v1659_v53 = vadd.f32 %v1658_v42, %v1545_v11  ;;  %v2508_v25 = vpop.permute.xlu2 %2507 }
 0x205   : > { %v4851_v8 = vpop.eup %4850  ;;  %4852 = vpow2.f32 %v2181_v6  ;;  %v2373_v10 = vmul.f32 1.442695, %v2313_v37  ;;  %v2022_v49 = vadd.f32 %v1984_v45, %v1860_v40 }
 0x206   : > { %v2408_v59 = vadd.f32 %v4851_v8, %v2280_v2  ;;  %2846 = vmatmul.f32.gmra.mxu0 %v6800_v51  ;;  %3285 = vmatmul.f32.gmra.mxu3 %v6800_v51  ;;  %v4468_v2 = vadd.f32 -1.0, %v6631_v29 }
 0x207   : > { %4854 = vpow2.f32 %v2373_v10  ;;  %v2058_v58 = vadd.f32 %v6590_v63, %v2022_v49  ;;  %v1987_v44 = vpop.f32.mrf.mxu3  ;;  %v2918_v10 = vpop.f32.mrf.mxu1 }
 0x208   : > { %v4512_v31 = vadd.f32 -1.0, %v2408_v59  ;;  %v6834_v51 = vsel %vm7718_vm6, %v4468_v2, %v2508_v25 }
 0x209   : > { %v2090_v9 = vmax.f32 %v2058_v58, 0.0  ;;  %v2122_v46 = vmin.f32 %v2058_v58, 0.0  ;;  %4539 = vmatmul.msk.f32.gmra.mxu1 %vm5974_vm9, %v2659_v54  ;;  %4570 = vmatmul.msk.f32.gmra.mxu2 %vm5904_vm8, %v2659_v54  ;;  %v2805_v54 = vpop.f32.mrf.mxu0  ;;  %vm7717_vm8 = vmmov %vm7707_vm0 }
 0x20a   : > { %v1825_v32 = vpop.f32.mrf.mxu2  ;;  %2531 = vrot.lane.b32.xlu2 %v4512_v31, %s5039_s25  ;;  %vm7719_vm0 = vmmov %vm7712_vm4 }
 0x20b   : > { %v4853_v39 = vpop.eup %4852  ;;  %v2183_v24 = vmul.f32 1.442695, %v2122_v46  ;;  %v2314_v23 = vsub.f32 0.0, %v2090_v9  ;;  %v1861_v26 = vadd.f32 %v1825_v32, %v1656_v43  ;;  %v2282_v31 = vsub.f32 0.0, %v2122_v46  ;;  %vm7720_vm4 = vmmov %vm7714_vm2 }
 0x20c   : > { %v2504_v52 = vpop.permute.xlu0 %2503  ;;  %v6823_v38 = vadd.f32 %v4853_v39, %v2089_v16  ;;  %v2919_v32 = vadd.f32 %v2918_v10, %v2805_v54  ;;  %vm7723_vm3 = vmmov %vm7719_vm0 }
 0x20d   : > { %v4855_v62 = vpop.eup %4854  ;;  %4856 = vpow2.f32 %v2183_v24  ;;  %v2375_v27 = vmul.f32 1.442695, %v2314_v23  ;;  %v2023_v45 = vadd.f32 %v1987_v44, %v1861_v26  ;;  %v2586_v18 = vsel %vm7716_vm5, %v4466_v61, %v2504_v52  ;;  %vm7724_vm5 = vmmov %vm7719_vm0 }
 0x20e   : > { %v2409_v4 = vadd.f32 %v4855_v62, %v2281_v47  ;;  %v2660_v14 = vrot.slane %v2586_v18, 7  ;;  %2849 = vmatmul.f32.gmra.mxu0 %v2586_v18  ;;  %3288 = vmatmul.f32.gmra.mxu3 %v2586_v18  ;;  %v4467_v44 = vadd.f32 -1.0, %v6621_v12  ;;  %v2664_v12 = vrot.slane %v6834_v51, 7 }
 0x20f   : > { %4858 = vpow2.f32 %v2375_v27  ;;  %v2059_v48 = vadd.f32 %v6590_v63, %v2023_v45  ;;  %v1990_v37 = vpop.f32.mrf.mxu3  ;;  %v2921_v25 = vpop.f32.mrf.mxu1 }
 0x210   : > { %v4513_v33 = vadd.f32 -1.0, %v2409_v4  ;;  %v2661_v6 = vsel %vm7717_vm8, %v2658_v28, %v2660_v14  ;;  %vm7726_vm8 = vmmov %vm7714_vm2 }
 0x211   : > { %v2091_v5 = vmax.f32 %v2059_v48, 0.0  ;;  %v2123_v16 = vmin.f32 %v2059_v48, 0.0  ;;  %2962 = vmatmul.f32.gmra.mxu1 %v2661_v6  ;;  %3126 = vmatmul.f32.gmra.mxu2 %v2661_v6  ;;  %v6843_v62 = vpop.f32.mrf.mxu0  ;;  %v6852_v48 = vld [vmem:[%s7620_s4] ss:$0 sm:$0xff] }
 0x212   : > { %v1828_v40 = vpop.f32.mrf.mxu2  ;;  %2533 = vrot.lane.b32.xlu0 %v4513_v33, %s5039_s25 }
 0x213   : > { %v4857_v8 = vpop.eup %4856  ;;  %v2185_v49 = vmul.f32 1.442695, %v2123_v16  ;;  %v2315_v59 = vsub.f32 0.0, %v2091_v5  ;;  %v1862_v58 = vadd.f32 %v1828_v40, %v1659_v53  ;;  %v2283_v54 = vsub.f32 0.0, %v2123_v16 }
 0x214   : > { %v2506_v11 = vpop.permute.xlu1 %2505  ;;  %v6836_v28 = vadd.f32 %v4857_v8, %v2090_v9 }
 0x215   : > { %v4859_v43 = vpop.eup %4858  ;;  %4860 = vpow2.f32 %v2185_v49  ;;  %v2377_v42 = vmul.f32 1.442695, %v2315_v59  ;;  %v2024_v29 = vadd.f32 %v1990_v37, %v1862_v58  ;;  %v2587_v39 = vsel %vm7719_vm0, %v4467_v44, %v2506_v11 }
 0x216   : > { %v2410_v24 = vadd.f32 %v4859_v43, %v2282_v31  ;;  %v2662_v26 = vrot.slane %v2587_v39, 7  ;;  %2852 = vmatmul.f32.gmra.mxu0 %v2587_v39  ;;  %3291 = vmatmul.f32.gmra.mxu3 %v2587_v39  ;;  %v4469_v49 = vadd.f32 -1.0, %v6641_v41  ;;  %v4471_v41 = vadd.f32 -1.0, %v6679_v1 }
 0x217   : > { %4862 = vpow2.f32 %v2377_v42  ;;  %v2060_v23 = vadd.f32 %v6590_v63, %v2024_v29  ;;  %v2924_v43 = vpop.f32.mrf.mxu1 }
 0x218   : > { %v4514_v46 = vadd.f32 -1.0, %v2410_v24  ;;  %v2663_v61 = vsel %vm7720_vm4, %v2660_v14, %v2662_v26  ;;  %v2665_v47 = vsel %vm7721_vm7, %v2662_v26, %v2664_v12  ;;  %v3250_v14 = vpop.f32.mrf.mxu3 }
 0x219   : > { %v2092_v52 = vmax.f32 %v2060_v23, 0.0  ;;  %v2124_v9 = vmin.f32 %v2060_v23, 0.0  ;;  %4540 = vmatmul.msk.f32.gmra.mxu1 %vm6018_vm10, %v2663_v61  ;;  %4571 = vmatmul.msk.f32.gmra.mxu2 %vm5974_vm9, %v2663_v61  ;;  %v2811_v10 = vpop.f32.mrf.mxu0  ;;  %vm7722_vm9 = vmmov %vm7719_vm0 }
 0x21a   : > { %v3088_v63 = vpop.f32.mrf.mxu2  ;;  %2535 = vrot.lane.b32.xlu1 %v4514_v46, %s5039_s25  ;;  %v4470_v46 = vadd.f32 -1.0, %v6659_v20 }
 0x21b   : > { %v4861_v27 = vpop.eup %4860  ;;  %v2187_v45 = vmul.f32 1.442695, %v2124_v9  ;;  %v2316_v18 = vsub.f32 0.0, %v2092_v52  ;;  %v3184_v4 = vadd.f32 %v3088_v63, %v2919_v32  ;;  %v2284_v59 = vsub.f32 0.0, %v2124_v9 }
 0x21c   : > { %v6855_v33 = vadd.f32 %v4861_v27, %v2091_v5  ;;  %v2514_v32 = vpop.permute.xlu2 %2513  ;;  %v2922_v27 = vadd.f32 %v2921_v25, %v6843_v62 }
 0x21d   : > { %v4863_v53 = vpop.eup %4862  ;;  %4864 = vpow2.f32 %v2187_v45  ;;  %v2379_v15 = vmul.f32 1.442695, %v2316_v18  ;;  %v3346_v6 = vadd.f32 %v3250_v14, %v3184_v4 }
 0x21e   : > { %v2411_v37 = vadd.f32 %v4863_v53, %v2283_v54  ;;  %2855 = vmatmul.f32.gmra.mxu0 %v6834_v51  ;;  %3294 = vmatmul.f32.gmra.mxu3 %v6834_v51 }
 0x21f   : > { %4866 = vpow2.f32 %v2379_v15  ;;  %v6858_v40 = vadd.f32 %v6852_v48, %v3346_v6 }
 0x220   : > { %v4515_v2 = vadd.f32 -1.0, %v2411_v37 }
 0x221   : > { %v3414_v8 = vsub.f32 0.0, %v6858_v40  ;;  %2968 = vmatmul.f32.gmra.mxu1 %v2665_v47  ;;  %3132 = vmatmul.f32.gmra.mxu2 %v2665_v47 }
 0x222   : > { %2537 = vrot.lane.b32.xlu2 %v4515_v2, %s5039_s25 }
 0x223   : > { %v4865_v5 = vpop.eup %4864  ;;  %v3446_v16 = vmul.f32 1.442695, %v3414_v8 }
 0x224   : > { %v6865_v58 = vadd.f32 %v4865_v5, %v2092_v52  ;;  %v2510_v44 = vpop.permute.xlu0 %2509  ;;  %v2591_v52 = vsel %vm7723_vm3, %v4471_v41, %v2514_v32 }
 0x225   : > { %v4867_v11 = vpop.eup %4866  ;;  %4868 = vpow2.f32 %v3446_v16  ;;  %v2589_v31 = vsel %vm7722_vm9, %v4469_v49, %v2510_v44  ;;  %v2670_v47 = vrot.slane %v2591_v52, 7  ;;  %v2925_v16 = vadd.f32 %v2924_v43, %v2811_v10  ;;  %vm7727_vm9 = vmmov %vm7723_vm3 }
 0x226   : > { %v2412_v51 = vadd.f32 %v4867_v11, %v2284_v59  ;;  %v2666_v42 = vrot.slane %v2589_v31, 7  ;;  %2858 = vmatmul.f32.gmra.mxu0 %v2589_v31  ;;  %3297 = vmatmul.f32.gmra.mxu3 %v2589_v31  ;;  %v4472_v11 = vadd.f32 -1.0, %v6692_v17 }
 0x228   : > { %v4516_v29 = vadd.f32 -1.0, %v2412_v51  ;;  %v2667_v39 = vsel %vm7714_vm2, %v2664_v12, %v2666_v42 }
 0x229   : > { %4541 = vmatmul.msk.f32.gmra.mxu1 %vm6075_vm11, %v2667_v39  ;;  %4572 = vmatmul.msk.f32.gmra.mxu2 %vm6018_vm10, %v2667_v39  ;;  %vm7725_vm10 = vmmov %vm7714_vm2 }
 0x22a   : > { %2539 = vrot.lane.b32.xlu0 %v4516_v29, %s5039_s25 }
 0x22b   : > { %v4869_v24 = vpop.eup %4868  ;;  %v6875_v26 = vpop.f32.mrf.mxu0 }
 0x22c   : > { %v3510_v23 = vadd.f32 1.0, %v4869_v24  ;;  %v2512_v9 = vpop.permute.xlu1 %2511 }
 0x22d   : > { %v2590_v12 = vsel %vm7724_vm5, %v4470_v46, %v2512_v9  ;;  %vm7731_vm5 = vmmov %vm7726_vm8 }
 0x22e   : > { %4870 = vrcp.f32 %v3510_v23  ;;  %v2668_v61 = vrot.slane %v2590_v12, 7  ;;  %2861 = vmatmul.f32.gmra.mxu0 %v2590_v12  ;;  %v2927_v34 = vpop.f32.mrf.mxu1  ;;  %3300 = vmatmul.f32.gmra.mxu3 %v2590_v12  ;;  %v3553_v37 = vand.u32 2147483648, %v3510_v23  ;;  %v3551_v8 = vand.u32 2147483647, %v3510_v23 }
 0x22f   : > { %vm3547_vm0 = vweird.f32 %v3510_v23  ;;  %v2928_v9 = vadd.f32 %v2927_v34, %v6875_v26 }
 0x230   : > { %v2669_v1 = vsel %vm7725_vm10, %v2666_v42, %v2668_v61  ;;  %v2671_v63 = vsel %vm7726_vm8, %v2668_v61, %v2670_v47  ;;  %v3554_v44 = vor.u32 1.1754944e-38, %v3553_v37  ;;  %vm3552_vm7 = vcmp.eq.f32.partialorder %v3551_v8, 8.507059e+37  ;;  %vm7732_vm10 = vmmov %vm7731_vm5 }
 0x231   : > { %2974 = vmatmul.f32.gmra.mxu1 %v2669_v1  ;;  %3138 = vmatmul.f32.gmra.mxu2 %v2669_v1  ;;  %v3253_v20 = vpop.f32.mrf.mxu3  ;;  %v4473_v1 = vadd.f32 -1.0, %v6713_v56 }
 0x233   : > { %v6883_v18 = vpop.f32.mrf.mxu0 }
 0x234   : > { %v4871_v45 = vpop.eup %4870  ;;  %v3091_v4 = vpop.f32.mrf.mxu2 }
 0x235   : > { %v3543_v14 = vmul.f32 %v4871_v45, %v3510_v23  ;;  %v3185_v54 = vadd.f32 %v3091_v4, %v2922_v27  ;;  %vm3548_vm6 = vweird.f32 %v4871_v45  ;;  %v2520_v17 = vpop.permute.xlu2 %2519 }
 0x236   : > { %2864 = vmatmul.f32.gmra.mxu0 %v2591_v52  ;;  %v6885_v53 = vpop.f32.mrf.mxu1  ;;  %3303 = vmatmul.f32.gmra.mxu3 %v2591_v52  ;;  %vm3549_vm4 = vmor %vm3547_vm0, %vm3548_vm6  ;;  %v4474_v52 = vadd.f32 -1.0, %v6729_v0 }
 0x237   : > { %v3544_v15 = vsub.f32 1.0, %v3543_v14  ;;  %v3347_v6 = vadd.f32 %v3253_v20, %v3185_v54  ;;  %v2931_v8 = vadd.f32 %v6885_v53, %v6883_v18 }
 0x239   : > { %v3545_v2 = vmul.f32 %v4871_v45, %v3544_v15  ;;  %v6888_v62 = vadd.f32 %v6852_v48, %v3347_v6  ;;  %4542 = vmatmul.msk.f32.gmra.mxu1 %vm6138_vm12, %v2671_v63  ;;  %4573 = vmatmul.msk.f32.gmra.mxu2 %vm6075_vm11, %v2671_v63  ;;  %v3256_v25 = vpop.f32.mrf.mxu3  ;;  %vm7728_vm11 = vmmov %vm7714_vm2 }
 0x23a   : > { %vm7729_vm2 = vmmov %vm7723_vm3 }
 0x23b   : > { %v3546_v5 = vadd.f32 %v4871_v45, %v3545_v2  ;;  %v3415_v49 = vsub.f32 0.0, %v6888_v62  ;;  %v6895_v59 = vpop.f32.mrf.mxu0  ;;  %v6911_v63 = vsel %vm7729_vm2, %v4474_v52, %v2520_v17  ;;  %vm7730_vm3 = vmmov %vm7729_vm2 }
 0x23c   : > { %v3094_v31 = vpop.f32.mrf.mxu2  ;;  %v2516_v51 = vpop.permute.xlu0 %2515  ;;  %v2676_v34 = vrot.slane %v6911_v63, 7  ;;  %vm7733_vm6 = vmmov %vm7729_vm2 }
 0x23d   : > { %v3550_v42 = vsel %vm3549_vm4, %v4871_v45, %v3546_v5  ;;  %v3448_v29 = vmul.f32 1.442695, %v3415_v49  ;;  %v3186_v32 = vadd.f32 %v3094_v31, %v2925_v16  ;;  %v2592_v55 = vsel %vm7727_vm9, %v4472_v11, %v2516_v51  ;;  %vm7735_vm9 = vmmov %vm7729_vm2 }
 0x23e   : > { %v3555_v39 = vsel %vm3552_vm7, %v3554_v44, %v3550_v42  ;;  %v2672_v41 = vrot.slane %v2592_v55, 7  ;;  %2867 = vmatmul.f32.gmra.mxu0 %v2592_v55  ;;  %v2933_v10 = vpop.f32.mrf.mxu1  ;;  %3306 = vmatmul.f32.gmra.mxu3 %v2592_v55  ;;  %vm7734_vm7 = vmmov %vm7731_vm5 }
 0x23f   : > { %4872 = vpow2.f32 %v3448_v29  ;;  %v3348_v43 = vadd.f32 %v3256_v25, %v3186_v32  ;;  %4054 = vrot.lane.b32.xlu1 %v3555_v39, %s5039_s25  ;;  %v2934_v55 = vadd.f32 %v2933_v10, %v6895_v59  ;;  %v4475_v39 = vadd.f32 -1.0, %v6744_v30 }
 0x240   : > { %v2673_v24 = vsel %vm7728_vm11, %v2670_v47, %v2672_v41 }
 0x241   : > { %v6902_v23 = vadd.f32 %v6852_v48, %v3348_v43  ;;  %2980 = vmatmul.f32.gmra.mxu1 %v2673_v24  ;;  %3144 = vmatmul.f32.gmra.mxu2 %v2673_v24  ;;  %v3259_v46 = vpop.f32.mrf.mxu3 }
 0x243   : > { %v3416_v12 = vsub.f32 0.0, %v6902_v23  ;;  %v6907_v61 = vpop.f32.mrf.mxu0 }
 0x244   : > { %v2518_v47 = vpop.permute.xlu1 %2517  ;;  %v3097_v27 = vpop.f32.mrf.mxu2 }
 0x245   : > { %v4873_v20 = vpop.eup %4872  ;;  %v3450_v45 = vmul.f32 1.442695, %v3416_v12  ;;  %v3187_v4 = vadd.f32 %v3097_v27, %v2928_v9  ;;  %v2593_v14 = vsel %vm7730_vm3, %v4473_v1, %v2518_v47 }
 0x246   : > { %v6914_v54 = vadd.f32 1.0, %v4873_v20  ;;  %v2674_v0 = vrot.slane %v2593_v14, 7  ;;  %2870 = vmatmul.f32.gmra.mxu0 %v2593_v14  ;;  %v6916_v26 = vpop.f32.mrf.mxu1  ;;  %3309 = vmatmul.f32.gmra.mxu3 %v2593_v14 }
 0x247   : > { %4874 = vpow2.f32 %v3450_v45  ;;  %v3349_v56 = vadd.f32 %v3259_v46, %v3187_v4 }
 0x248   : > { %4876 = vrcp.f32 %v6914_v54  ;;  %v2675_v15 = vsel %vm7731_vm5, %v2672_v41, %v2674_v0  ;;  %v2677_v6 = vsel %vm7732_vm10, %v2674_v0, %v2676_v34  ;;  %v3568_v41 = vand.u32 2147483648, %v6914_v54  ;;  %vm7737_vm10 = vmmov %vm7734_vm7 }
 0x249   : > { %v6925_v37 = vadd.f32 %v6852_v48, %v3349_v56  ;;  %4543 = vmatmul.msk.f32.gmra.mxu1 %vm6214_vm13, %v2675_v15  ;;  %4574 = vmatmul.msk.f32.gmra.mxu2 %vm6138_vm12, %v2675_v15  ;;  %v3262_v2 = vpop.f32.mrf.mxu3  ;;  %v3566_v46 = vand.u32 2147483647, %v6914_v54  ;;  %vm3562_vm8 = vweird.f32 %v6914_v54 }
 0x24a   : > { %v3569_v14 = vor.u32 1.1754944e-38, %v3568_v41 }
 0x24b   : > { %v3417_v25 = vsub.f32 0.0, %v6925_v37  ;;  %v6934_v5 = vpop.f32.mrf.mxu0  ;;  %vm3567_vm4 = vcmp.eq.f32.partialorder %v3566_v46, 8.507059e+37 }
 0x24c   : > { %v3100_v16 = vpop.f32.mrf.mxu2  ;;  %v2526_v20 = vpop.permute.xlu2 %2525 }
 0x24d   : > { %v4875_v49 = vpop.eup %4874  ;;  %v3452_v11 = vmul.f32 1.442695, %v3417_v25  ;;  %v3188_v44 = vadd.f32 %v3100_v16, %v2931_v8  ;;  %v2937_v16 = vadd.f32 %v6916_v26, %v6907_v61 }
 0x24e   : > { %v4877_v31 = vpop.eup %4876  ;;  %v6936_v51 = vadd.f32 1.0, %v4875_v49  ;;  %2873 = vmatmul.f32.gmra.mxu0 %v6911_v63  ;;  %v6939_v42 = vpop.f32.mrf.mxu1  ;;  %3312 = vmatmul.f32.gmra.mxu3 %v6911_v63 }
 0x24f   : > { %4878 = vpow2.f32 %v3452_v11  ;;  %v3350_v19 = vadd.f32 %v3262_v2, %v3188_v44  ;;  %v3558_v18 = vmul.f32 %v4877_v31, %v6914_v54  ;;  %vm3563_vm12 = vweird.f32 %v4877_v31 }
 0x250   : > { %4880 = vrcp.f32 %v6936_v51  ;;  %vm3564_vm0 = vmor %vm3562_vm8, %vm3563_vm12  ;;  %v4477_v54 = vadd.f32 -1.0, %v6777_v22  ;;  %v4476_v44 = vadd.f32 -1.0, %v6761_v50 }
 0x251   : > { %v6945_v53 = vadd.f32 %v6852_v48, %v3350_v19  ;;  %2986 = vmatmul.f32.gmra.mxu1 %v2677_v6  ;;  %3150 = vmatmul.f32.gmra.mxu2 %v2677_v6  ;;  %v3265_v29 = vpop.f32.mrf.mxu3  ;;  %v3559_v32 = vsub.f32 1.0, %v3558_v18  ;;  %vm7738_vm12 = vmmov %vm7734_vm7 }
 0x252   : > { %v6974_v25 = vsel %vm7735_vm9, %v4477_v54, %v2526_v20 }
 0x253   : > { %v3418_v43 = vsub.f32 0.0, %v6945_v53  ;;  %v6951_v17 = vpop.f32.mrf.mxu0  ;;  %v3560_v24 = vmul.f32 %v4877_v31, %v3559_v32  ;;  %v2682_v13 = vrot.slane %v6974_v25, 7 }
 0x254   : > { %v2522_v52 = vpop.permute.xlu0 %2521  ;;  %v3103_v9 = vpop.f32.mrf.mxu2 }
 0x255   : > { %v4879_v12 = vpop.eup %4878  ;;  %v3454_v1 = vmul.f32 1.442695, %v3418_v43  ;;  %v3189_v47 = vadd.f32 %v3103_v9, %v2934_v55  ;;  %v2595_v59 = vsel %vm7733_vm6, %v4475_v39, %v2522_v52  ;;  %v3561_v30 = vadd.f32 %v4877_v31, %v3560_v24 }
 0x256   : > { %v4881_v10 = vpop.eup %4880  ;;  %v6956_v27 = vadd.f32 1.0, %v4879_v12  ;;  %v2678_v45 = vrot.slane %v2595_v59, 7  ;;  %2876 = vmatmul.f32.gmra.mxu0 %v2595_v59  ;;  %v6958_v4 = vpop.f32.mrf.mxu1  ;;  %3315 = vmatmul.f32.gmra.mxu3 %v2595_v59 }
 0x257   : > { %4882 = vpow2.f32 %v3454_v1  ;;  %v3351_v0 = vadd.f32 %v3265_v29, %v3189_v47  ;;  %v3565_v56 = vsel %vm3564_vm0, %v4877_v31, %v3561_v30  ;;  %v3573_v2 = vmul.f32 %v4881_v10, %v6936_v51 }
 0x258   : > { %4884 = vrcp.f32 %v6956_v27  ;;  %v3570_v15 = vsel %vm3567_vm4, %v3569_v14, %v3565_v56  ;;  %v2679_v6 = vsel %vm7734_vm7, %v2676_v34, %v2678_v45  ;;  %v3581_v34 = vand.u32 2147483647, %v6936_v51 }
 0x259   : > { %v6968_v8 = vadd.f32 %v6852_v48, %v3351_v0  ;;  %4056 = vrot.lane.b32.xlu2 %v3570_v15, %s5039_s25  ;;  %4544 = vmatmul.msk.f32.gmra.mxu1 %vm6293_vm14, %v2679_v6  ;;  %v3268_v22 = vpop.f32.mrf.mxu3  ;;  %v3574_v63 = vsub.f32 1.0, %v3573_v2  ;;  %v3583_v31 = vand.u32 2147483648, %v6936_v51  ;;  %vm3578_vm11 = vweird.f32 %v4881_v10 }
 0x25a   : > { %4575 = vmatmul.msk.f32.gmra.mxu2 %vm6214_vm13, %v2679_v6  ;;  %vm7736_vm13 = vmmov %vm7729_vm2  ;;  %vm3577_vm2 = vweird.f32 %v6936_v51  ;;  %vm3582_vm3 = vcmp.eq.f32.partialorder %v3581_v34, 8.507059e+37  ;;  %v2940_v14 = vadd.f32 %v6939_v42, %v6934_v5  ;;  %v3596_v56 = vand.u32 2147483647, %v6956_v27 }
 0x25b   : > { %v3419_v49 = vsub.f32 0.0, %v6968_v8  ;;  %v6982_v11 = vpop.f32.mrf.mxu0  ;;  %v3575_v29 = vmul.f32 %v4881_v10, %v3574_v63  ;;  %vm3579_vm5 = vmor %vm3577_vm2, %vm3578_vm11  ;;  %v3584_v52 = vor.u32 1.1754944e-38, %v3583_v31  ;;  %vm3592_vm6 = vweird.f32 %v6956_v27 }
 0x25c   : > { %v2524_v19 = vpop.permute.xlu1 %2523  ;;  %v3106_v18 = vpop.f32.mrf.mxu2  ;;  %vm3597_vm4 = vcmp.eq.f32.partialorder %v3596_v56, 8.507059e+37 }
 0x25d   : > { %v4883_v32 = vpop.eup %4882  ;;  %v3456_v55 = vmul.f32 1.442695, %v3419_v49  ;;  %v3190_v39 = vadd.f32 %v3106_v18, %v2937_v16  ;;  %v2596_v41 = vsel %vm7736_vm13, %v4476_v44, %v2524_v19  ;;  %v3576_v24 = vadd.f32 %v4881_v10, %v3575_v29  ;;  %vm7740_vm13 = vmmov %vm7737_vm10 }
 0x25e   : > { %v4885_v61 = vpop.eup %4884  ;;  %v6989_v26 = vadd.f32 1.0, %v4883_v32  ;;  %v2680_v43 = vrot.slane %v2596_v41, 7  ;;  %2879 = vmatmul.f32.gmra.mxu0 %v2596_v41  ;;  %v6991_v50 = vpop.f32.mrf.mxu1  ;;  %3318 = vmatmul.f32.gmra.mxu3 %v2596_v41  ;;  %v2943_v32 = vadd.f32 %v6958_v4, %v6951_v17  ;;  %v4478_v41 = vadd.f32 -1.0, %v6785_v35 }
 0x25f   : > { %4886 = vpow2.f32 %v3456_v55  ;;  %v3352_v46 = vadd.f32 %v3268_v22, %v3190_v39  ;;  %v3588_v9 = vmul.f32 %v4885_v61, %v6956_v27  ;;  %v3580_v51 = vsel %vm3579_vm5, %v4881_v10, %v3576_v24 }
 0x260   : > { %4888 = vrcp.f32 %v6989_v26  ;;  %v2681_v12 = vsel %vm7737_vm10, %v2678_v45, %v2680_v43  ;;  %v2683_v1 = vsel %vm7738_vm12, %v2680_v43, %v2682_v13  ;;  %v3585_v59 = vsel %vm3582_vm3, %v3584_v52, %v3580_v51 }
 0x261   : > { %v7001_v47 = vadd.f32 %v6852_v48, %v3352_v46  ;;  %2992 = vmatmul.f32.gmra.mxu1 %v2681_v12  ;;  %v3271_v30 = vpop.f32.mrf.mxu3  ;;  %v3589_v20 = vsub.f32 1.0, %v3588_v9  ;;  %4058 = vrot.lane.b32.xlu0 %v3585_v59, %s5039_s25  ;;  %v3598_v10 = vand.u32 2147483648, %v6956_v27  ;;  %vm3593_vm8 = vweird.f32 %v4885_v61 }
 0x262   : > { %3156 = vmatmul.f32.gmra.mxu2 %v2681_v12  ;;  %vm3594_vm0 = vmor %vm3592_vm6, %vm3593_vm8  ;;  %v3611_v52 = vand.u32 2147483647, %v6989_v26  ;;  %v4480_v17 = vadd.f32 -1.0, %v6812_v36 }
 0x263   : > { %v3420_v45 = vsub.f32 0.0, %v7001_v47  ;;  %v7008_v54 = vpop.f32.mrf.mxu0  ;;  %v3590_v0 = vmul.f32 %v4885_v61, %v3589_v20  ;;  %v3599_v16 = vor.u32 1.1754944e-38, %v3598_v10 }
 0x264   : > { %v3109_v15 = vpop.f32.mrf.mxu2  ;;  %v2532_v20 = vpop.permute.xlu2 %2531  ;;  %vm3612_vm2 = vcmp.eq.f32.partialorder %v3611_v52, 8.507059e+37 }
 0x265   : > { %v4887_v6 = vpop.eup %4886  ;;  %v3458_v2 = vmul.f32 1.442695, %v3420_v45  ;;  %v3191_v22 = vadd.f32 %v3109_v15, %v2940_v14  ;;  %v3591_v63 = vadd.f32 %v4885_v61, %v3590_v0 }
 0x266   : > { %v4889_v5 = vpop.eup %4888  ;;  %v7012_v42 = vadd.f32 1.0, %v4887_v6  ;;  %2882 = vmatmul.f32.gmra.mxu0 %v6974_v25  ;;  %v7015_v34 = vpop.f32.mrf.mxu1  ;;  %3321 = vmatmul.f32.gmra.mxu3 %v6974_v25 }
 0x267   : > { %4890 = vpow2.f32 %v3458_v2  ;;  %v3353_v49 = vadd.f32 %v3271_v30, %v3191_v22  ;;  %v3595_v44 = vsel %vm3594_vm0, %v4885_v61, %v3591_v63  ;;  %v3603_v27 = vmul.f32 %v4889_v5, %v6989_v26  ;;  %vm7743_vm0 = vmmov %vm7740_vm13 }
 0x268   : > { %4892 = vrcp.f32 %v7012_v42  ;;  %v3600_v31 = vsel %vm3597_vm4, %v3599_v16, %v3595_v44  ;;  %v3613_v61 = vand.u32 2147483648, %v6989_v26  ;;  %vm3608_vm7 = vweird.f32 %v4889_v5  ;;  %vm7744_vm4 = vmmov %vm7743_vm0 }
 0x269   : > { %v7021_v19 = vadd.f32 %v6852_v48, %v3353_v49  ;;  %v3274_v18 = vpop.f32.mrf.mxu3  ;;  %4060 = vrot.lane.b32.xlu1 %v3600_v31, %s5039_s25  ;;  %4545 = vmatmul.msk.f32.gmra.mxu1 %vm6370_vm15, %v2683_v1  ;;  %v3604_v29 = vsub.f32 1.0, %v3603_v27  ;;  %v2946_v2 = vadd.f32 %v6991_v50, %v6982_v11  ;;  %v4479_v22 = vadd.f32 -1.0, %v6802_v21 }
 0x26a   : > { %4576 = vmatmul.msk.f32.gmra.mxu2 %vm6293_vm14, %v2683_v1  ;;  %vm7739_vm14 = vmmov %vm7735_vm9  ;;  %vm3607_vm9 = vweird.f32 %v6989_v26  ;;  %v3614_v10 = vor.u32 1.1754944e-38, %v3613_v61  ;;  %v3628_v25 = vand.u32 2147483648, %v7012_v42  ;;  %v3626_v49 = vand.u32 2147483647, %v7012_v42 }
 0x26b   : > { %v3421_v55 = vsub.f32 0.0, %v7021_v19  ;;  %v7031_v39 = vpop.f32.mrf.mxu0  ;;  %v3605_v46 = vmul.f32 %v4889_v5, %v3604_v29  ;;  %vm3609_vm11 = vmor %vm3607_vm9, %vm3608_vm7  ;;  %vm3622_vm10 = vweird.f32 %v7012_v42 }
 0x26c   : > { %v2528_v43 = vpop.permute.xlu0 %2527  ;;  %v3112_v24 = vpop.f32.mrf.mxu2  ;;  %vm7741_vm3 = vmmov %vm7739_vm14  ;;  %v3629_v61 = vor.u32 1.1754944e-38, %v3628_v25  ;;  %vm3627_vm6 = vcmp.eq.f32.partialorder %v3626_v49, 8.507059e+37 }
 0x26d   : > { %v4891_v3 = vpop.eup %4890  ;;  %v3460_v9 = vmul.f32 1.442695, %v3421_v55  ;;  %v3192_v51 = vadd.f32 %v3112_v24, %v2943_v32  ;;  %v2598_v12 = vsel %vm7739_vm14, %v4478_v41, %v2528_v43  ;;  %v3606_v30 = vadd.f32 %v4889_v5, %v3605_v46  ;;  %vm7742_vm12 = vmmov %vm7741_vm3 }
 0x26e   : > { %v4893_v4 = vpop.eup %4892  ;;  %v7038_v1 = vadd.f32 1.0, %v4891_v3  ;;  %v2684_v59 = vrot.slane %v2598_v12, 7  ;;  %2885 = vmatmul.f32.gmra.mxu0 %v2598_v12  ;;  %v7040_v35 = vpop.f32.mrf.mxu1  ;;  %3324 = vmatmul.f32.gmra.mxu3 %v2598_v12 }
 0x26f   : > { %4894 = vpow2.f32 %v3460_v9  ;;  %v3354_v14 = vadd.f32 %v3274_v18, %v3192_v51  ;;  %v3618_v45 = vmul.f32 %v4893_v4, %v7012_v42  ;;  %v3610_v0 = vsel %vm3609_vm11, %v4889_v5, %v3606_v30 }
 0x270   : > { %4896 = vrcp.f32 %v7038_v1  ;;  %v2685_v36 = vsel %vm7740_vm13, %v2682_v13, %v2684_v59  ;;  %v3615_v15 = vsel %vm3612_vm2, %v3614_v10, %v3610_v0  ;;  %v7058_v13 = vsel %vm7741_vm3, %v4480_v17, %v2532_v20  ;;  %vm7745_vm13 = vmmov %vm7741_vm3 }
 0x271   : > { %v7050_v56 = vadd.f32 %v6852_v48, %v3354_v14  ;;  %v3277_v26 = vpop.f32.mrf.mxu3  ;;  %2998 = vmatmul.f32.gmra.mxu1 %v2685_v36  ;;  %v3619_v6 = vsub.f32 1.0, %v3618_v45  ;;  %4062 = vrot.lane.b32.xlu2 %v3615_v15, %s5039_s25  ;;  %vm3623_vm5 = vweird.f32 %v4893_v4  ;;  %v2688_v43 = vrot.slane %v7058_v13, 7 }
 0x272   : > { %3162 = vmatmul.f32.gmra.mxu2 %v2685_v36  ;;  %vm3624_vm8 = vmor %vm3622_vm10, %vm3623_vm5  ;;  %v2949_v17 = vadd.f32 %v7015_v34, %v7008_v54  ;;  %v3641_v14 = vand.u32 2147483647, %v7038_v1  ;;  %v3643_v10 = vand.u32 2147483648, %v7038_v1 }
 0x273   : > { %v3422_v63 = vsub.f32 0.0, %v7050_v56  ;;  %v7061_v5 = vpop.f32.mrf.mxu0  ;;  %v3620_v16 = vmul.f32 %v4893_v4, %v3619_v6  ;;  %vm7746_vm5 = vmmov %vm7743_vm0 }
 0x274   : > { %v2530_v44 = vpop.permute.xlu1 %2529  ;;  %v3115_v11 = vpop.f32.mrf.mxu2  ;;  %vm3642_vm9 = vcmp.eq.f32.partialorder %v3641_v14, 8.507059e+37 }
 0x275   : > { %v4895_v50 = vpop.eup %4894  ;;  %v3462_v31 = vmul.f32 1.442695, %v3422_v63  ;;  %v3193_v21 = vadd.f32 %v3115_v11, %v2946_v2  ;;  %v2599_v27 = vsel %vm7742_vm12, %v4479_v22, %v2530_v44  ;;  %v3621_v18 = vadd.f32 %v4893_v4, %v3620_v16 }
 0x276   : > { %v4897_v29 = vpop.eup %4896  ;;  %v7066_v32 = vadd.f32 1.0, %v4895_v50  ;;  %v2686_v55 = vrot.slane %v2599_v27, 7  ;;  %2888 = vmatmul.f32.gmra.mxu0 %v2599_v27  ;;  %v7068_v41 = vpop.f32.mrf.mxu1  ;;  %3327 = vmatmul.f32.gmra.mxu3 %v2599_v27  ;;  %v3644_v2 = vor.u32 1.1754944e-38, %v3643_v10  ;;  %v2952_v11 = vadd.f32 %v7040_v35, %v7031_v39 }
 0x277   : > { %4898 = vpow2.f32 %v3462_v31  ;;  %v3355_v42 = vadd.f32 %v3277_v26, %v3193_v21  ;;  %v3625_v24 = vsel %vm3624_vm8, %v4893_v4, %v3621_v18  ;;  %v3633_v12 = vmul.f32 %v4897_v29, %v7038_v1  ;;  %vm7748_vm8 = vmmov %vm7745_vm13 }
 0x278   : > { %4900 = vrcp.f32 %v7066_v32  ;;  %v2687_v46 = vsel %vm7743_vm0, %v2684_v59, %v2686_v55  ;;  %v3630_v52 = vsel %vm3627_vm6, %v3629_v61, %v3625_v24  ;;  %v2689_v3 = vsel %vm7744_vm4, %v2686_v55, %v2688_v43  ;;  %vm7749_vm0 = vmmov %vm7748_vm8 }
 0x279   : > { %v7078_v9 = vadd.f32 %v6852_v48, %v3355_v42  ;;  %4546 = vmatmul.msk.f32.gmra.mxu1 %vm6462_vm1, %v2687_v46  ;;  %v3280_v51 = vpop.f32.mrf.mxu3  ;;  %4064 = vrot.lane.b32.xlu0 %v3630_v52, %s5039_s25  ;;  %v3634_v30 = vsub.f32 1.0, %v3633_v12  ;;  %vm3638_vm7 = vweird.f32 %v4897_v29  ;;  %v4481_v31 = vadd.f32 -1.0, %v6823_v38 }
 0x27a   : > { %4577 = vmatmul.msk.f32.gmra.mxu2 %vm6370_vm15, %v2687_v46  ;;  %vm3637_vm15 = vweird.f32 %v7038_v1  ;;  %v3658_v21 = vand.u32 2147483648, %v7066_v32  ;;  %v3656_v55 = vand.u32 2147483647, %v7066_v32  ;;  %v4483_v35 = vadd.f32 -1.0, %v6855_v33 }
 0x27b   : > { %v3423_v4 = vsub.f32 0.0, %v7078_v9  ;;  %v7089_v59 = vpop.f32.mrf.mxu0  ;;  %v3635_v26 = vmul.f32 %v4897_v29, %v3634_v30  ;;  %vm3639_vm14 = vmor %vm3637_vm15, %vm3638_vm7  ;;  %vm3652_vm2 = vweird.f32 %v7066_v32  ;;  %vm7747_vm12 = vnez %v7692_v57 }
 0x27c   : > { %v3118_v20 = vpop.f32.mrf.mxu2  ;;  %v2538_v12 = vpop.permute.xlu2 %2537  ;;  %vm3657_vm10 = vcmp.eq.f32.partialorder %v3656_v55, 8.507059e+37  ;;  %vm7750_vm15 = vmmov %vm7746_vm5 }
 0x27d   : > { %v4899_v45 = vpop.eup %4898  ;;  %v3464_v36 = vmul.f32 1.442695, %v3423_v4  ;;  %v3194_v0 = vadd.f32 %v3118_v20, %v2949_v17  ;;  %v3636_v6 = vadd.f32 %v4897_v29, %v3635_v26  ;;  %v3659_v4 = vor.u32 1.1754944e-38, %v3658_v21 }
 0x27e   : > { %v4901_v7 = vpop.eup %4900  ;;  %v7093_v15 = vadd.f32 1.0, %v4899_v45  ;;  %2891 = vmatmul.f32.gmra.mxu0 %v7058_v13  ;;  %v7096_v54 = vpop.f32.mrf.mxu1  ;;  %3330 = vmatmul.f32.gmra.mxu3 %v7058_v13  ;;  %v4482_v13 = vadd.f32 -1.0, %v6836_v28 }
 0x27f   : > { %4902 = vpow2.f32 %v3464_v36  ;;  %v3356_v34 = vadd.f32 %v3280_v51, %v3194_v0  ;;  %v3648_v22 = vmul.f32 %v4901_v7, %v7066_v32  ;;  %v3640_v16 = vsel %vm3639_vm14, %v4897_v29, %v3636_v6  ;;  %vm7751_vm14 = vmmov %vm7746_vm5 }
 0x280   : > { %4904 = vrcp.f32 %v7093_v15  ;;  %v3645_v49 = vsel %vm3642_vm9, %v3644_v2, %v3640_v16  ;;  %vm3653_vm11 = vweird.f32 %v4901_v7  ;;  %v2955_v36 = vadd.f32 %v7068_v41, %v7061_v5 }
 0x281   : > { %v7103_v25 = vadd.f32 %v6852_v48, %v3356_v34  ;;  %3004 = vmatmul.f32.gmra.mxu1 %v2689_v3  ;;  %v3283_v63 = vpop.f32.mrf.mxu3  ;;  %v3649_v44 = vsub.f32 1.0, %v3648_v22  ;;  %4066 = vrot.lane.b32.xlu1 %v3645_v49, %s5039_s25  ;;  %vm3654_vm3 = vmor %vm3652_vm2, %vm3653_vm11  ;;  %v7140_v0 = vsel %vm7748_vm8, %v4483_v35, %v2538_v12  ;;  %v3671_v5 = vand.u32 2147483647, %v7093_v15 }
 0x282   : > { %3168 = vmatmul.f32.gmra.mxu2 %v2689_v3  ;;  %vm7753_vm8 = vmmov %vm7751_vm14 }
 0x283   : > { %v3424_v1 = vsub.f32 0.0, %v7103_v25  ;;  %v7109_v50 = vpop.f32.mrf.mxu0  ;;  %v3650_v29 = vmul.f32 %v4901_v7, %v3649_v44  ;;  %vm3672_vm7 = vcmp.eq.f32.partialorder %v3671_v5, 8.507059e+37 }
 0x284   : > { %v2534_v27 = vpop.permute.xlu0 %2533  ;;  %v3121_v18 = vpop.f32.mrf.mxu2 }
 0x285   : > { %v4903_v61 = vpop.eup %4902  ;;  %v3466_v42 = vmul.f32 1.442695, %v3424_v1  ;;  %v3195_v24 = vadd.f32 %v3121_v18, %v2952_v11  ;;  %v2601_v39 = vsel %vm7745_vm13, %v4481_v31, %v2534_v27  ;;  %v3651_v51 = vadd.f32 %v4901_v7, %v3650_v29 }
 0x286   : > { %v4905_v46 = vpop.eup %4904  ;;  %v7116_v52 = vadd.f32 1.0, %v4903_v61  ;;  %v2690_v3 = vrot.slane %v2601_v39, 7  ;;  %2894 = vmatmul.f32.gmra.mxu0 %v2601_v39  ;;  %v7118_v38 = vpop.f32.mrf.mxu1  ;;  %3333 = vmatmul.f32.gmra.mxu3 %v2601_v39  ;;  %v3016_v31 = vrot.slane %v7140_v0, 7 }
 0x287   : > { %4906 = vpow2.f32 %v3466_v42  ;;  %v3357_v17 = vadd.f32 %v3283_v63, %v3195_v24  ;;  %v3663_v30 = vmul.f32 %v4905_v46, %v7093_v15  ;;  %v3655_v20 = vsel %vm3654_vm3, %v4901_v7, %v3651_v51 }
 0x288   : > { %4908 = vrcp.f32 %v7116_v52  ;;  %v2691_v33 = vsel %vm7746_vm5, %v2688_v43, %v2690_v3  ;;  %v3660_v10 = vsel %vm3657_vm10, %v3659_v4, %v3655_v20  ;;  %v3673_v43 = vand.u32 2147483648, %v7093_v15  ;;  %vm7752_vm5 = vmmov %vm7749_vm0 }
 0x289   : > { %v7128_v14 = vadd.f32 %v6852_v48, %v3357_v17  ;;  %4547 = vmatmul.msk.f32.gmra.mxu1 %vm7747_vm12, %v2691_v33  ;;  %v3286_v32 = vpop.f32.mrf.mxu3  ;;  %v3664_v45 = vsub.f32 1.0, %v3663_v30  ;;  %4068 = vrot.lane.b32.xlu2 %v3660_v10, %s5039_s25  ;;  %vm3668_vm6 = vweird.f32 %v4905_v46  ;;  %v2958_v24 = vadd.f32 %v7096_v54, %v7089_v59 }
 0x28a   : > { %4578 = vmatmul.msk.f32.gmra.mxu2 %vm6462_vm1, %v2691_v33  ;;  %vm3667_vm1 = vweird.f32 %v7093_v15  ;;  %v3674_v1 = vor.u32 1.1754944e-38, %v3673_v43  ;;  %v3686_v51 = vand.u32 2147483647, %v7116_v52  ;;  %v3688_v12 = vand.u32 2147483648, %v7116_v52 }
 0x28b   : > { %v3425_v26 = vsub.f32 0.0, %v7128_v14  ;;  %v7143_v7 = vpop.f32.mrf.mxu0  ;;  %v3665_v34 = vmul.f32 %v4905_v46, %v3664_v45  ;;  %vm3669_vm4 = vmor %vm3667_vm1, %vm3668_vm6  ;;  %vm3682_vm11 = vweird.f32 %v7116_v52 }
 0x28c   : > { %v2536_v41 = vpop.permute.xlu1 %2535  ;;  %v3124_v60 = vpop.f32.mrf.mxu2  ;;  %v3689_v45 = vor.u32 1.1754944e-38, %v3688_v12  ;;  %vm3687_vm2 = vcmp.eq.f32.partialorder %v3686_v51, 8.507059e+37 }
 0x28d   : > { %v4907_v6 = vpop.eup %4906  ;;  %v3468_v2 = vmul.f32 1.442695, %v3425_v26  ;;  %v3196_v28 = vadd.f32 %v3124_v60, %v2955_v36  ;;  %v2602_v22 = vsel %vm7749_vm0, %v4482_v13, %v2536_v41  ;;  %v3666_v63 = vadd.f32 %v4905_v46, %v3665_v34 }
 0x28e   : > { %v4909_v16 = vpop.eup %4908  ;;  %v7148_v49 = vadd.f32 1.0, %v4907_v6  ;;  %v2692_v44 = vrot.slane %v2602_v22, 7  ;;  %2897 = vmatmul.f32.gmra.mxu0 %v2602_v22  ;;  %v7150_v11 = vpop.f32.mrf.mxu1  ;;  %3336 = vmatmul.f32.gmra.mxu3 %v2602_v22 }
 0x28f   : > { %4910 = vpow2.f32 %v3468_v2  ;;  %v3358_v15 = vadd.f32 %v3286_v32, %v3196_v28  ;;  %v3670_v21 = vsel %vm3669_vm4, %v4905_v46, %v3666_v63  ;;  %v3678_v42 = vmul.f32 %v4909_v16, %v7116_v52 }
 0x290   : > { %4912 = vrcp.f32 %v7148_v49  ;;  %v2693_v27 = vsel %vm7750_vm15, %v2690_v3, %v2692_v44  ;;  %v3675_v18 = vsel %vm3672_vm7, %v3674_v1, %v3670_v21  ;;  %v3017_v29 = vsel %vm7751_vm14, %v2692_v44, %v3016_v31 }
 0x291   : > { %v7160_v55 = vadd.f32 %v6852_v48, %v3358_v15  ;;  %3010 = vmatmul.f32.gmra.mxu1 %v2693_v27  ;;  %v3289_v61 = vpop.f32.mrf.mxu3  ;;  %4070 = vrot.lane.b32.xlu0 %v3675_v18, %s5039_s25  ;;  %v3679_v46 = vsub.f32 1.0, %v3678_v42  ;;  %vm3683_vm9 = vweird.f32 %v4909_v16  ;;  %v2961_v52 = vadd.f32 %v7118_v38, %v7109_v50 }
 0x292   : > { %3174 = vmatmul.f32.gmra.mxu2 %v2693_v27  ;;  %vm3684_vm13 = vmor %vm3682_vm11, %vm3683_vm9  ;;  %v3703_v6 = vand.u32 2147483648, %v7148_v49  ;;  %v3701_v57 = vand.u32 2147483647, %v7148_v49  ;;  %vm3697_vm10 = vweird.f32 %v7148_v49  ;;  %v2964_v51 = vadd.f32 %v7150_v11, %v7143_v7 }
 0x293   : > { %v3426_v39 = vsub.f32 0.0, %v7160_v55  ;;  %v7167_v35 = vpop.f32.mrf.mxu0  ;;  %v3680_v33 = vmul.f32 %v4909_v16, %v3679_v46 }
 0x294   : > { %v3127_v3 = vpop.f32.mrf.mxu2  ;;  %v3704_v18 = vor.u32 1.1754944e-38, %v3703_v6  ;;  %vm3702_vm6 = vcmp.eq.f32.partialorder %v3701_v57, 8.507059e+37 }
 0x295   : > { %v4911_v17 = vpop.eup %4910  ;;  %v3470_v4 = vmul.f32 1.442695, %v3426_v39  ;;  %v3197_v30 = vadd.f32 %v3127_v3, %v2958_v24  ;;  %v3681_v54 = vadd.f32 %v4909_v16, %v3680_v33  ;;  %v7208_v24 = vld [vmem:[%s7620_s4] ss:$0 sm:$0xff] }
 0x296   : > { %v4913_v20 = vpop.eup %4912  ;;  %v7171_v32 = vadd.f32 1.0, %v4911_v17  ;;  %v7173_v10 = vpop.f32.mrf.mxu1  ;;  %3339 = vmatmul.f32.gmra.mxu3 %v7140_v0 }
 0x297   : > { %4914 = vpow2.f32 %v3470_v4  ;;  %v3359_v59 = vadd.f32 %v3289_v61, %v3197_v30  ;;  %v3693_v36 = vmul.f32 %v4913_v20, %v7148_v49  ;;  %v3685_v26 = vsel %vm3684_vm13, %v4909_v16, %v3681_v54 }
 0x298   : > { %4916 = vrcp.f32 %v7171_v32  ;;  %v3690_v34 = vsel %vm3687_vm2, %v3689_v45, %v3685_v26  ;;  %vm3698_vm3 = vweird.f32 %v4913_v20  ;;  %v3718_v0 = vand.u32 2147483648, %v7171_v32 }
 0x299   : > { %v7180_v13 = vadd.f32 %v6852_v48, %v3359_v59  ;;  %v3292_v43 = vpop.f32.mrf.mxu3  ;;  %v3694_v5 = vsub.f32 1.0, %v3693_v36  ;;  %4072 = vrot.lane.b32.xlu1 %v3690_v34, %s5039_s25  ;;  %v4484_v48 = vadd.f32 -1.0, %v6865_v58  ;;  %v3716_v4 = vand.u32 2147483647, %v7171_v32 }
 0x29a   : > { %4579 = vmatmul.msk.f32.gmra.mxu2 %vm7747_vm12, %v3017_v29  ;;  %vm3699_vm12 = vmor %vm3697_vm10, %vm3698_vm3  ;;  %vm3712_vm0 = vweird.f32 %v7171_v32  ;;  %v3719_v36 = vor.u32 1.1754944e-38, %v3718_v0 }
 0x29b   : > { %v3427_v41 = vsub.f32 0.0, %v7180_v13  ;;  %v7188_v60 = vpop.f32.mrf.mxu0  ;;  %v3695_v22 = vmul.f32 %v4913_v20, %v3694_v5  ;;  %vm3717_vm7 = vcmp.eq.f32.partialorder %v3716_v4, 8.507059e+37  ;;  %vm7754_vm3 = vmmov %vm7752_vm5 }
 0x29c   : > { %v2540_v2 = vpop.permute.xlu0 %2539  ;;  %v3130_v28 = vpop.f32.mrf.mxu2 }
 0x29d   : > { %v4915_v63 = vpop.eup %4914  ;;  %v3472_v16 = vmul.f32 1.442695, %v3427_v41  ;;  %v3198_v44 = vadd.f32 %v3130_v28, %v2961_v52  ;;  %v2604_v50 = vsel %vm7752_vm5, %v4484_v48, %v2540_v2  ;;  %v3696_v58 = vadd.f32 %v4913_v20, %v3695_v22 }
 0x29e   : > { %v4917_v38 = vpop.eup %4916  ;;  %v7194_v1 = vadd.f32 1.0, %v4915_v63  ;;  %v7196_v15 = vpop.f32.mrf.mxu1  ;;  %v3018_v21 = vrot.slane %v2604_v50, 7  ;;  %3342 = vmatmul.f32.gmra.mxu3 %v2604_v50  ;;  %v2967_v48 = vadd.f32 %v7173_v10, %v7167_v35 }
 0x29f   : > { %4918 = vpow2.f32 %v3472_v16  ;;  %v3360_v27 = vadd.f32 %v3292_v43, %v3198_v44  ;;  %v3708_v29 = vmul.f32 %v4917_v38, %v7171_v32  ;;  %v3700_v42 = vsel %vm3699_vm12, %v4913_v20, %v3696_v58  ;;  %vm7755_vm12 = vmmov %vm7754_vm3 }
 0x2a0   : > { %4920 = vrcp.f32 %v7194_v1  ;;  %v3019_v61 = vsel %vm7753_vm8, %v3016_v31, %v3018_v21  ;;  %v3705_v46 = vsel %vm3702_vm6, %v3704_v18, %v3700_v42  ;;  %vm3713_vm1 = vweird.f32 %v4917_v38 }
 0x2a1   : > { %v7211_v49 = vadd.f32 %v7208_v24, %v3360_v27  ;;  %v3295_v39 = vpop.f32.mrf.mxu3  ;;  %v3709_v3 = vsub.f32 1.0, %v3708_v29  ;;  %4074 = vrot.lane.b32.xlu2 %v3705_v46, %s5039_s25  ;;  %vm3714_vm4 = vmor %vm3712_vm0, %vm3713_vm1  ;;  %v3733_v28 = vand.u32 2147483648, %v7194_v1  ;;  %v3731_v63 = vand.u32 2147483647, %v7194_v1 }
 0x2a2   : > { %3180 = vmatmul.f32.gmra.mxu2 %v3019_v61  ;;  %vm3727_vm14 = vweird.f32 %v7194_v1 }
 0x2a3   : > { %v3428_v31 = vsub.f32 0.0, %v7211_v49  ;;  %v7218_v12 = vpop.f32.mrf.mxu0  ;;  %v3710_v17 = vmul.f32 %v4917_v38, %v3709_v3  ;;  %v3734_v27 = vor.u32 1.1754944e-38, %v3733_v28  ;;  %vm3732_vm11 = vcmp.eq.f32.partialorder %v3731_v63, 8.507059e+37 }
 0x2a4   : > { %v3133_v30 = vpop.f32.mrf.mxu2 }
 0x2a5   : > { %v4919_v33 = vpop.eup %4918  ;;  %v3474_v20 = vmul.f32 1.442695, %v3428_v31  ;;  %v3199_v59 = vadd.f32 %v3133_v30, %v2964_v51  ;;  %v3711_v54 = vadd.f32 %v4917_v38, %v3710_v17 }
 0x2a6   : > { %v4921_v7 = vpop.eup %4920  ;;  %v7222_v11 = vadd.f32 1.0, %v4919_v33  ;;  %v7224_v45 = vpop.f32.mrf.mxu1 }
 0x2a7   : > { %4922 = vpow2.f32 %v3474_v20  ;;  %v3361_v43 = vadd.f32 %v3295_v39, %v3199_v59  ;;  %v3715_v26 = vsel %vm3714_vm4, %v4917_v38, %v3711_v54  ;;  %v3723_v5 = vmul.f32 %v4921_v7, %v7194_v1 }
 0x2a8   : > { %4924 = vrcp.f32 %v7222_v11  ;;  %v3720_v34 = vsel %vm3717_vm7, %v3719_v36, %v3715_v26  ;;  %vm3728_vm15 = vweird.f32 %v4921_v7  ;;  %v2970_v1 = vadd.f32 %v7196_v15, %v7188_v60 }
 0x2a9   : > { %v7229_v52 = vadd.f32 %v7208_v24, %v3361_v43  ;;  %v3298_v32 = vpop.f32.mrf.mxu3  ;;  %4076 = vrot.lane.b32.xlu0 %v3720_v34, %s5039_s25  ;;  %v3724_v41 = vsub.f32 1.0, %v3723_v5  ;;  %vm3729_vm9 = vmor %vm3727_vm14, %vm3728_vm15  ;;  %v3748_v0 = vand.u32 2147483648, %v7222_v11  ;;  %v3746_v60 = vand.u32 2147483647, %v7222_v11  ;;  %v4999_v34 = vld [vmem:[%s5087_s23 + $0x8] sm:$0xff] }
 0x2aa   : > { %vm3742_vm2 = vweird.f32 %v7222_v11  ;;  %v2973_v63 = vadd.f32 %v7224_v45, %v7218_v12 }
 0x2ab   : > { %v3429_v6 = vsub.f32 0.0, %v7229_v52  ;;  %v7235_v2 = vpop.f32.mrf.mxu0  ;;  %v3725_v57 = vmul.f32 %v4921_v7, %v3724_v41  ;;  %vm3747_vm10 = vcmp.eq.f32.partialorder %v3746_v60, 8.507059e+37 }
 0x2ac   : > { %v3136_v22 = vpop.f32.mrf.mxu2 }
 0x2ad   : > { %v4923_v16 = vpop.eup %4922  ;;  %v3476_v44 = vmul.f32 1.442695, %v3429_v6  ;;  %v3200_v50 = vadd.f32 %v3136_v22, %v2967_v48  ;;  %v3726_v35 = vadd.f32 %v4921_v7, %v3725_v57 }
 0x2ae   : > { %v4925_v38 = vpop.eup %4924  ;;  %v7239_v21 = vadd.f32 1.0, %v4923_v16  ;;  %v7241_v58 = vpop.f32.mrf.mxu1 }
 0x2af   : > { %4926 = vpow2.f32 %v3476_v44  ;;  %v3362_v10 = vadd.f32 %v3298_v32, %v3200_v50  ;;  %v3738_v18 = vmul.f32 %v4925_v38, %v7222_v11  ;;  %v3730_v29 = vsel %vm3729_vm9, %v4921_v7, %v3726_v35 }
 0x2b0   : > { %4928 = vrcp.f32 %v7239_v21  ;;  %v3735_v46 = vsel %vm3732_vm11, %v3734_v27, %v3730_v29  ;;  %vm3743_vm13 = vweird.f32 %v4925_v38  ;;  %v3763_v44 = vand.u32 2147483648, %v7239_v21 }
 0x2b1   : > { %v7247_v61 = vadd.f32 %v7208_v24, %v3362_v10  ;;  %v4055_v42 = vpop.permute.xlu1 %4054  ;;  %v3301_v39 = vpop.f32.mrf.mxu3  ;;  %v3739_v3 = vsub.f32 1.0, %v3738_v18  ;;  %4078 = vrot.lane.b32.xlu1 %v3735_v46, %s5039_s25  ;;  %vm3744_vm5 = vmor %vm3742_vm2, %vm3743_vm13  ;;  %v3761_v35 = vand.u32 2147483647, %v7239_v21  ;;  %vm3757_vm6 = vweird.f32 %v7239_v21 }
 0x2b2   : > { %v4150_v51 = vmul.f32 %v4055_v42, %v6858_v40  ;;  %v4998_v40 = vld [vmem:[%s5087_s23] sm:$0xff] }
 0x2b3   : > { %v3430_v31 = vsub.f32 0.0, %v7247_v61  ;;  %v4057_v17 = vpop.permute.xlu2 %4056  ;;  %v3740_v4 = vmul.f32 %v4925_v38, %v3739_v3  ;;  %v7265_v54 = vpop.f32.mrf.mxu0  ;;  %v3764_v3 = vor.u32 1.1754944e-38, %v3763_v44  ;;  %vm3762_vm0 = vcmp.eq.f32.partialorder %v3761_v35, 8.507059e+37 }
 0x2b4   : > { %v4182_v15 = vadd.f32 %v4998_v40, %v4150_v51  ;;  %v4151_v30 = vmul.f32 %v4057_v17, %v6888_v62  ;;  %v3139_v33 = vpop.f32.mrf.mxu2  ;;  %v3749_v62 = vor.u32 1.1754944e-38, %v3748_v0 }
 0x2b5   : > { %v4927_v20 = vpop.eup %4926  ;;  %v3478_v59 = vmul.f32 1.442695, %v3430_v31  ;;  %v3201_v7 = vadd.f32 %v3139_v33, %v2970_v1  ;;  %v3741_v36 = vadd.f32 %v4925_v38, %v3740_v4 }
 0x2b6   : > { %v4929_v43 = vpop.eup %4928  ;;  %v7268_v26 = vadd.f32 1.0, %v4927_v20  ;;  %4214 = vst.msk [vmem:[%s7260_s30] sm:$0xff] %vm7754_vm3, %v4182_v15  ;;  %v4183_v5 = vadd.f32 %v4999_v34, %v4151_v30  ;;  %v7273_v32 = vpop.f32.mrf.mxu1 }
 0x2b7   : > { %4930 = vpow2.f32 %v3478_v59  ;;  %v3363_v41 = vadd.f32 %v3301_v39, %v3201_v7  ;;  %v3745_v48 = vsel %vm3744_vm5, %v4925_v38, %v3741_v36  ;;  %v3753_v6 = vmul.f32 %v4929_v43, %v7239_v21 }
 0x2b8   : > { %4932 = vrcp.f32 %v7268_v26  ;;  %4215 = vst.msk [vmem:[%s7260_s30 + $0x8] sm:$0xff] %vm7755_vm12, %v4183_v5  ;;  %v3750_v11 = vsel %vm3747_vm10, %v3749_v62, %v3745_v48  ;;  %vm3758_vm8 = vweird.f32 %v4929_v43  ;;  %v2976_v21 = vadd.f32 %v7241_v58, %v7235_v2 }
 0x2b9   : > { %v7281_v28 = vadd.f32 %v7208_v24, %v3363_v41  ;;  %v3304_v22 = vpop.f32.mrf.mxu3  ;;  %4080 = vrot.lane.b32.xlu2 %v3750_v11, %s5039_s25  ;;  %v3754_v57 = vsub.f32 1.0, %v3753_v6  ;;  %vm3759_vm1 = vmor %vm3757_vm6, %vm3758_vm8  ;;  %v3778_v60 = vand.u32 2147483648, %v7268_v26  ;;  %v3776_v30 = vand.u32 2147483647, %v7268_v26 }
 0x2ba   : > { %vm3772_vm7 = vweird.f32 %v7268_v26  ;;  %vm7756_vm6 = vmmov %vm7754_vm3 }
 0x2bb   : > { %v3431_v16 = vsub.f32 0.0, %v7281_v28  ;;  %v3755_v38 = vmul.f32 %v4929_v43, %v3754_v57  ;;  %v7294_v12 = vpop.f32.mrf.mxu0  ;;  %v3779_v58 = vor.u32 1.1754944e-38, %v3778_v60  ;;  %vm3777_vm14 = vcmp.eq.f32.partialorder %v3776_v30, 8.507059e+37 }
 0x2bc   : > { %v3142_v50 = vpop.f32.mrf.mxu2  ;;  %v2979_v57 = vadd.f32 %v7273_v32, %v7265_v54  ;;  %v5000_v32 = vld [vmem:[%s5087_s23 + $0x20] sm:$0xff] }
 0x2bd   : > { %v4931_v10 = vpop.eup %4930  ;;  %v3480_v27 = vmul.f32 1.442695, %v3431_v16  ;;  %v3202_v18 = vadd.f32 %v3142_v50, %v2973_v63  ;;  %v3756_v46 = vadd.f32 %v4929_v43, %v3755_v38 }
 0x2be   : > { %v4933_v29 = vpop.eup %4932  ;;  %v7289_v42 = vadd.f32 1.0, %v4931_v10  ;;  %v7291_v39 = vpop.f32.mrf.mxu1 }
 0x2bf   : > { %4934 = vpow2.f32 %v3480_v27  ;;  %v3364_v45 = vadd.f32 %v3304_v22, %v3202_v18  ;;  %v3768_v1 = vmul.f32 %v4933_v29, %v7268_v26  ;;  %v3760_v51 = vsel %vm3759_vm1, %v4929_v43, %v3756_v46 }
 0x2c0   : > { %4936 = vrcp.f32 %v7289_v42  ;;  %v3765_v17 = vsel %vm3762_vm0, %v3764_v3, %v3760_v51  ;;  %vm3773_vm4 = vweird.f32 %v4933_v29  ;;  %v3793_v16 = vand.u32 2147483648, %v7289_v42 }
 0x2c1   : > { %v7299_v0 = vadd.f32 %v7208_v24, %v3364_v45  ;;  %v3307_v31 = vpop.f32.mrf.mxu3  ;;  %v3769_v4 = vsub.f32 1.0, %v3768_v1  ;;  %4082 = vrot.lane.b32.xlu0 %v3765_v17, %s5039_s25  ;;  %vm3774_vm15 = vmor %vm3772_vm7, %vm3773_vm4  ;;  %v3791_v35 = vand.u32 2147483647, %v7289_v42  ;;  %vm3787_vm11 = vweird.f32 %v7289_v42 }
 0x2c2   : > { %v3794_v51 = vor.u32 1.1754944e-38, %v3793_v16  ;;  %vm7757_vm7 = vmmov %vm7754_vm3 }
 0x2c3   : > { %v3432_v40 = vsub.f32 0.0, %v7299_v0  ;;  %v3770_v15 = vmul.f32 %v4933_v29, %v3769_v4  ;;  %v7314_v11 = vpop.f32.mrf.mxu0  ;;  %vm3792_vm2 = vcmp.eq.f32.partialorder %v3791_v35, 8.507059e+37 }
 0x2c4   : > { %v3145_v33 = vpop.f32.mrf.mxu2 }
 0x2c5   : > { %v4935_v20 = vpop.eup %4934  ;;  %v3482_v59 = vmul.f32 1.442695, %v3432_v40  ;;  %v3203_v7 = vadd.f32 %v3145_v33, %v2976_v21  ;;  %v3771_v36 = vadd.f32 %v4933_v29, %v3770_v15  ;;  %v2982_v40 = vadd.f32 %v7291_v39, %v7294_v12 }
 0x2c6   : > { %v4937_v43 = vpop.eup %4936  ;;  %v7308_v34 = vadd.f32 1.0, %v4935_v20  ;;  %v7310_v2 = vpop.f32.mrf.mxu1 }
 0x2c7   : > { %4938 = vpow2.f32 %v3482_v59  ;;  %v3365_v5 = vadd.f32 %v3307_v31, %v3203_v7  ;;  %v3775_v62 = vsel %vm3774_vm15, %v4933_v29, %v3771_v36  ;;  %v3783_v48 = vmul.f32 %v4937_v43, %v7289_v42 }
 0x2c8   : > { %4940 = vrcp.f32 %v7308_v34  ;;  %v3780_v41 = vsel %vm3777_vm14, %v3779_v58, %v3775_v62  ;;  %vm3788_vm9 = vweird.f32 %v4937_v43  ;;  %v3808_v33 = vand.u32 2147483648, %v7308_v34 }
 0x2c9   : > { %v7317_v26 = vadd.f32 %v7208_v24, %v3365_v5  ;;  %v3310_v6 = vpop.f32.mrf.mxu3  ;;  %4084 = vrot.lane.b32.xlu1 %v3780_v41, %s5039_s25  ;;  %v3784_v22 = vsub.f32 1.0, %v3783_v48  ;;  %vm3789_vm13 = vmor %vm3787_vm11, %vm3788_vm9  ;;  %v3806_v36 = vand.u32 2147483647, %v7308_v34  ;;  %vm3802_vm10 = vweird.f32 %v7308_v34  ;;  %v5001_v48 = vld [vmem:[%s5087_s23 + $0x10] sm:$0xff] }
 0x2ca   : > { %v2985_v35 = vadd.f32 %v7310_v2, %v7314_v11 }
 0x2cb   : > { %v3433_v63 = vsub.f32 0.0, %v7317_v26  ;;  %v4063_v44 = vpop.permute.xlu2 %4062  ;;  %v3785_v38 = vmul.f32 %v4937_v43, %v3784_v22  ;;  %v7342_v15 = vpop.f32.mrf.mxu0  ;;  %vm3807_vm8 = vcmp.eq.f32.partialorder %v3806_v36, 8.507059e+37 }
 0x2cc   : > { %v3148_v50 = vpop.f32.mrf.mxu2  ;;  %v4154_v18 = vmul.f32 %v4063_v44, %v6945_v53 }
 0x2cd   : > { %v4939_v10 = vpop.eup %4938  ;;  %v3484_v27 = vmul.f32 1.442695, %v3433_v63  ;;  %v3204_v29 = vadd.f32 %v3148_v50, %v2979_v57  ;;  %v3786_v54 = vadd.f32 %v4937_v43, %v3785_v38  ;;  %v3809_v57 = vor.u32 1.1754944e-38, %v3808_v33 }
 0x2ce   : > { %v4941_v46 = vpop.eup %4940  ;;  %v7326_v45 = vadd.f32 1.0, %v4939_v10  ;;  %v4186_v3 = vadd.f32 %v5000_v32, %v4154_v18  ;;  %v7331_v31 = vpop.f32.mrf.mxu1 }
 0x2cf   : > { %4942 = vpow2.f32 %v3484_v27  ;;  %v3366_v1 = vadd.f32 %v3310_v6, %v3204_v29  ;;  %v3790_v17 = vsel %vm3789_vm13, %v4937_v43, %v3786_v54  ;;  %v3798_v53 = vmul.f32 %v4941_v46, %v7308_v34 }
 0x2d0   : > { %4944 = vrcp.f32 %v7326_v45  ;;  %4218 = vst.msk [vmem:[%s7260_s30 + $0x20] sm:$0xff] %vm7754_vm3, %v4186_v3  ;;  %v3795_v21 = vsel %vm3792_vm2, %v3794_v51, %v3790_v17  ;;  %vm3803_vm5 = vweird.f32 %v4941_v46  ;;  %v3823_v18 = vand.u32 2147483648, %v7326_v45  ;;  %v5002_v17 = vld [vmem:[%s5087_s23 + $0x18] sm:$0xff]  ;;  %vm7758_vm2 = vmmov %vm7754_vm3 }
 0x2d1   : > { %v7337_v4 = vadd.f32 %v7208_v24, %v3366_v1  ;;  %v3313_v42 = vpop.f32.mrf.mxu3  ;;  %4086 = vrot.lane.b32.xlu2 %v3795_v21, %s5039_s25  ;;  %v3799_v60 = vsub.f32 1.0, %v3798_v53  ;;  %vm3804_vm12 = vmor %vm3802_vm10, %vm3803_vm5  ;;  %v3821_v54 = vand.u32 2147483647, %v7326_v45  ;;  %vm3817_vm0 = vweird.f32 %v7326_v45 }
 0x2d3   : > { %v3434_v30 = vsub.f32 0.0, %v7337_v4  ;;  %v4059_v20 = vpop.permute.xlu0 %4058  ;;  %v3800_v7 = vmul.f32 %v4941_v46, %v3799_v60  ;;  %v7368_v3 = vpop.f32.mrf.mxu0  ;;  %vm3822_vm15 = vcmp.eq.f32.partialorder %v3821_v54, 8.507059e+37 }
 0x2d4   : > { %v3151_v59 = vpop.f32.mrf.mxu2  ;;  %v4152_v5 = vmul.f32 %v4059_v20, %v6902_v23 }
 0x2d5   : > { %v4943_v43 = vpop.eup %4942  ;;  %v3486_v58 = vmul.f32 1.442695, %v3434_v30  ;;  %v3205_v62 = vadd.f32 %v3151_v59, %v2982_v40  ;;  %v3801_v41 = vadd.f32 %v4941_v46, %v3800_v7 }
 0x2d6   : > { %v4945_v39 = vpop.eup %4944  ;;  %v7348_v12 = vadd.f32 1.0, %v4943_v43  ;;  %v4184_v6 = vadd.f32 %v5001_v48, %v4152_v5  ;;  %v7359_v34 = vpop.f32.mrf.mxu1 }
 0x2d7   : > { %4946 = vpow2.f32 %v3486_v58  ;;  %v3367_v22 = vadd.f32 %v3313_v42, %v3205_v62  ;;  %v3805_v63 = vsel %vm3804_vm12, %v4941_v46, %v3801_v41  ;;  %v3813_v23 = vmul.f32 %v4945_v39, %v7326_v45 }
 0x2d8   : > { %4948 = vrcp.f32 %v7348_v12  ;;  %4216 = vst.msk [vmem:[%s7260_s30 + $0x10] sm:$0xff] %vm7756_vm6, %v4184_v6  ;;  %v3810_v50 = vsel %vm3807_vm8, %v3809_v57, %v3805_v63  ;;  %vm3818_vm1 = vweird.f32 %v4945_v39  ;;  %v3838_v7 = vand.u32 2147483648, %v7348_v12  ;;  %vm7759_vm8 = vmmov %vm7758_vm2 }
 0x2d9   : > { %v7357_v16 = vadd.f32 %v7208_v24, %v3367_v22  ;;  %v3316_v44 = vpop.f32.mrf.mxu3  ;;  %4088 = vrot.lane.b32.xlu0 %v3810_v50, %s5039_s25  ;;  %v3814_v38 = vsub.f32 1.0, %v3813_v23  ;;  %vm3819_vm4 = vmor %vm3817_vm0, %vm3818_vm1  ;;  %v3836_v43 = vand.u32 2147483647, %v7348_v12  ;;  %v2988_v58 = vadd.f32 %v7331_v31, %v7342_v15  ;;  %v5003_v50 = vld [vmem:[%s5087_s23 + $0x38] sm:$0xff] }
 0x2da   : > { %vm3832_vm9 = vweird.f32 %v7348_v12  ;;  %v3839_v31 = vor.u32 1.1754944e-38, %v3838_v7 }
 0x2db   : > { %v3435_v10 = vsub.f32 0.0, %v7357_v16  ;;  %v4061_v27 = vpop.permute.xlu1 %4060  ;;  %v3815_v46 = vmul.f32 %v4945_v39, %v3814_v38  ;;  %v2880_v15 = vpop.f32.mrf.mxu0  ;;  %vm3837_vm13 = vcmp.eq.f32.partialorder %v3836_v43, 8.507059e+37 }
 0x2dc   : > { %v4153_v29 = vmul.f32 %v4061_v27, %v6925_v37  ;;  %v3824_v37 = vor.u32 1.1754944e-38, %v3823_v18 }
 0x2dd   : > { %v4947_v32 = vpop.eup %4946  ;;  %v3488_v1 = vmul.f32 1.442695, %v3435_v10  ;;  %v3154_v51 = vpop.f32.mrf.mxu2  ;;  %v3816_v21 = vadd.f32 %v4945_v39, %v3815_v46 }
 0x2de   : > { %v4949_v2 = vpop.eup %4948  ;;  %v7371_v11 = vadd.f32 1.0, %v4947_v32  ;;  %v4185_v53 = vadd.f32 %v5002_v17, %v4153_v29  ;;  %v3206_v42 = vadd.f32 %v3154_v51, %v2985_v35  ;;  %v7387_v62 = vpop.f32.mrf.mxu1  ;;  %v2991_v51 = vadd.f32 %v7359_v34, %v7368_v3 }
 0x2df   : > { %4950 = vpow2.f32 %v3488_v1  ;;  %v3828_v60 = vmul.f32 %v4949_v2, %v7348_v12  ;;  %v3820_v30 = vsel %vm3819_vm4, %v4945_v39, %v3816_v21  ;;  %vm3833_vm14 = vweird.f32 %v4949_v2 }
 0x2e0   : > { %4952 = vrcp.f32 %v7371_v11  ;;  %4217 = vst.msk [vmem:[%s7260_s30 + $0x18] sm:$0xff] %vm7757_vm7, %v4185_v53  ;;  %v3368_v40 = vadd.f32 %v3316_v44, %v3206_v42  ;;  %v3825_v33 = vsel %vm3822_vm15, %v3824_v37, %v3820_v30  ;;  %vm3834_vm11 = vmor %vm3832_vm9, %vm3833_vm14  ;;  %v3853_v46 = vand.u32 2147483648, %v7371_v11 }
 0x2e1   : > { %v3319_v45 = vpop.f32.mrf.mxu3  ;;  %v3829_v20 = vsub.f32 1.0, %v3828_v60  ;;  %4090 = vrot.lane.b32.xlu1 %v3825_v33, %s5039_s25  ;;  %v3851_v1 = vand.u32 2147483647, %v7371_v11  ;;  %vm3847_vm5 = vweird.f32 %v7371_v11  ;;  %vm7760_vm7 = vmmov %vm7758_vm2 }
 0x2e2   : > { %v7379_v59 = vadd.f32 %v7208_v24, %v3368_v40  ;;  %v5004_v40 = vld [vmem:[%s5087_s23 + $0x28] sm:$0xff]  ;;  %v3854_v33 = vor.u32 1.1754944e-38, %v3853_v46 }
 0x2e3   : > { %v3830_v36 = vmul.f32 %v4949_v2, %v3829_v20  ;;  %v4069_v39 = vpop.permute.xlu2 %4068  ;;  %vm3852_vm12 = vcmp.eq.f32.partialorder %v3851_v1, 8.507059e+37 }
 0x2e4   : > { %v3436_v5 = vsub.f32 0.0, %v7379_v59  ;;  %v4157_v48 = vmul.f32 %v4069_v39, %v7021_v19 }
 0x2e5   : > { %v4951_v41 = vpop.eup %4950  ;;  %v3157_v6 = vpop.f32.mrf.mxu2  ;;  %v3831_v22 = vadd.f32 %v4949_v2, %v3830_v36 }
 0x2e6   : > { %v4953_v57 = vpop.eup %4952  ;;  %v7391_v63 = vadd.f32 1.0, %v4951_v41  ;;  %v3490_v23 = vmul.f32 1.442695, %v3436_v5  ;;  %v3207_v44 = vadd.f32 %v3157_v6, %v2988_v58  ;;  %v4189_v38 = vadd.f32 %v5003_v50, %v4157_v48  ;;  %v2996_v60 = vpop.f32.mrf.mxu1 }
 0x2e7   : > { %v3835_v35 = vsel %vm3834_vm11, %v4949_v2, %v3831_v22  ;;  %v3843_v19 = vmul.f32 %v4953_v57, %v7371_v11  ;;  %vm3848_vm3 = vweird.f32 %v4953_v57  ;;  %v2883_v36 = vpop.f32.mrf.mxu0  ;;  %v2994_v6 = vadd.f32 %v7387_v62, %v2880_v15  ;;  %vm7761_vm11 = vmmov %vm7758_vm2 }
 0x2e8   : > { %4954 = vrcp.f32 %v7391_v63  ;;  %v3369_v10 = vadd.f32 %v3319_v45, %v3207_v44  ;;  %v3840_v12 = vsel %vm3837_vm13, %v3839_v31, %v3835_v35  ;;  %4221 = vst.msk [vmem:[%s7260_s30 + $0x38] sm:$0xff] %vm7758_vm2, %v4189_v38  ;;  %vm3849_vm10 = vmor %vm3847_vm5, %vm3848_vm3  ;;  %v3868_v39 = vand.u32 2147483648, %v7391_v63 }
 0x2e9   : > { %4956 = vpow2.f32 %v3490_v23  ;;  %v3322_v27 = vpop.f32.mrf.mxu3  ;;  %4092 = vrot.lane.b32.xlu2 %v3840_v12, %s5039_s25  ;;  %v3844_v18 = vsub.f32 1.0, %v3843_v19  ;;  %v3866_v48 = vand.u32 2147483647, %v7391_v63  ;;  %vm3862_vm1 = vweird.f32 %v7391_v63 }
 0x2ea   : > { %v7401_v29 = vadd.f32 %v7208_v24, %v3369_v10  ;;  %v3869_v19 = vor.u32 1.1754944e-38, %v3868_v39 }
 0x2eb   : > { %v4065_v54 = vpop.permute.xlu0 %4064  ;;  %v3845_v32 = vmul.f32 %v4953_v57, %v3844_v18  ;;  %vm3867_vm4 = vcmp.eq.f32.partialorder %v3866_v48, 8.507059e+37 }
 0x2ec   : > { %v3437_v2 = vsub.f32 0.0, %v7401_v29  ;;  %v4155_v17 = vmul.f32 %v4065_v54, %v6968_v8 }
 0x2ed   : > { %v3160_v53 = vpop.f32.mrf.mxu2  ;;  %v3846_v42 = vadd.f32 %v4953_v57, %v3845_v32 }
 0x2ee   : > { %v4955_v21 = vpop.eup %4954  ;;  %v3492_v37 = vmul.f32 1.442695, %v3437_v2  ;;  %v4187_v30 = vadd.f32 %v5004_v40, %v4155_v17  ;;  %v3208_v45 = vadd.f32 %v3160_v53, %v2991_v51  ;;  %v2999_v15 = vpop.f32.mrf.mxu1  ;;  %v2997_v2 = vadd.f32 %v2996_v60, %v2883_v36  ;;  %v5006_v60 = vld [vmem:[%s5087_s23 + $0x50] sm:$0xff] }
 0x2ef   : > { %v4957_v20 = vpop.eup %4956  ;;  %v3850_v7 = vsel %vm3849_vm10, %v4953_v57, %v3846_v42  ;;  %v3858_v34 = vmul.f32 %v4955_v21, %v7391_v63  ;;  %vm3863_vm6 = vweird.f32 %v4955_v21  ;;  %v2886_v1 = vpop.f32.mrf.mxu0 }
 0x2f0   : > { %v7412_v3 = vadd.f32 1.0, %v4957_v20  ;;  %4958 = vpow2.f32 %v3492_v37  ;;  %4219 = vst.msk [vmem:[%s7260_s30 + $0x28] sm:$0xff] %vm7759_vm8, %v4187_v30  ;;  %v3370_v8 = vadd.f32 %v3322_v27, %v3208_v45  ;;  %v3855_v11 = vsel %vm3852_vm12, %v3854_v33, %v3850_v7  ;;  %vm3864_vm0 = vmor %vm3862_vm1, %vm3863_vm6  ;;  %v5005_v27 = vld [vmem:[%s5087_s23 + $0x30] sm:$0xff] }
 0x2f1   : > { %v3325_v43 = vpop.f32.mrf.mxu3  ;;  %4094 = vrot.lane.b32.xlu0 %v3855_v11, %s5039_s25  ;;  %v3859_v58 = vsub.f32 1.0, %v3858_v34  ;;  %vm7762_vm12 = vmmov %vm7760_vm7 }
 0x2f2   : > { %4960 = vrcp.f32 %v7412_v3  ;;  %v7419_v5 = vadd.f32 %v7208_v24, %v3370_v8  ;;  %v3883_v42 = vand.u32 2147483648, %v7412_v3  ;;  %v3881_v30 = vand.u32 2147483647, %v7412_v3 }
 0x2f3   : > { %v3860_v41 = vmul.f32 %v4955_v21, %v3859_v58  ;;  %v4067_v57 = vpop.permute.xlu1 %4066  ;;  %vm3877_vm14 = vweird.f32 %v7412_v3 }
 0x2f4   : > { %v3438_v22 = vsub.f32 0.0, %v7419_v5  ;;  %v4156_v38 = vmul.f32 %v4067_v57, %v7001_v47  ;;  %vm3882_vm13 = vcmp.eq.f32.partialorder %v3881_v30, 8.507059e+37 }
 0x2f5   : > { %v3163_v23 = vpop.f32.mrf.mxu2  ;;  %v3861_v44 = vadd.f32 %v4955_v21, %v3860_v41 }
 0x2f6   : > { %v4959_v31 = vpop.eup %4958  ;;  %v3494_v50 = vmul.f32 1.442695, %v3438_v22  ;;  %v3209_v35 = vadd.f32 %v3163_v23, %v2994_v6  ;;  %v4188_v18 = vadd.f32 %v5005_v27, %v4156_v38  ;;  %v3002_v41 = vpop.f32.mrf.mxu1  ;;  %v3000_v22 = vadd.f32 %v2999_v15, %v2886_v1  ;;  %v5007_v15 = vld [vmem:[%s5087_s23 + $0x40] sm:$0xff] }
 0x2f7   : > { %v7427_v10 = vadd.f32 1.0, %v4959_v31  ;;  %v3865_v12 = vsel %vm3864_vm0, %v4955_v21, %v3861_v44 }
 0x2f8   : > { %v4961_v62 = vpop.eup %4960  ;;  %4962 = vpow2.f32 %v3494_v50  ;;  %v3371_v46 = vadd.f32 %v3325_v43, %v3209_v35  ;;  %v3870_v54 = vsel %vm3867_vm4, %v3869_v19, %v3865_v12  ;;  %4220 = vst.msk [vmem:[%s7260_s30 + $0x30] sm:$0xff] %vm7760_vm7, %v4188_v18  ;;  %v2889_v35 = vpop.f32.mrf.mxu0  ;;  %vm7763_vm4 = vmmov %vm7760_vm7 }
 0x2f9   : > { %4964 = vrcp.f32 %v7427_v10  ;;  %v3328_v63 = vpop.f32.mrf.mxu3  ;;  %4096 = vrot.lane.b32.xlu1 %v3870_v54, %s5039_s25  ;;  %v3873_v47 = vmul.f32 %v4961_v62, %v7412_v3  ;;  %vm3878_vm15 = vweird.f32 %v4961_v62  ;;  %v3896_v23 = vand.u32 2147483647, %v7427_v10 }
 0x2fa   : > { %v7436_v32 = vadd.f32 %v7208_v24, %v3371_v46  ;;  %vm3879_vm9 = vmor %vm3877_vm14, %vm3878_vm15  ;;  %v3898_v44 = vand.u32 2147483648, %v7427_v10  ;;  %vm3892_vm3 = vweird.f32 %v7427_v10 }
 0x2fb   : > { %v3874_v51 = vsub.f32 1.0, %v3873_v47  ;;  %v4075_v53 = vpop.permute.xlu2 %4074  ;;  %vm3897_vm10 = vcmp.eq.f32.partialorder %v3896_v23, 8.507059e+37  ;;  %vm7764_vm14 = vmmov %vm7763_vm4 }
 0x2fc   : > { %v3439_v17 = vsub.f32 0.0, %v7436_v32  ;;  %v4160_v21 = vmul.f32 %v4075_v53, %v7103_v25  ;;  %v3884_v25 = vor.u32 1.1754944e-38, %v3883_v42  ;;  %v3899_v47 = vor.u32 1.1754944e-38, %v3898_v44 }
 0x2fd   : > { %v3166_v37 = vpop.f32.mrf.mxu2  ;;  %v3875_v40 = vmul.f32 %v4961_v62, %v3874_v51 }
 0x2fe   : > { %v4963_v45 = vpop.eup %4962  ;;  %v3496_v33 = vmul.f32 1.442695, %v3439_v17  ;;  %v3210_v20 = vadd.f32 %v3166_v37, %v2997_v2  ;;  %v4192_v8 = vadd.f32 %v5006_v60, %v4160_v21  ;;  %v3003_v37 = vadd.f32 %v3002_v41, %v2889_v35  ;;  %v5008_v41 = vld [vmem:[%s5087_s23 + $0x48] sm:$0xff] }
 0x2ff   : > { %v4965_v7 = vpop.eup %4964  ;;  %v7442_v34 = vadd.f32 1.0, %v4963_v45  ;;  %v3876_v11 = vadd.f32 %v4961_v62, %v3875_v40  ;;  %v3005_v40 = vpop.f32.mrf.mxu1 }
 0x300   : > { %4966 = vpow2.f32 %v3496_v33  ;;  %v3372_v36 = vadd.f32 %v3328_v63, %v3210_v20  ;;  %v3888_v43 = vmul.f32 %v4965_v7, %v7427_v10  ;;  %4224 = vst.msk [vmem:[%s7260_s30 + $0x50] sm:$0xff] %vm7761_vm11, %v4192_v8  ;;  %vm3893_vm2 = vweird.f32 %v4965_v7 }
 0x301   : > { %4968 = vrcp.f32 %v7442_v34  ;;  %v3331_v58 = vpop.f32.mrf.mxu3  ;;  %v3880_v39 = vsel %vm3879_vm9, %v4961_v62, %v3876_v11  ;;  %vm3894_vm5 = vmor %vm3892_vm3, %vm3893_vm2  ;;  %v3911_v42 = vand.u32 2147483647, %v7442_v34  ;;  %v3913_v21 = vand.u32 2147483648, %v7442_v34 }
 0x302   : > { %v7451_v48 = vadd.f32 %v7208_v24, %v3372_v36  ;;  %v3885_v6 = vsel %vm3882_vm13, %v3884_v25, %v3880_v39  ;;  %v3889_v3 = vsub.f32 1.0, %v3888_v43  ;;  %vm3907_vm6 = vweird.f32 %v7442_v34  ;;  %v2892_v43 = vpop.f32.mrf.mxu0 }
 0x303   : > { %4098 = vrot.lane.b32.xlu2 %v3885_v6, %s5039_s25  ;;  %v4071_v57 = vpop.permute.xlu0 %4070  ;;  %vm3912_vm0 = vcmp.eq.f32.partialorder %v3911_v42, 8.507059e+37  ;;  %v3914_v39 = vor.u32 1.1754944e-38, %v3913_v21 }
 0x304   : > { %v3440_v31 = vsub.f32 0.0, %v7451_v48  ;;  %v4158_v50 = vmul.f32 %v4071_v57, %v7050_v56  ;;  %v3890_v38 = vmul.f32 %v4965_v7, %v3889_v3 }
 0x305   : > { %v3169_v19 = vpop.f32.mrf.mxu2 }
 0x306   : > { %v4967_v12 = vpop.eup %4966  ;;  %v3498_v62 = vmul.f32 1.442695, %v3440_v31  ;;  %v4190_v27 = vadd.f32 %v5007_v15, %v4158_v50  ;;  %v3211_v18 = vadd.f32 %v3169_v19, %v3000_v22  ;;  %v3891_v46 = vadd.f32 %v4965_v7, %v3890_v38 }
 0x307   : > { %v4969_v54 = vpop.eup %4968  ;;  %v7460_v63 = vadd.f32 1.0, %v4967_v12  ;;  %v3006_v50 = vadd.f32 %v3005_v40, %v2892_v43  ;;  %v5010_v43 = vld [vmem:[%s5087_s23 + $0x58] sm:$0xff] }
 0x308   : > { %4970 = vpow2.f32 %v3498_v62  ;;  %4222 = vst.msk [vmem:[%s7260_s30 + $0x40] sm:$0xff] %vm7762_vm12, %v4190_v27  ;;  %v3373_v56 = vadd.f32 %v3331_v58, %v3211_v18  ;;  %v3895_v1 = vsel %vm3894_vm5, %v4965_v7, %v3891_v46  ;;  %v3903_v51 = vmul.f32 %v4969_v54, %v7442_v34  ;;  %v5009_v46 = vld [vmem:[%s5087_s23 + $0x68] sm:$0xff] }
 0x309   : > { %4972 = vrcp.f32 %v7460_v63  ;;  %v3334_v10 = vpop.f32.mrf.mxu3  ;;  %v3900_v2 = vsel %vm3897_vm10, %v3899_v47, %v3895_v1  ;;  %vm3908_vm8 = vweird.f32 %v4969_v54  ;;  %v3928_v19 = vand.u32 2147483648, %v7460_v63  ;;  %vm7765_vm10 = vmmov %vm7763_vm4 }
 0x30a   : > { %v7467_v17 = vadd.f32 %v7208_v24, %v3373_v56  ;;  %4100 = vrot.lane.b32.xlu0 %v3900_v2, %s5039_s25  ;;  %v3904_v53 = vsub.f32 1.0, %v3903_v51  ;;  %vm3909_vm1 = vmor %vm3907_vm6, %vm3908_vm8  ;;  %v3926_v15 = vand.u32 2147483647, %v7460_v63  ;;  %v3008_v51 = vpop.f32.mrf.mxu1  ;;  %vm3922_vm15 = vweird.f32 %v7460_v63  ;;  %v2895_v42 = vpop.f32.mrf.mxu0 }
 0x30b   : > { %v4073_v33 = vpop.permute.xlu1 %4072  ;;  %v3929_v2 = vor.u32 1.1754944e-38, %v3928_v19 }
 0x30c   : > { %v3441_v30 = vsub.f32 0.0, %v7467_v17  ;;  %v3905_v45 = vmul.f32 %v4969_v54, %v3904_v53  ;;  %v4159_v8 = vmul.f32 %v4073_v33, %v7078_v9  ;;  %vm3927_vm11 = vcmp.eq.f32.partialorder %v3926_v15, 8.507059e+37 }
 0x30d   : > { %v3172_v20 = vpop.f32.mrf.mxu2 }
 0x30e   : > { %v4971_v7 = vpop.eup %4970  ;;  %v3500_v60 = vmul.f32 1.442695, %v3441_v30  ;;  %v3212_v11 = vadd.f32 %v3172_v20, %v3003_v37  ;;  %v3906_v36 = vadd.f32 %v4969_v54, %v3905_v45  ;;  %v4191_v6 = vadd.f32 %v5008_v41, %v4159_v8 }
 0x30f   : > { %v4973_v25 = vpop.eup %4972  ;;  %v7475_v58 = vadd.f32 1.0, %v4971_v7  ;;  %v3009_v30 = vadd.f32 %v3008_v51, %v2895_v42  ;;  %v5012_v42 = vld [vmem:[%s5087_s23 + $0x60] sm:$0xff] }
 0x310   : > { %4974 = vpow2.f32 %v3500_v60  ;;  %v3374_v3 = vadd.f32 %v3334_v10, %v3212_v11  ;;  %v3910_v22 = vsel %vm3909_vm1, %v4969_v54, %v3906_v36  ;;  %v3918_v9 = vmul.f32 %v4973_v25, %v7460_v63  ;;  %4223 = vst.msk [vmem:[%s7260_s30 + $0x48] sm:$0xff] %vm7763_vm4, %v4191_v6 }
 0x311   : > { %4976 = vrcp.f32 %v7475_v58  ;;  %v3915_v34 = vsel %vm3912_vm0, %v3914_v39, %v3910_v22  ;;  %v3337_v23 = vpop.f32.mrf.mxu3  ;;  %vm3923_vm7 = vweird.f32 %v4973_v25  ;;  %v3941_v33 = vand.u32 2147483647, %v7475_v58  ;;  %vm7766_vm0 = vmmov %vm7763_vm4 }
 0x312   : > { %v7483_v57 = vadd.f32 %v7208_v24, %v3374_v3  ;;  %4102 = vrot.lane.b32.xlu1 %v3915_v34, %s5039_s25  ;;  %v3919_v31 = vsub.f32 1.0, %v3918_v9  ;;  %vm3924_vm9 = vmor %vm3922_vm15, %vm3923_vm7  ;;  %v3943_v20 = vand.u32 2147483648, %v7475_v58  ;;  %vm3937_vm2 = vweird.f32 %v7475_v58 }
 0x313   : > { %v4081_v44 = vpop.permute.xlu2 %4080  ;;  %vm3942_vm5 = vcmp.eq.f32.partialorder %v3941_v33, 8.507059e+37 }
 0x314   : > { %v3442_v38 = vsub.f32 0.0, %v7483_v57  ;;  %v4163_v35 = vmul.f32 %v4081_v44, %v7180_v13  ;;  %v3920_v62 = vmul.f32 %v4973_v25, %v3919_v31  ;;  %v3944_v34 = vor.u32 1.1754944e-38, %v3943_v20  ;;  %v5011_v31 = vld [vmem:[%s7620_s4] ss:$0 sm:$0xff] }
 0x315   : > { %v3175_v12 = vpop.f32.mrf.mxu2 }
 0x316   : > { %v4975_v27 = vpop.eup %4974  ;;  %v3502_v18 = vmul.f32 1.442695, %v3442_v38  ;;  %v4195_v54 = vadd.f32 %v5009_v46, %v4163_v35  ;;  %v3213_v47 = vadd.f32 %v3175_v12, %v3006_v50  ;;  %v3921_v10 = vadd.f32 %v4973_v25, %v3920_v62  ;;  %v2898_v35 = vpop.f32.mrf.mxu0 }
 0x317   : > { %v4977_v56 = vpop.eup %4976  ;;  %v7491_v1 = vadd.f32 1.0, %v4975_v27 }
 0x318   : > { %4978 = vpow2.f32 %v3502_v18  ;;  %4227 = vst.msk [vmem:[%s7260_s30 + $0x68] sm:$0xff] %vm7764_vm14, %v4195_v54  ;;  %v3375_v13 = vadd.f32 %v3337_v23, %v3213_v47  ;;  %v3933_v53 = vmul.f32 %v4977_v56, %v7475_v58  ;;  %v3925_v21 = vsel %vm3924_vm9, %v4973_v25, %v3921_v10  ;;  %v3011_v58 = vpop.f32.mrf.mxu1  ;;  %vm7767_vm9 = vmmov %vm7766_vm0 }
 0x319   : > { %4980 = vrcp.f32 %v7491_v1  ;;  %v3930_v40 = vsel %vm3927_vm11, %v3929_v2, %v3925_v21  ;;  %vm3938_vm13 = vweird.f32 %v4977_v56  ;;  %v3956_v19 = vand.u32 2147483647, %v7491_v1 }
 0x31a   : > { %v7500_v37 = vadd.f32 %v7208_v24, %v3375_v13  ;;  %v3934_v63 = vsub.f32 1.0, %v3933_v53  ;;  %4104 = vrot.lane.b32.xlu2 %v3930_v40, %s5039_s25  ;;  %v3340_v24 = vpop.f32.mrf.mxu3  ;;  %vm3939_vm3 = vmor %vm3937_vm2, %vm3938_vm13  ;;  %v3958_v12 = vand.u32 2147483648, %v7491_v1  ;;  %v3012_v62 = vadd.f32 %v3011_v58, %v2898_v35 }
 0x31b   : > { %v4077_v45 = vpop.permute.xlu0 %4076  ;;  %vm3952_vm8 = vweird.f32 %v7491_v1  ;;  %vm3957_vm1 = vcmp.eq.f32.partialorder %v3956_v19, 8.507059e+37 }
 0x31c   : > { %v3443_v7 = vsub.f32 0.0, %v7500_v37  ;;  %v4161_v60 = vmul.f32 %v4077_v45, %v7128_v14  ;;  %v3935_v8 = vmul.f32 %v4977_v56, %v3934_v63  ;;  %v3959_v40 = vor.u32 1.1754944e-38, %v3958_v12 }
 0x31d   : > { %v3178_v11 = vpop.f32.mrf.mxu2 }
 0x31e   : > { %v4979_v36 = vpop.eup %4978  ;;  %v3504_v25 = vmul.f32 1.442695, %v3443_v7  ;;  %v4193_v39 = vadd.f32 %v5010_v43, %v4161_v60  ;;  %v3214_v41 = vadd.f32 %v3178_v11, %v3009_v30  ;;  %v3936_v6 = vadd.f32 %v4977_v56, %v3935_v8 }
 0x31f   : > { %v4981_v3 = vpop.eup %4980  ;;  %v7509_v22 = vadd.f32 1.0, %v4979_v36 }
 0x320   : > { %4982 = vpow2.f32 %v3504_v25  ;;  %4225 = vst.msk [vmem:[%s7260_s30 + $0x58] sm:$0xff] %vm7765_vm10, %v4193_v39  ;;  %v3376_v14 = vadd.f32 %v3340_v24, %v3214_v41  ;;  %v3940_v9 = vsel %vm3939_vm3, %v4977_v56, %v3936_v6  ;;  %v3948_v23 = vmul.f32 %v4981_v3, %v7491_v1  ;;  %v5013_v6 = vld [vmem:[%s5087_s23 + $0x80] sm:$0xff] }
 0x321   : > { %4984 = vrcp.f32 %v7509_v22  ;;  %v3945_v44 = vsel %vm3942_vm5, %v3944_v34, %v3940_v9  ;;  %vm3953_vm12 = vweird.f32 %v4981_v3  ;;  %v3973_v20 = vand.u32 2147483648, %v7509_v22  ;;  %vm7768_vm5 = vmmov %vm7766_vm0 }
 0x322   : > { %v7518_v50 = vadd.f32 %v5011_v31, %v3376_v14  ;;  %4106 = vrot.lane.b32.xlu0 %v3945_v44, %s5039_s25  ;;  %v3949_v38 = vsub.f32 1.0, %v3948_v23  ;;  %v3343_v53 = vpop.f32.mrf.mxu3  ;;  %vm3954_vm6 = vmor %vm3952_vm8, %vm3953_vm12  ;;  %v3971_v24 = vand.u32 2147483647, %v7509_v22  ;;  %vm3967_vm7 = vweird.f32 %v7509_v22 }
 0x323   : > { %v4079_v27 = vpop.permute.xlu1 %4078  ;;  %v3974_v34 = vor.u32 1.1754944e-38, %v3973_v20 }
 0x324   : > { %v3444_v15 = vsub.f32 0.0, %v7518_v50  ;;  %v3950_v18 = vmul.f32 %v4981_v3, %v3949_v38  ;;  %v4162_v46 = vmul.f32 %v4079_v27, %v7160_v55  ;;  %vm3972_vm14 = vcmp.eq.f32.partialorder %v3971_v24, 8.507059e+37  ;;  %v5016_v24 = vld [vmem:[%s5087_s23 + $0x98] sm:$0xff] }
 0x325   : > { %v3181_v54 = vpop.f32.mrf.mxu2 }
 0x326   : > { %v4983_v47 = vpop.eup %4982  ;;  %v3506_v56 = vmul.f32 1.442695, %v3444_v15  ;;  %v3215_v51 = vadd.f32 %v3181_v54, %v3012_v62  ;;  %v3951_v10 = vadd.f32 %v4981_v3, %v3950_v18  ;;  %v4194_v21 = vadd.f32 %v5012_v42, %v4162_v46  ;;  %v5014_v15 = vld [vmem:[%s5087_s23 + $0x70] sm:$0xff] }
 0x327   : > { %v4985_v13 = vpop.eup %4984  ;;  %v3539_v2 = vadd.f32 1.0, %v4983_v47 }
 0x328   : > { %4986 = vpow2.f32 %v3506_v56  ;;  %v3377_v63 = vadd.f32 %v3343_v53, %v3215_v51  ;;  %v3955_v30 = vsel %vm3954_vm6, %v4981_v3, %v3951_v10  ;;  %v3963_v55 = vmul.f32 %v4985_v13, %v7509_v22  ;;  %4226 = vst.msk [vmem:[%s7260_s30 + $0x60] sm:$0xff] %vm7766_vm0, %v4194_v21  ;;  %v5015_v53 = vld [vmem:[%s5087_s23 + $0x78] sm:$0xff]  ;;  %vm7769_vm6 = vmmov %vm7766_vm0 }
 0x329   : > { %4988 = vrcp.f32 %v3539_v2  ;;  %v3960_v45 = vsel %vm3957_vm1, %v3959_v40, %v3955_v30  ;;  %vm3968_vm4 = vweird.f32 %v4985_v13  ;;  %v3988_v58 = vand.u32 2147483648, %v3539_v2 }
 0x32a   : > { %v7530_v33 = vadd.f32 %v5011_v31, %v3377_v63  ;;  %4108 = vrot.lane.b32.xlu1 %v3960_v45, %s5039_s25  ;;  %v3964_v1 = vsub.f32 1.0, %v3963_v55  ;;  %vm3969_vm15 = vmor %vm3967_vm7, %vm3968_vm4  ;;  %v3986_v31 = vand.u32 2147483647, %v3539_v2  ;;  %vm3982_vm13 = vweird.f32 %v3539_v2 }
 0x32b   : > { %v4087_v60 = vpop.permute.xlu2 %4086  ;;  %v3989_v18 = vor.u32 1.1754944e-38, %v3988_v58 }
 0x32c   : > { %v3445_v7 = vsub.f32 0.0, %v7530_v33  ;;  %v3965_v8 = vmul.f32 %v4985_v13, %v3964_v1  ;;  %v4166_v11 = vmul.f32 %v4087_v60, %v7247_v61  ;;  %vm3987_vm3 = vcmp.eq.f32.partialorder %v3986_v31, 8.507059e+37 }
 0x32e   : > { %v4987_v36 = vpop.eup %4986  ;;  %v3508_v25 = vmul.f32 1.442695, %v3445_v7  ;;  %v3966_v43 = vadd.f32 %v4985_v13, %v3965_v8  ;;  %v4198_v3 = vadd.f32 %v5013_v6, %v4166_v11  ;;  %v5017_v6 = vld [vmem:[%s5087_s23 + $0x88] sm:$0xff] }
 0x32f   : > { %v4989_v39 = vpop.eup %4988  ;;  %v3540_v41 = vadd.f32 1.0, %v4987_v36 }
 0x330   : > { %4990 = vpow2.f32 %v3508_v25  ;;  %v3970_v14 = vsel %vm3969_vm15, %v4985_v13, %v3966_v43  ;;  %v3978_v9 = vmul.f32 %v4989_v39, %v3539_v2  ;;  %4230 = vst.msk [vmem:[%s7260_s30 + $0x80] sm:$0xff] %vm7767_vm9, %v4198_v3  ;;  %vm3983_vm11 = vweird.f32 %v4989_v39  ;;  %vm7770_vm15 = vmmov %vm7768_vm5 }
 0x331   : > { %4992 = vrcp.f32 %v3540_v41  ;;  %v3975_v61 = vsel %vm3972_vm14, %v3974_v34, %v3970_v14  ;;  %vm3984_vm2 = vmor %vm3982_vm13, %vm3983_vm11  ;;  %v4003_v51 = vand.u32 2147483648, %v3540_v41  ;;  %v4001_v2 = vand.u32 2147483647, %v3540_v41 }
 0x332   : > { %4110 = vrot.lane.b32.xlu2 %v3975_v61, %s5039_s25  ;;  %v3979_v23 = vsub.f32 1.0, %v3978_v9  ;;  %vm3997_vm12 = vweird.f32 %v3540_v41  ;;  %vm7771_vm9 = vmmov %vm7768_vm5  ;;  %v5018_v9 = vld [vmem:[%s5087_s23 + $0x90] sm:$0xff] }
 0x333   : > { %v4083_v22 = vpop.permute.xlu0 %4082  ;;  %v4004_v63 = vor.u32 1.1754944e-38, %v4003_v51  ;;  %vm4002_vm1 = vcmp.eq.f32.partialorder %v4001_v2, 8.507059e+37  ;;  %vm7772_vm11 = vmmov %vm7768_vm5 }
 0x334   : > { %v3980_v44 = vmul.f32 %v4989_v39, %v3979_v23  ;;  %v4164_v38 = vmul.f32 %v4083_v22, %v7211_v49  ;;  %vm7773_vm13 = vmmov %vm7768_vm5 }
 0x336   : > { %v4991_v35 = vpop.eup %4990  ;;  %v3981_v19 = vadd.f32 %v4989_v39, %v3980_v44  ;;  %v4196_v27 = vadd.f32 %v5014_v15, %v4164_v38 }
 0x337   : > { %v4993_v12 = vpop.eup %4992  ;;  %v3541_v62 = vadd.f32 1.0, %v4991_v35 }
 0x338   : > { %v3985_v46 = vsel %vm3984_vm2, %v4989_v39, %v3981_v19  ;;  %v3993_v54 = vmul.f32 %v4993_v12, %v3540_v41  ;;  %4228 = vst.msk [vmem:[%s7260_s30 + $0x70] sm:$0xff] %vm7768_vm5, %v4196_v27  ;;  %vm3998_vm10 = vweird.f32 %v4993_v12  ;;  %vm7774_vm2 = vmmov %vm7768_vm5 }
 0x339   : > { %4994 = vrcp.f32 %v3541_v62  ;;  %v3990_v47 = vsel %vm3987_vm3, %v3989_v18, %v3985_v46  ;;  %vm3999_vm8 = vmor %vm3997_vm12, %vm3998_vm10  ;;  %v4018_v20 = vand.u32 2147483648, %v3541_v62  ;;  %v4016_v8 = vand.u32 2147483647, %v3541_v62 }
 0x33a   : > { %4112 = vrot.lane.b32.xlu0 %v3990_v47, %s5039_s25  ;;  %v3994_v49 = vsub.f32 1.0, %v3993_v54  ;;  %vm4012_vm4 = vweird.f32 %v3541_v62  ;;  %vm7775_vm3 = vmmov %vm7774_vm2 }
 0x33b   : > { %v4085_v56 = vpop.permute.xlu1 %4084  ;;  %v4019_v25 = vor.u32 1.1754944e-38, %v4018_v20  ;;  %vm4017_vm14 = vcmp.eq.f32.partialorder %v4016_v8, 8.507059e+37  ;;  %vm7776_vm5 = vmmov %vm7774_vm2  ;;  %v5029_v20 = vld [vmem:[%s5087_s23 + $0xe8] sm:$0xff]  ;;  %v5030_v8 = vld [vmem:[%s5087_s23 + $0xf0] sm:$0xff] }
 0x33c   : > { %v4165_v10 = vmul.f32 %v4085_v56, %v7229_v52  ;;  %v3995_v13 = vmul.f32 %v4993_v12, %v3994_v49  ;;  %vm7777_vm10 = vmmov %vm7774_vm2 }
 0x33d   : > { %vm7778_vm12 = vmmov %vm7774_vm2 }
 0x33e   : > { %v4197_v42 = vadd.f32 %v5015_v53, %v4165_v10  ;;  %v3996_v21 = vadd.f32 %v4993_v12, %v3995_v13 }
 0x33f   : > { %v4995_v40 = vpop.eup %4994 }
 0x340   : > { %4229 = vst.msk [vmem:[%s7260_s30 + $0x78] sm:$0xff] %vm7769_vm6, %v4197_v42  ;;  %v4000_v30 = vsel %vm3999_vm8, %v4993_v12, %v3996_v21  ;;  %v4008_v55 = vmul.f32 %v4995_v40, %v3541_v62  ;;  %vm4013_vm0 = vweird.f32 %v4995_v40  ;;  %vm7779_vm8 = vmmov %vm7774_vm2 }
 0x341   : > { %v4005_v45 = vsel %vm4002_vm1, %v4004_v63, %v4000_v30  ;;  %vm4014_vm7 = vmor %vm4012_vm4, %vm4013_vm0 }
 0x342   : > { %4114 = vrot.lane.b32.xlu1 %v4005_v45, %s5039_s25  ;;  %v4009_v52 = vsub.f32 1.0, %v4008_v55  ;;  %vm7780_vm6 = vmmov %vm7774_vm2  ;;  %v5028_v45 = vld [vmem:[%s5087_s23 + $0xf8] sm:$0xff] }
 0x343   : > { %v4093_v1 = vpop.permute.xlu2 %4092  ;;  %vm7781_vm1 = vmmov %vm7774_vm2 }
 0x344   : > { %v4169_v7 = vmul.f32 %v4093_v1, %v7317_v26  ;;  %v4010_v60 = vmul.f32 %v4995_v40, %v4009_v52  ;;  %vm7782_vm0 = vmmov %vm7781_vm1 }
 0x345   : > { %vm7783_vm4 = vmmov %vm7782_vm0 }
 0x346   : > { %v4201_v11 = vadd.f32 %v5016_v24, %v4169_v7  ;;  %v4011_v36 = vadd.f32 %v4995_v40, %v4010_v60 }
 0x348   : > { %4233 = vst.msk [vmem:[%s7260_s30 + $0x98] sm:$0xff] %vm7770_vm15, %v4201_v11  ;;  %v4015_v43 = vsel %vm4014_vm7, %v4995_v40, %v4011_v36  ;;  %vm7784_vm7 = vmmov %vm7782_vm0 }
 0x349   : > { %v4020_v39 = vsel %vm4017_vm14, %v4019_v25, %v4015_v43 }
 0x34a   : > { %4116 = vrot.lane.b32.xlu2 %v4020_v39, %s5039_s25 }
 0x34b   : > { %v4089_v26 = vpop.permute.xlu0 %4088 }
 0x34c   : > { %v4167_v41 = vmul.f32 %v4089_v26, %v7281_v28  ;;  %v5019_v28 = vld [vmem:[%s5087_s23 + $0xb0] sm:$0xff] }
 0x34e   : > { %v4199_v3 = vadd.f32 %v5017_v6, %v4167_v41 }
 0x350   : > { %4231 = vst.msk [vmem:[%s7260_s30 + $0x88] sm:$0xff] %vm7771_vm9, %v4199_v3 }
 0x353   : > { %v4091_v34 = vpop.permute.xlu1 %4090 }
 0x354   : > { %v4168_v14 = vmul.f32 %v4091_v34, %v7299_v0  ;;  %v5020_v0 = vld [vmem:[%s5087_s23 + $0xa0] sm:$0xff] }
 0x356   : > { %v4200_v61 = vadd.f32 %v5018_v9, %v4168_v14 }
 0x358   : > { %4232 = vst.msk [vmem:[%s7260_s30 + $0x90] sm:$0xff] %vm7772_vm11, %v4200_v61 }
 0x35d   : > { %v4099_v23 = vpop.permute.xlu2 %4098 }
 0x35e   : > { %v4172_v58 = vmul.f32 %v4099_v23, %v7379_v59  ;;  %v5021_v59 = vld [vmem:[%s5087_s23 + $0xa8] sm:$0xff] }
 0x360   : > { %v4204_v22 = vadd.f32 %v5019_v28, %v4172_v58 }
 0x362   : > { %4236 = vst.msk [vmem:[%s7260_s30 + $0xb0] sm:$0xff] %vm7773_vm13, %v4204_v22 }
 0x363   : > { %v4095_v44 = vpop.permute.xlu0 %4094 }
 0x364   : > { %v4170_v31 = vmul.f32 %v4095_v44, %v7337_v4  ;;  %v5022_v4 = vld [vmem:[%s5087_s23 + $0xc8] sm:$0xff] }
 0x366   : > { %v4202_v38 = vadd.f32 %v5020_v0, %v4170_v31 }
 0x368   : > { %4234 = vst.msk [vmem:[%s7260_s30 + $0xa0] sm:$0xff] %vm7774_vm2, %v4202_v38 }
 0x36b   : > { %v4097_v35 = vpop.permute.xlu1 %4096 }
 0x36c   : > { %v4171_v19 = vmul.f32 %v4097_v35, %v7357_v16  ;;  %v5023_v16 = vld [vmem:[%s5087_s23 + $0xb8] sm:$0xff] }
 0x36e   : > { %v4203_v12 = vadd.f32 %v5021_v59, %v4171_v19 }
 0x370   : > { %4235 = vst.msk [vmem:[%s7260_s30 + $0xa8] sm:$0xff] %vm7775_vm3, %v4203_v12 }
 0x374   : > { %v4105_v62 = vpop.permute.xlu2 %4104 }
 0x375   : > { %v4175_v15 = vmul.f32 %v4105_v62, %v7436_v32  ;;  %v5024_v32 = vld [vmem:[%s5087_s23 + $0xc0] sm:$0xff] }
 0x377   : > { %v4207_v27 = vadd.f32 %v5022_v4, %v4175_v15 }
 0x379   : > { %4239 = vst.msk [vmem:[%s7260_s30 + $0xc8] sm:$0xff] %vm7776_vm5, %v4207_v27 }
 0x37c   : > { %v4101_v18 = vpop.permute.xlu0 %4100 }
 0x37d   : > { %v4173_v46 = vmul.f32 %v4101_v18, %v7401_v29  ;;  %v5025_v29 = vld [vmem:[%s5087_s23 + $0xe0] sm:$0xff] }
 0x37f   : > { %v4205_v54 = vadd.f32 %v5023_v16, %v4173_v46 }
 0x381   : > { %4237 = vst.msk [vmem:[%s7260_s30 + $0xb8] sm:$0xff] %vm7777_vm10, %v4205_v54 }
 0x384   : > { %v4103_v47 = vpop.permute.xlu1 %4102 }
 0x385   : > { %v4174_v49 = vmul.f32 %v4103_v47, %v7419_v5  ;;  %v5026_v5 = vld [vmem:[%s5087_s23 + $0xd0] sm:$0xff] }
 0x387   : > { %v4206_v56 = vadd.f32 %v5024_v32, %v4174_v49 }
 0x389   : > { %4238 = vst.msk [vmem:[%s7260_s30 + $0xc0] sm:$0xff] %vm7778_vm12, %v4206_v56 }
 0x38c   : > { %v4111_v51 = vpop.permute.xlu2 %4110 }
 0x38d   : > { %v4178_v10 = vmul.f32 %v4111_v51, %v7483_v57  ;;  %v5027_v57 = vld [vmem:[%s5087_s23 + $0xd8] sm:$0xff] }
 0x38f   : > { %v4210_v13 = vadd.f32 %v5025_v29, %v4178_v10 }
 0x391   : > { %4242 = vst.msk [vmem:[%s7260_s30 + $0xe0] sm:$0xff] %vm7779_vm8, %v4210_v13 }
 0x394   : > { %v4107_v2 = vpop.permute.xlu0 %4106 }
 0x395   : > { %v4176_v53 = vmul.f32 %v4107_v2, %v7451_v48 }
 0x397   : > { %v4208_v42 = vadd.f32 %v5026_v5, %v4176_v53 }
 0x399   : > { %4240 = vst.msk [vmem:[%s7260_s30 + $0xd0] sm:$0xff] %vm7780_vm6, %v4208_v42 }
 0x39c   : > { %v4109_v21 = vpop.permute.xlu1 %4108 }
 0x39d   : > { %v4177_v40 = vmul.f32 %v4109_v21, %v7467_v17 }
 0x39f   : > { %v4209_v63 = vadd.f32 %v5027_v57, %v4177_v40 }
 0x3a1   : > { %4241 = vst.msk [vmem:[%s7260_s30 + $0xd8] sm:$0xff] %vm7781_vm1, %v4209_v63 }
 0x3a4   : > { %v4117_v30 = vpop.permute.xlu2 %4116 }
 0x3a5   : > { %v4181_v55 = vmul.f32 %v4117_v30, %v7530_v33 }
 0x3a7   : > { %v4213_v48 = vadd.f32 %v5028_v45, %v4181_v55 }
 0x3a9   : > { %4245 = vst.msk [vmem:[%s7260_s30 + $0xf8] sm:$0xff] %vm7782_vm0, %v4213_v48 }
 0x3ac   : > { %v4113_v52 = vpop.permute.xlu0 %4112 }
 0x3ad   : > { %v4179_v1 = vmul.f32 %v4113_v52, %v7500_v37 }
 0x3af   : > { %v4211_v7 = vadd.f32 %v5029_v20, %v4179_v1 }
 0x3b1   : > { %4243 = vst.msk [vmem:[%s7260_s30 + $0xe8] sm:$0xff] %vm7783_vm4, %v4211_v7 }
 0x3b4   : > { %v4115_v17 = vpop.permute.xlu1 %4114 }
 0x3b5   : > { %v4180_v60 = vmul.f32 %v4115_v17, %v7518_v50 }
 0x3b7   : > { %v4212_v24 = vadd.f32 %v5030_v8, %v4180_v60 }
 0x3b9   : > { %4244 = vst.msk [vmem:[%s7260_s30 + $0xf0] sm:$0xff] %vm7784_vm7, %v4212_v24 }
 0x3ba PF: > { %s15_s18 = sadd.s32 1, %s5037_s18  }
 0x3bb   : > { %p12_p4 = scmp.ge.s32.totalorder %s15_s18, 4  }
 0x3bd   :  { %14 = sbr.rel (!%p12_p4) target bundleno = 1 (0x1), region = 76 }

</bundles_post_ra>
